<compile_context>
chip_gen: v7x
topology: tpu7x:2x2x1
jax: 0.10.0
libtpu: 0.0.40
codegen_flags: <defaults>
</compile_context>

<pallas_src>
import functools

import jax
import jax.numpy as jnp
from jax.experimental import pallas as pl
from jax.experimental.pallas import tpu as pltpu


_K = 4           # conv kernel size of every ConvTranspose2d
_TM_MAX = 512    # max rows per M tile
_TC_MAX = 2048   # max output columns per tile (multiple of 128)
_BN_EPS = 1e-5

_LAYERS = (
    dict(name="l1", cin=100, cout=512, use_bn=True),   # ConvT(100,512,4,1,0)+BN+ReLU
    dict(name="l2", cin=512, cout=256, use_bn=True),   # ConvT(512,256,4,2,1)+BN+ReLU
    dict(name="l3", cin=256, cout=128, use_bn=True),   # ConvT(256,128,4,2,1)+BN+ReLU
    dict(name="l4", cin=128, cout=3, use_bn=False),    # ConvT(128,  3,4,2,1)+Tanh
)


def _round_up(x, m):
    return ((x + m - 1) // m) * m


def _derive_m_tile(m):
    if m <= _TM_MAX:
        return m                      # block == full dim is always legal
    for tm in (512, 256, 128, 64, 32, 16, 8):
        if m % tm == 0:
            return tm
    return m


@functools.lru_cache(maxsize=None)
def _vmem_limit_bytes():
    """Generation-tuned scoped-VMEM limit: ~3/4 of physical, capped at 96 MiB
    (v5e/v6e: 128 MiB parts -> 96 MiB; v7x: 64 MiB part -> 48 MiB)."""
    try:
        cap = int(pltpu.get_tpu_info().vmem_capacity_bytes)
    except Exception:
        return 32 * 1024 * 1024
    return max(32 * 1024 * 1024, min(cap * 3 // 4, 96 * 1024 * 1024))


# ----------------------------------------------------------------------------
# Pallas kernel: one (tm, Kp) x (Kp, tc) MXU matmul per grid step.
#   bf16 operands -> f32 accumulation -> optional tanh -> bf16 store.
#   For BN layers the kernel additionally emits per-block column sum and
#   sum-of-squares (taken from the f32 result, before any bf16 rounding).
# ----------------------------------------------------------------------------
def _convmm_kernel(x_ref, w_ref, o_ref, *stats_refs, act, compute_stats):
    y = jnp.dot(x_ref[0], w_ref[0], preferred_element_type=jnp.float32)
    if compute_stats:
        sum_ref, sumsq_ref = stats_refs
        sum_ref[...] = jnp.sum(y, axis=0, keepdims=True).reshape(sum_ref.shape)
        sumsq_ref[...] = jnp.sum(y * y, axis=0,
                                 keepdims=True).reshape(sumsq_ref.shape)
    if act == "tanh":
        y = jnp.tanh(y)
    elif act == "relu":
        y = jnp.maximum(y, 0.0)
    o_ref[0] = y.astype(o_ref.dtype)


def _pallas_conv_matmul(X, W, *, act, compute_stats):
    """X:(P,M,Kp) bf16 @ W:(P,Kp,Cp) bf16 -> Y:(P,M,Cp) bf16 [+ f32 stats]."""
    P, M, Kp = X.shape
    _, _, Cp = W.shape
    tm = _derive_m_tile(M)
    tc = min(Cp, _TC_MAX)
    n_m, n_c = M // tm, Cp // tc

    out_shape = jax.ShapeDtypeStruct((P, M, Cp), jnp.bfloat16)
    out_spec = pl.BlockSpec((1, tm, tc), lambda p, m, c: (p, m, c))
    if compute_stats:
        stat_shape = jax.ShapeDtypeStruct((P, n_m, 1, Cp), jnp.float32)
        stat_spec = pl.BlockSpec((1, 1, 1, tc), lambda p, m, c: (p, m, 0, c))
        out_shape = (out_shape, stat_shape, stat_shape)
        out_spec = (out_spec, stat_spec, stat_spec)

    kernel = functools.partial(_convmm_kernel, act=act,
                               compute_stats=compute_stats)
    return pl.pallas_call(
        kernel,
        out_shape=out_shape,
        grid=(P, n_m, n_c),
        in_specs=[
            pl.BlockSpec((1, tm, Kp), lambda p, m, c: (p, m, 0)),
            pl.BlockSpec((1, Kp, tc), lambda p, m, c: (p, 0, c)),
        ],
        out_specs=out_spec,
        compiler_params=pltpu.CompilerParams(
            dimension_semantics=("parallel", "parallel", "parallel"),
            vmem_limit_bytes=_vmem_limit_bytes(),
        ),
    )(X, W)


# ----------------------------------------------------------------------------
# Plain-JAX glue: BN finalize / apply, sub-pixel im2col, phase recombination.
# ----------------------------------------------------------------------------
def _bn_affine(bn_sum, bn_sumsq, gamma, beta, *, count, spatial):
    """Finalize BN: per-block sums (P, n_m, 1, spatial*C) -> scale/shift (C,)."""
    c = gamma.shape[0]
    s1 = jnp.sum(bn_sum, axis=(0, 1, 2)).reshape(spatial, c).sum(axis=0)
    s2 = jnp.sum(bn_sumsq, axis=(0, 1, 2)).reshape(spatial, c).sum(axis=0)
    mean = s1 / count
    var = jnp.maximum(s2 / count - mean * mean, 0.0)   # biased (training) var
    scale = gamma * jax.lax.rsqrt(var + _BN_EPS)
    shift = beta - mean * scale
    return scale, shift


def _apply_bn_relu(x, scale, shift):
    """Per-channel affine (BN) + ReLU on an NHWC bf16 tensor (f32 math)."""
    y = x.astype(jnp.float32) * scale + shift
    return jnp.maximum(y, 0.0).astype(jnp.bfloat16)


def _subpixel_im2col(x):
    """x:(N,H,W,C) -> X:(4, N*H*W, 4*C).  Phase p = 2*ph_h + ph_w produces the
    output pixels (2*qh+ph_h, 2*qw+ph_w); columns are ordered (o_h, o_w, c)."""
    n, h, w, c = x.shape
    xp = jnp.pad(x, ((0, 0), (1, 1), (1, 1), (0, 0)))
    phases = []
    for ph_h in range(2):
        for ph_w in range(2):
            taps = [xp[:, ph_h + o_h:ph_h + o_h + h,
                       ph_w + o_w:ph_w + o_w + w, :]
                    for o_h in range(2) for o_w in range(2)]
            phases.append(jnp.stack(taps, axis=3).reshape(n * h * w, 4 * c))
    return jnp.stack(phases, axis=0)


def _phase_merge(y, n, h, w, c):
    """y:(4, N*H*W, C) per-phase outputs -> (N, 2H, 2W, C)."""
    y = y.reshape(2, 2, n, h, w, c)
    y = jnp.transpose(y, (2, 3, 0, 4, 1, 5))
    return y.reshape(n, 2 * h, 2 * w, c)


def _subpixel_weight_matrices(wt):
    """wt:(Cin,Cout,4,4) -> (4, 2*2*Cin, Cout).  Output pixel parity ph uses
    kernel taps kh = 3 - 2*o_h - ph_h, kw = 3 - 2*o_w - ph_w."""
    cin, cout = wt.shape[0], wt.shape[1]
    mats = []
    for ph_h in range(2):
        for ph_w in range(2):
            taps = [wt[:, :, 3 - 2 * o_h - ph_h, 3 - 2 * o_w - ph_w]
                    for o_h in range(2) for o_w in range(2)]
            mats.append(jnp.stack(taps, axis=0).reshape(4 * cin, cout))
    return jnp.stack(mats, axis=0)


# ----------------------------------------------------------------------------
# Generator parameters.
# ----------------------------------------------------------------------------
def init_generator_params(key):
    """Raw PyTorch-layout parameters (ConvTranspose2d weight: (Cin,Cout,K,K))."""
    ks = jax.random.split(key, len(_LAYERS))
    raw = {}
    for k, cfg in zip(ks, _LAYERS):
        raw[cfg["name"] + "_w"] = (
            jax.random.normal(k, (cfg["cin"], cfg["cout"], _K, _K), jnp.float32)
            * 0.05)
        if cfg["use_bn"]:
            raw[cfg["name"] + "_g"] = jnp.ones((cfg["cout"],), jnp.float32)
            raw[cfg["name"] + "_b"] = jnp.zeros((cfg["cout"],), jnp.float32)
    return raw


def prepare_generator_params(raw):
    """One-time weight packing: matmul layout + K/C padding + bf16 cast."""
    prepared = []
    # layer 1: (Cin,Cout,4,4) -> (Cin, kh*kw*Cout), K rows padded 100 -> 128.
    w1 = raw["l1_w"]
    cin = w1.shape[0]
    w1m = jnp.transpose(w1, (0, 2, 3, 1)).reshape(cin, _K * _K * w1.shape[1])
    w1m = jnp.pad(w1m, ((0, _round_up(cin, 128) - cin), (0, 0)))[None]
    prepared.append(dict(W=w1m.astype(jnp.bfloat16),
                         gamma=raw["l1_g"], beta=raw["l1_b"]))
    # layers 2..4: 4-phase sub-pixel weight matrices, Cout padded to 128.
    for cfg in _LAYERS[1:]:
        cin, cout = cfg["cin"], cfg["cout"]
        wm = _subpixel_weight_matrices(raw[cfg["name"] + "_w"])  # (4,4*cin,cout)
        kp = _round_up(4 * cin, 128)
        cp = _round_up(cout, 128)
        wm = jnp.pad(wm, ((0, 0), (0, kp - 4 * cin), (0, cp - cout)))
        entry = dict(W=wm.astype(jnp.bfloat16))
        if cfg["use_bn"]:
            entry["gamma"] = raw[cfg["name"] + "_g"]
            entry["beta"] = raw[cfg["name"] + "_b"]
        prepared.append(entry)
    return prepared


# ----------------------------------------------------------------------------
# Forward: ConvT(100->512,4,1,0)+BN+ReLU -> ConvT(512->256,4,2,1)+BN+ReLU ->
#          ConvT(256->128,4,2,1)+BN+ReLU -> ConvT(128->3,4,2,1)+Tanh
# ----------------------------------------------------------------------------
@jax.jit
def generator_forward(prepared, z_nchw):
    n = z_nchw.shape[0]

    # ---- layer 1: 1x1-input ConvT == plain matmul (no im2col, no zeros) ----
    p1 = prepared[0]
    kp1 = p1["W"].shape[1]
    mp = _round_up(n, 8)                               # sublane-align tiny M
    z = z_nchw.reshape(n, -1).astype(jnp.bfloat16)
    x1 = jnp.zeros((1, mp, kp1), jnp.bfloat16).at[0, :n, :z.shape[1]].set(z)
    y, s1, s2 = _pallas_conv_matmul(x1, p1["W"], act=None, compute_stats=True)
    x = y[0, :n].reshape(n, _K, _K, _LAYERS[0]["cout"])        # NHWC, pre-BN
    scale, shift = _bn_affine(s1, s2, p1["gamma"], p1["beta"],
                              count=n * _K * _K, spatial=_K * _K)

    # ---- layers 2..4: stride-2 ConvT via 4-phase sub-pixel matmuls ---------
    for cfg, lay in zip(_LAYERS[1:], prepared[1:]):
        x = _apply_bn_relu(x, scale, shift)    # BN+ReLU of the previous layer
        nn, h, w, _ = x.shape
        xi = _subpixel_im2col(x)                           # (4, n*h*w, 4*cin)
        kp = lay["W"].shape[1]
        if xi.shape[-1] != kp:
            xi = jnp.pad(xi, ((0, 0), (0, 0), (0, kp - xi.shape[-1])))
        if cfg["use_bn"]:
            y, s1, s2 = _pallas_conv_matmul(xi, lay["W"], act=None,
                                            compute_stats=True)
            scale, shift = _bn_affine(s1, s2, lay["gamma"], lay["beta"],
                                      count=4 * nn * h * w, spatial=1)
        else:
            y = _pallas_conv_matmul(xi, lay["W"], act="tanh",
                                    compute_stats=False)
        cout = cfg["cout"]
        x = _phase_merge(y[:, :, :cout], nn, h, w, cout)   # (N, 2H, 2W, cout)

    return jnp.transpose(x, (0, 3, 1, 2)).astype(jnp.float32)  # NCHW


# ----------------------------------------------------------------------------
# Pure-JAX f32 reference (training-mode BN), for a loose numerical self-check.
# ----------------------------------------------------------------------------
def _reference_forward(raw, z):
    x = z.astype(jnp.float32)
    specs = (("l1", 1, 0), ("l2", 2, 1), ("l3", 2, 1), ("l4", 2, 1))
    for cfg, (name, stride, pad) in zip(_LAYERS, specs):
        wt = raw[name + "_w"]
        wf = jnp.transpose(wt[:, :, ::-1, ::-1], (1, 0, 2, 3))   # (Cout,Cin,K,K)
        x = jax.lax.conv_general_dilated(
            x, wf, window_strides=(1, 1),
            padding=[(_K - 1 - pad,) * 2] * 2,
            lhs_dilation=(stride, stride),
            dimension_numbers=("NCHW", "OIHW", "NCHW"),
            precision=jax.lax.Precision.HIGHEST)
        if cfg["use_bn"]:
            mean = x.mean(axis=(0, 2, 3), keepdims=True)
            var = jnp.square(x - mean).mean(axis=(0, 2, 3), keepdims=True)
            x = (x - mean) * jax.lax.rsqrt(var + _BN_EPS)
            x = x * raw[name + "_g"].reshape(1, -1, 1, 1)
            x = x + raw[name + "_b"].reshape(1, -1, 1, 1)
            x = jnp.maximum(x, 0.0)
        else:
            x = jnp.tanh(x)
    return x


if __name__ == "__main__":
    key = jax.random.PRNGKey(0)
    pkey, zkey = jax.random.split(key)
    raw = init_generator_params(pkey)
    prepared = prepare_generator_params(raw)

    batch = 2
    z = jax.random.normal(zkey, (batch, 100, 1, 1), jnp.float32)

    out = jax.block_until_ready(generator_forward(prepared, z))
    assert out.shape == (batch, 3, 32, 32), out.shape
    assert bool(jnp.all(jnp.isfinite(out)))
    assert bool(jnp.all(jnp.abs(out) <= 1.0 + 1e-6))     # tanh output range

    # bf16-operand / f32-accumulation kernel vs. f32 reference (loose bound).
    ref = jax.block_until_ready(_reference_forward(raw, z))
    err = jnp.abs(out - ref)
    max_err, mean_err = float(jnp.max(err)), float(jnp.mean(err))
    assert max_err < 0.30 and mean_err < 0.03, (max_err, mean_err)

    print("KERNEL_OK")
</pallas_src>

<mosaic_0001>
module attributes {stable_mosaic.version = 11 : i64} {
  func.func @_convmm_kernel(%arg0: i32, %arg1: i32, %arg2: i32, %arg3: memref<1x8x128xbf16, #tpu.memory_space<vmem>>, %arg4: memref<1x128x2048xbf16, #tpu.memory_space<vmem>>, %arg5: memref<1x8x2048xbf16, #tpu.memory_space<vmem>>, %arg6: memref<1x1x1x2048xf32, #tpu.memory_space<vmem>>, %arg7: memref<1x1x1x2048xf32, #tpu.memory_space<vmem>>) attributes {dimension_semantics = [#tpu.dimension_semantics<parallel>, #tpu.dimension_semantics<parallel>, #tpu.dimension_semantics<parallel>], iteration_bounds = array<i64: 1, 1, 4>, scalar_prefetch = 0 : i64, scratch_operands = 0 : i64, tpu.core_type = #tpu.core_type<tc>, window_params = [{transform_indices = @transform_0, window_bounds = array<i64: 1, 8, 128>}, {transform_indices = @transform_1, window_bounds = array<i64: 1, 128, 2048>}, {transform_indices = @transform_2, window_bounds = array<i64: 1, 8, 2048>}, {transform_indices = @transform_3, window_bounds = array<i64: 1, 1, 1, 2048>}, {transform_indices = @transform_4, window_bounds = array<i64: 1, 1, 1, 2048>}]} {
    %c0 = arith.constant 0 : index
    %c0_0 = arith.constant 0 : index
    %c0_1 = arith.constant 0 : index
    %0 = vector.load %arg3[%c0, %c0_0, %c0_1] : memref<1x8x128xbf16, #tpu.memory_space<vmem>>, vector<1x8x128xbf16>
    %1 = vector.shape_cast %0 : vector<1x8x128xbf16> to vector<8x128xbf16>
    %c0_2 = arith.constant 0 : index
    %c0_3 = arith.constant 0 : index
    %c0_4 = arith.constant 0 : index
    %2 = vector.load %arg4[%c0_2, %c0_3, %c0_4] : memref<1x128x2048xbf16, #tpu.memory_space<vmem>>, vector<1x128x2048xbf16>
    %3 = vector.shape_cast %2 : vector<1x128x2048xbf16> to vector<128x2048xbf16>
    %cst = arith.constant dense<0.000000e+00> : vector<8x2048xf32>
    %4 = tpu.matmul %1, %3, %cst {dimension_numbers = #tpu.dot_dimension_numbers<[1], [0], [0], [1], [0, 0, 1, 1], [], []>} : vector<8x128xbf16>, vector<128x2048xbf16>, vector<8x2048xf32> -> vector<8x2048xf32>
    %cst_5 = arith.constant dense<0.000000e+00> : vector<2048xf32>
    %5 = vector.multi_reduction <add>, %4, %cst_5 [0] : vector<8x2048xf32> to vector<2048xf32>
    %6 = vector.shape_cast %5 : vector<2048xf32> to vector<1x2048xf32>
    %7 = vector.shape_cast %6 : vector<1x2048xf32> to vector<1x1x1x2048xf32>
    %c0_6 = arith.constant 0 : index
    %c0_7 = arith.constant 0 : index
    %c0_8 = arith.constant 0 : index
    %c0_9 = arith.constant 0 : index
    %8 = vector.load %arg6[%c0_6, %c0_7, %c0_8, %c0_9] : memref<1x1x1x2048xf32, #tpu.memory_space<vmem>>, vector<1x1x1x2048xf32>
    tpu.vector_store %arg6[%c0_6, %c0_7, %c0_8, %c0_9], %7 {strides = array<i32>} : memref<1x1x1x2048xf32, #tpu.memory_space<vmem>>, vector<1x1x1x2048xf32>,
    %9 = arith.mulf %4, %4 : vector<8x2048xf32>
    %cst_10 = arith.constant dense<0.000000e+00> : vector<2048xf32>
    %10 = vector.multi_reduction <add>, %9, %cst_10 [0] : vector<8x2048xf32> to vector<2048xf32>
    %11 = vector.shape_cast %10 : vector<2048xf32> to vector<1x2048xf32>
    %12 = vector.shape_cast %11 : vector<1x2048xf32> to vector<1x1x1x2048xf32>
    %c0_11 = arith.constant 0 : index
    %c0_12 = arith.constant 0 : index
    %c0_13 = arith.constant 0 : index
    %c0_14 = arith.constant 0 : index
    %13 = vector.load %arg7[%c0_11, %c0_12, %c0_13, %c0_14] : memref<1x1x1x2048xf32, #tpu.memory_space<vmem>>, vector<1x1x1x2048xf32>
    tpu.vector_store %arg7[%c0_11, %c0_12, %c0_13, %c0_14], %12 {strides = array<i32>} : memref<1x1x1x2048xf32, #tpu.memory_space<vmem>>, vector<1x1x1x2048xf32>,
    %14 = arith.truncf %4 : vector<8x2048xf32> to vector<8x2048xbf16>
    %c0_15 = arith.constant 0 : index
    %c0_16 = arith.constant 0 : index
    %c0_17 = arith.constant 0 : index
    %15 = vector.load %arg5[%c0_15, %c0_16, %c0_17] : memref<1x8x2048xbf16, #tpu.memory_space<vmem>>, vector<1x8x2048xbf16>
    %16 = vector.shape_cast %15 : vector<1x8x2048xbf16> to vector<8x2048xbf16>
    %17 = vector.shape_cast %14 : vector<8x2048xbf16> to vector<1x8x2048xbf16>
    tpu.vector_store %arg5[%c0_15, %c0_16, %c0_17], %17 {strides = array<i32>} : memref<1x8x2048xbf16, #tpu.memory_space<vmem>>, vector<1x8x2048xbf16>,
    return
  }
  func.func @transform_0(%arg0: i32, %arg1: i32, %arg2: i32) -> (i32, i32, i32) {
    %c0_i32 = arith.constant 0 : i32
    %c0_i32_0 = arith.constant 0 : i32
    return %arg0, %arg1, %c0_i32 : i32, i32, i32
  }
  func.func @transform_1(%arg0: i32, %arg1: i32, %arg2: i32) -> (i32, i32, i32) {
    %c0_i32 = arith.constant 0 : i32
    %c0_i32_0 = arith.constant 0 : i32
    return %arg0, %c0_i32, %arg2 : i32, i32, i32
  }
  func.func @transform_2(%arg0: i32, %arg1: i32, %arg2: i32) -> (i32, i32, i32) {
    %c0_i32 = arith.constant 0 : i32
    return %arg0, %arg1, %arg2 : i32, i32, i32
  }
  func.func @transform_3(%arg0: i32, %arg1: i32, %arg2: i32) -> (i32, i32, i32, i32) {
    %c0_i32 = arith.constant 0 : i32
    %c0_i32_0 = arith.constant 0 : i32
    return %arg0, %arg1, %c0_i32, %arg2 : i32, i32, i32, i32
  }
  func.func @transform_4(%arg0: i32, %arg1: i32, %arg2: i32) -> (i32, i32, i32, i32) {
    %c0_i32 = arith.constant 0 : i32
    %c0_i32_0 = arith.constant 0 : i32
    return %arg0, %arg1, %c0_i32, %arg2 : i32, i32, i32, i32
  }
}

module attributes {stable_mosaic.version = 11 : i64} {
  func.func @_convmm_kernel(%arg0: i32, %arg1: i32, %arg2: i32, %arg3: memref<1x32x2048xbf16, #tpu.memory_space<vmem>>, %arg4: memref<1x2048x256xbf16, #tpu.memory_space<vmem>>, %arg5: memref<1x32x256xbf16, #tpu.memory_space<vmem>>, %arg6: memref<1x1x1x256xf32, #tpu.memory_space<vmem>>, %arg7: memref<1x1x1x256xf32, #tpu.memory_space<vmem>>) attributes {dimension_semantics = [#tpu.dimension_semantics<parallel>, #tpu.dimension_semantics<parallel>, #tpu.dimension_semantics<parallel>], iteration_bounds = array<i64: 4, 1, 1>, scalar_prefetch = 0 : i64, scratch_operands = 0 : i64, tpu.core_type = #tpu.core_type<tc>, window_params = [{transform_indices = @transform_0, window_bounds = array<i64: 1, 32, 2048>}, {transform_indices = @transform_1, window_bounds = array<i64: 1, 2048, 256>}, {transform_indices = @transform_2, window_bounds = array<i64: 1, 32, 256>}, {transform_indices = @transform_3, window_bounds = array<i64: 1, 1, 1, 256>}, {transform_indices = @transform_4, window_bounds = array<i64: 1, 1, 1, 256>}]} {
    %c0 = arith.constant 0 : index
    %c0_0 = arith.constant 0 : index
    %c0_1 = arith.constant 0 : index
    %0 = vector.load %arg3[%c0, %c0_0, %c0_1] : memref<1x32x2048xbf16, #tpu.memory_space<vmem>>, vector<1x32x2048xbf16>
    %1 = vector.shape_cast %0 : vector<1x32x2048xbf16> to vector<32x2048xbf16>
    %c0_2 = arith.constant 0 : index
    %c0_3 = arith.constant 0 : index
    %c0_4 = arith.constant 0 : index
    %2 = vector.load %arg4[%c0_2, %c0_3, %c0_4] : memref<1x2048x256xbf16, #tpu.memory_space<vmem>>, vector<1x2048x256xbf16>
    %3 = vector.shape_cast %2 : vector<1x2048x256xbf16> to vector<2048x256xbf16>
    %cst = arith.constant dense<0.000000e+00> : vector<32x256xf32>
    %4 = tpu.matmul %1, %3, %cst {dimension_numbers = #tpu.dot_dimension_numbers<[1], [0], [0], [1], [0, 0, 1, 1], [], []>} : vector<32x2048xbf16>, vector<2048x256xbf16>, vector<32x256xf32> -> vector<32x256xf32>
    %cst_5 = arith.constant dense<0.000000e+00> : vector<256xf32>
    %5 = vector.multi_reduction <add>, %4, %cst_5 [0] : vector<32x256xf32> to vector<256xf32>
    %6 = vector.shape_cast %5 : vector<256xf32> to vector<1x256xf32>
    %7 = vector.shape_cast %6 : vector<1x256xf32> to vector<1x1x1x256xf32>
    %c0_6 = arith.constant 0 : index
    %c0_7 = arith.constant 0 : index
    %c0_8 = arith.constant 0 : index
    %c0_9 = arith.constant 0 : index
    %8 = vector.load %arg6[%c0_6, %c0_7, %c0_8, %c0_9] : memref<1x1x1x256xf32, #tpu.memory_space<vmem>>, vector<1x1x1x256xf32>
    tpu.vector_store %arg6[%c0_6, %c0_7, %c0_8, %c0_9], %7 {strides = array<i32>} : memref<1x1x1x256xf32, #tpu.memory_space<vmem>>, vector<1x1x1x256xf32>,
    %9 = arith.mulf %4, %4 : vector<32x256xf32>
    %cst_10 = arith.constant dense<0.000000e+00> : vector<256xf32>
    %10 = vector.multi_reduction <add>, %9, %cst_10 [0] : vector<32x256xf32> to vector<256xf32>
    %11 = vector.shape_cast %10 : vector<256xf32> to vector<1x256xf32>
    %12 = vector.shape_cast %11 : vector<1x256xf32> to vector<1x1x1x256xf32>
    %c0_11 = arith.constant 0 : index
    %c0_12 = arith.constant 0 : index
    %c0_13 = arith.constant 0 : index
    %c0_14 = arith.constant 0 : index
    %13 = vector.load %arg7[%c0_11, %c0_12, %c0_13, %c0_14] : memref<1x1x1x256xf32, #tpu.memory_space<vmem>>, vector<1x1x1x256xf32>
    tpu.vector_store %arg7[%c0_11, %c0_12, %c0_13, %c0_14], %12 {strides = array<i32>} : memref<1x1x1x256xf32, #tpu.memory_space<vmem>>, vector<1x1x1x256xf32>,
    %14 = arith.truncf %4 : vector<32x256xf32> to vector<32x256xbf16>
    %c0_15 = arith.constant 0 : index
    %c0_16 = arith.constant 0 : index
    %c0_17 = arith.constant 0 : index
    %15 = vector.load %arg5[%c0_15, %c0_16, %c0_17] : memref<1x32x256xbf16, #tpu.memory_space<vmem>>, vector<1x32x256xbf16>
    %16 = vector.shape_cast %15 : vector<1x32x256xbf16> to vector<32x256xbf16>
    %17 = vector.shape_cast %14 : vector<32x256xbf16> to vector<1x32x256xbf16>
    tpu.vector_store %arg5[%c0_15, %c0_16, %c0_17], %17 {strides = array<i32>} : memref<1x32x256xbf16, #tpu.memory_space<vmem>>, vector<1x32x256xbf16>,
    return
  }
  func.func @transform_0(%arg0: i32, %arg1: i32, %arg2: i32) -> (i32, i32, i32) {
    %c0_i32 = arith.constant 0 : i32
    %c0_i32_0 = arith.constant 0 : i32
    return %arg0, %arg1, %c0_i32 : i32, i32, i32
  }
  func.func @transform_1(%arg0: i32, %arg1: i32, %arg2: i32) -> (i32, i32, i32) {
    %c0_i32 = arith.constant 0 : i32
    %c0_i32_0 = arith.constant 0 : i32
    return %arg0, %c0_i32, %arg2 : i32, i32, i32
  }
  func.func @transform_2(%arg0: i32, %arg1: i32, %arg2: i32) -> (i32, i32, i32) {
    %c0_i32 = arith.constant 0 : i32
    return %arg0, %arg1, %arg2 : i32, i32, i32
  }
  func.func @transform_3(%arg0: i32, %arg1: i32, %arg2: i32) -> (i32, i32, i32, i32) {
    %c0_i32 = arith.constant 0 : i32
    %c0_i32_0 = arith.constant 0 : i32
    return %arg0, %arg1, %c0_i32, %arg2 : i32, i32, i32, i32
  }
  func.func @transform_4(%arg0: i32, %arg1: i32, %arg2: i32) -> (i32, i32, i32, i32) {
    %c0_i32 = arith.constant 0 : i32
    %c0_i32_0 = arith.constant 0 : i32
    return %arg0, %arg1, %c0_i32, %arg2 : i32, i32, i32, i32
  }
}

module attributes {stable_mosaic.version = 11 : i64} {
  func.func @_convmm_kernel(%arg0: i32, %arg1: i32, %arg2: i32, %arg3: memref<1x128x1024xbf16, #tpu.memory_space<vmem>>, %arg4: memref<1x1024x128xbf16, #tpu.memory_space<vmem>>, %arg5: memref<1x128x128xbf16, #tpu.memory_space<vmem>>, %arg6: memref<1x1x1x128xf32, #tpu.memory_space<vmem>>, %arg7: memref<1x1x1x128xf32, #tpu.memory_space<vmem>>) attributes {dimension_semantics = [#tpu.dimension_semantics<parallel>, #tpu.dimension_semantics<parallel>, #tpu.dimension_semantics<parallel>], iteration_bounds = array<i64: 4, 1, 1>, scalar_prefetch = 0 : i64, scratch_operands = 0 : i64, tpu.core_type = #tpu.core_type<tc>, window_params = [{transform_indices = @transform_0, window_bounds = array<i64: 1, 128, 1024>}, {transform_indices = @transform_1, window_bounds = array<i64: 1, 1024, 128>}, {transform_indices = @transform_2, window_bounds = array<i64: 1, 128, 128>}, {transform_indices = @transform_3, window_bounds = array<i64: 1, 1, 1, 128>}, {transform_indices = @transform_4, window_bounds = array<i64: 1, 1, 1, 128>}]} {
    %c0 = arith.constant 0 : index
    %c0_0 = arith.constant 0 : index
    %c0_1 = arith.constant 0 : index
    %0 = vector.load %arg3[%c0, %c0_0, %c0_1] : memref<1x128x1024xbf16, #tpu.memory_space<vmem>>, vector<1x128x1024xbf16>
    %1 = vector.shape_cast %0 : vector<1x128x1024xbf16> to vector<128x1024xbf16>
    %c0_2 = arith.constant 0 : index
    %c0_3 = arith.constant 0 : index
    %c0_4 = arith.constant 0 : index
    %2 = vector.load %arg4[%c0_2, %c0_3, %c0_4] : memref<1x1024x128xbf16, #tpu.memory_space<vmem>>, vector<1x1024x128xbf16>
    %3 = vector.shape_cast %2 : vector<1x1024x128xbf16> to vector<1024x128xbf16>
    %cst = arith.constant dense<0.000000e+00> : vector<128x128xf32>
    %4 = tpu.matmul %1, %3, %cst {dimension_numbers = #tpu.dot_dimension_numbers<[1], [0], [0], [1], [0, 0, 1, 1], [], []>} : vector<128x1024xbf16>, vector<1024x128xbf16>, vector<128x128xf32> -> vector<128x128xf32>
    %cst_5 = arith.constant dense<0.000000e+00> : vector<128xf32>
    %5 = vector.multi_reduction <add>, %4, %cst_5 [0] : vector<128x128xf32> to vector<128xf32>
    %6 = vector.shape_cast %5 : vector<128xf32> to vector<1x128xf32>
    %7 = vector.shape_cast %6 : vector<1x128xf32> to vector<1x1x1x128xf32>
    %c0_6 = arith.constant 0 : index
    %c0_7 = arith.constant 0 : index
    %c0_8 = arith.constant 0 : index
    %c0_9 = arith.constant 0 : index
    %8 = vector.load %arg6[%c0_6, %c0_7, %c0_8, %c0_9] : memref<1x1x1x128xf32, #tpu.memory_space<vmem>>, vector<1x1x1x128xf32>
    tpu.vector_store %arg6[%c0_6, %c0_7, %c0_8, %c0_9], %7 {strides = array<i32>} : memref<1x1x1x128xf32, #tpu.memory_space<vmem>>, vector<1x1x1x128xf32>,
    %9 = arith.mulf %4, %4 : vector<128x128xf32>
    %cst_10 = arith.constant dense<0.000000e+00> : vector<128xf32>
    %10 = vector.multi_reduction <add>, %9, %cst_10 [0] : vector<128x128xf32> to vector<128xf32>
    %11 = vector.shape_cast %10 : vector<128xf32> to vector<1x128xf32>
    %12 = vector.shape_cast %11 : vector<1x128xf32> to vector<1x1x1x128xf32>
    %c0_11 = arith.constant 0 : index
    %c0_12 = arith.constant 0 : index
    %c0_13 = arith.constant 0 : index
    %c0_14 = arith.constant 0 : index
    %13 = vector.load %arg7[%c0_11, %c0_12, %c0_13, %c0_14] : memref<1x1x1x128xf32, #tpu.memory_space<vmem>>, vector<1x1x1x128xf32>
    tpu.vector_store %arg7[%c0_11, %c0_12, %c0_13, %c0_14], %12 {strides = array<i32>} : memref<1x1x1x128xf32, #tpu.memory_space<vmem>>, vector<1x1x1x128xf32>,
    %14 = arith.truncf %4 : vector<128x128xf32> to vector<128x128xbf16>
    %c0_15 = arith.constant 0 : index
    %c0_16 = arith.constant 0 : index
    %c0_17 = arith.constant 0 : index
    %15 = vector.load %arg5[%c0_15, %c0_16, %c0_17] : memref<1x128x128xbf16, #tpu.memory_space<vmem>>, vector<1x128x128xbf16>
    %16 = vector.shape_cast %15 : vector<1x128x128xbf16> to vector<128x128xbf16>
    %17 = vector.shape_cast %14 : vector<128x128xbf16> to vector<1x128x128xbf16>
    tpu.vector_store %arg5[%c0_15, %c0_16, %c0_17], %17 {strides = array<i32>} : memref<1x128x128xbf16, #tpu.memory_space<vmem>>, vector<1x128x128xbf16>,
    return
  }
  func.func @transform_0(%arg0: i32, %arg1: i32, %arg2: i32) -> (i32, i32, i32) {
    %c0_i32 = arith.constant 0 : i32
    %c0_i32_0 = arith.constant 0 : i32
    return %arg0, %arg1, %c0_i32 : i32, i32, i32
  }
  func.func @transform_1(%arg0: i32, %arg1: i32, %arg2: i32) -> (i32, i32, i32) {
    %c0_i32 = arith.constant 0 : i32
    %c0_i32_0 = arith.constant 0 : i32
    return %arg0, %c0_i32, %arg2 : i32, i32, i32
  }
  func.func @transform_2(%arg0: i32, %arg1: i32, %arg2: i32) -> (i32, i32, i32) {
    %c0_i32 = arith.constant 0 : i32
    return %arg0, %arg1, %arg2 : i32, i32, i32
  }
  func.func @transform_3(%arg0: i32, %arg1: i32, %arg2: i32) -> (i32, i32, i32, i32) {
    %c0_i32 = arith.constant 0 : i32
    %c0_i32_0 = arith.constant 0 : i32
    return %arg0, %arg1, %c0_i32, %arg2 : i32, i32, i32, i32
  }
  func.func @transform_4(%arg0: i32, %arg1: i32, %arg2: i32) -> (i32, i32, i32, i32) {
    %c0_i32 = arith.constant 0 : i32
    %c0_i32_0 = arith.constant 0 : i32
    return %arg0, %arg1, %c0_i32, %arg2 : i32, i32, i32, i32
  }
}

module attributes {stable_mosaic.version = 11 : i64} {
  func.func @_convmm_kernel(%arg0: i32, %arg1: i32, %arg2: i32, %arg3: memref<1x512x512xbf16, #tpu.memory_space<vmem>>, %arg4: memref<1x512x128xbf16, #tpu.memory_space<vmem>>, %arg5: memref<1x512x128xbf16, #tpu.memory_space<vmem>>) attributes {dimension_semantics = [#tpu.dimension_semantics<parallel>, #tpu.dimension_semantics<parallel>, #tpu.dimension_semantics<parallel>], iteration_bounds = array<i64: 4, 1, 1>, scalar_prefetch = 0 : i64, scratch_operands = 0 : i64, tpu.core_type = #tpu.core_type<tc>, window_params = [{transform_indices = @transform_0, window_bounds = array<i64: 1, 512, 512>}, {transform_indices = @transform_1, window_bounds = array<i64: 1, 512, 128>}, {transform_indices = @transform_2, window_bounds = array<i64: 1, 512, 128>}]} {
    %c0 = arith.constant 0 : index
    %c0_0 = arith.constant 0 : index
    %c0_1 = arith.constant 0 : index
    %0 = vector.load %arg3[%c0, %c0_0, %c0_1] : memref<1x512x512xbf16, #tpu.memory_space<vmem>>, vector<1x512x512xbf16>
    %1 = vector.shape_cast %0 : vector<1x512x512xbf16> to vector<512x512xbf16>
    %c0_2 = arith.constant 0 : index
    %c0_3 = arith.constant 0 : index
    %c0_4 = arith.constant 0 : index
    %2 = vector.load %arg4[%c0_2, %c0_3, %c0_4] : memref<1x512x128xbf16, #tpu.memory_space<vmem>>, vector<1x512x128xbf16>
    %3 = vector.shape_cast %2 : vector<1x512x128xbf16> to vector<512x128xbf16>
    %cst = arith.constant dense<0.000000e+00> : vector<512x128xf32>
    %4 = tpu.matmul %1, %3, %cst {dimension_numbers = #tpu.dot_dimension_numbers<[1], [0], [0], [1], [0, 0, 1, 1], [], []>} : vector<512x512xbf16>, vector<512x128xbf16>, vector<512x128xf32> -> vector<512x128xf32>
    %5 = math.tanh %4 : vector<512x128xf32>
    %6 = arith.truncf %5 : vector<512x128xf32> to vector<512x128xbf16>
    %c0_5 = arith.constant 0 : index
    %c0_6 = arith.constant 0 : index
    %c0_7 = arith.constant 0 : index
    %7 = vector.load %arg5[%c0_5, %c0_6, %c0_7] : memref<1x512x128xbf16, #tpu.memory_space<vmem>>, vector<1x512x128xbf16>
    %8 = vector.shape_cast %7 : vector<1x512x128xbf16> to vector<512x128xbf16>
    %9 = vector.shape_cast %6 : vector<512x128xbf16> to vector<1x512x128xbf16>
    tpu.vector_store %arg5[%c0_5, %c0_6, %c0_7], %9 {strides = array<i32>} : memref<1x512x128xbf16, #tpu.memory_space<vmem>>, vector<1x512x128xbf16>,
    return
  }
  func.func @transform_0(%arg0: i32, %arg1: i32, %arg2: i32) -> (i32, i32, i32) {
    %c0_i32 = arith.constant 0 : i32
    %c0_i32_0 = arith.constant 0 : i32
    return %arg0, %arg1, %c0_i32 : i32, i32, i32
  }
  func.func @transform_1(%arg0: i32, %arg1: i32, %arg2: i32) -> (i32, i32, i32) {
    %c0_i32 = arith.constant 0 : i32
    %c0_i32_0 = arith.constant 0 : i32
    return %arg0, %c0_i32, %arg2 : i32, i32, i32
  }
  func.func @transform_2(%arg0: i32, %arg1: i32, %arg2: i32) -> (i32, i32, i32) {
    %c0_i32 = arith.constant 0 : i32
    return %arg0, %arg1, %arg2 : i32, i32, i32
  }
}

</mosaic_0001>

<bundles_post_ra>
// kernel: generator_forward.4
= control target key start
LH: loop header
LB: loop body
LE: loop exit
PB: predicated region body
PF: predicated region fallthrough
CT: control target
= control target key end

     0   :  { %10 = vsyncpa [#allocation3], 0  ;;  %s2928_s0 = inlined_call_operand.vmem [shape: bf16[1,8,128], index: 0, kind: input, shape index: {}]   ;;  %s2929_s1 = inlined_call_operand.hbm [shape: bf16[1,128,8192], index: 1, kind: input, shape index: {}]   ;;  %s2930_s2 = inlined_call_operand.vmem [shape: bf16[1,8,8192], index: 2, kind: output, shape index: {0}]   ;;  %s2931_s3 = inlined_call_operand.vmem [shape: f32[1,1,1,8192], index: 3, kind: output, shape index: {1}]   ;;  %s2932_s4 = inlined_call_operand.vmem [shape: f32[1,1,1,8192], index: 4, kind: output, shape index: {2}]  }
   0x1   :  { %12 = vsyncpa [#allocation3 + $0x1], 0  ;;  %s2554_s15 = smov 0   ;;  %s2556_s16 = smov 0  }
   0x2   :  { %s2558_s17 = smov 0   ;;  %s2560_s18 = smov 0  }
   0x3   :  { %s2562_s19 = smov 0   ;;  %s2564_s20 = smov 0  }
   0x4 LB: > { %s2220_s21 = sadd.s32 4294967295, %s2521_s20   ;;  %s30_s22 = sadd.s32 1, %s2517_s19  ;;  %s2521_s20 = sphi %s2564_s20, %s18_s20   ;;  %s2517_s19 = sphi %s2562_s19, %s2941_s19   ;;  %s2513_s18 = sphi %s2560_s18, %s2940_s18   ;;  %s2509_s17 = sphi %s2558_s17, %s2939_s17   ;;  %s2505_s16 = sphi %s2556_s16, %s2938_s16   ;;  %s2501_s15 = sphi %s2554_s15, %s2937_s15  }
   0x5   : > { %p31_p0 = scmp.ge.s32.totalorder %s30_s22, 4  ;;  %s74_s23 = sadd.s32 1, %s2509_s17 }
   0x6   : > { %p81_p1 = scmp.ne.s32.totalorder %s2509_s17, %s2505_s16  ;;  %p82_p2 = scmp.eq.s32.totalorder %s2521_s20, 0 }
   0x7   : > { %s2943_s22 = smov (%p31_p0, %s30_s22), 0  ;;  %p87_p4 = scmp.ne.s32.totalorder %s2505_s16, %s2501_s15 }
   0x8   : > { %p2590_p3 = por %p82_p2, %p81_p1  ;;  %s70_s25 = ssub.s32 %s2517_s19, %s2943_s22 }
   0x9   : > { %p88_p5 = scmp.eq.s32.totalorder %s2220_s21, 0  ;;  %p72_p6 = scmp.eq.s32.totalorder %s70_s25, 0 }
   0xa   : > { %p2387_p8 = scmp.lt.s32.totalorder %s2521_s20, 4  ;;  %s211_s28 = sand.u32 1, %s2509_s17  }
   0xb   : > { %p2597_p7 = por %p88_p5, %p87_p4  ;;  %s2372_s29 = sshll.u32 %s2517_s19, 10 }
   0xc   : > { %s2603_s27 = scalar_select %p72_p6, %s2509_s17, %s74_s23  }
   0xd   : > { %s2225_s30 = sshll.u32 %s211_s28, 10  ;;  %s2610_s7 = scalar_lea.hbm %s2929_s1, %s2372_s29 }
   0xe   : > { %s215_s8 = scalar_lea.vmem [#allocation2], %s2225_s30  ;;  %p2614_p9 = pnand %p2387_p8, %p2590_p3 }
   0xf   : > { %s224_s9 = sshll.u32 %s215_s8, 4  ;;  %s2621_s11 = scalar_lea.sflag [#allocation3], %s211_s28  ;;  %s2618_s9 = int_to_ptr.vmem [resolvable:$true] %s224_s9 }
  0x10   : > { %s2441_s12 = scalar_lea.hbm %s2610_s7, 16384  ;;  %p2443_p12 = pneg %p2614_p9 }
  0x11   : > { %p2442_p11 = scmp.ne.s32.totalorder %s2610_s7, %s2441_s12  ;;  %s2446_s15 = scalar_lea.hbm %s2929_s1, 65536 }
  0x12   : > { %p2447_p1 = scmp.lt.u32.totalorder %s2610_s7, %s2929_s1  ;;  %p2448_p2 = scmp.lt.u32.totalorder %s2446_s15, %s2441_s12 }
  0x13   : > { %p2444_p13 = pnand %p2443_p12, %p2442_p11  ;;  %p2450_p4 = scmp.lt.u32.totalorder %s2441_s12, %s2610_s7 }
  0x14   : > { %p2449_p3 = por %p2448_p2, %p2447_p1 }
  0x15   : > { %p2445_p0 = pneg %p2444_p13 }
  0x16   : > { %p2451_p5 = por %p2450_p4, %p2449_p3 }
  0x18   : > { %p2452_p6 = pnand %p2451_p5, %p2445_p0 }
  0x1a   : > { %2455 = shalt.err (!%p2452_p6)
}
  0x1b   : > { %s2456_s24 = scalar_lea.vmem %s2618_s9, 16384  ;;  %s2523_s25 = smov [#allocation2]  }
  0x1c   : > { %p2457_p8 = scmp.ne.s32.totalorder %s2618_s9, %s2456_s24  ;;  %s2461_s28 = sshll.u32 %s2523_s25, 4  ;;  %s2462_s28 = int_to_ptr.vmem [resolvable:$false] %s2461_s28 }
  0x1d   : > { %s2463_s29 = scalar_lea.vmem %s2462_s28, 32768  ;;  %p2464_p10 = scmp.lt.s32.totalorder %s2618_s9, %s2462_s28 }
  0x1e   : > { %p2459_p11 = pnand %p2457_p8, %p2443_p12  ;;  %p2465_p1 = scmp.lt.s32.totalorder %s2463_s29, %s2456_s24 }
  0x20   : > { %p2460_p13 = pneg %p2459_p11  ;;  %p2466_p2 = por %p2465_p1, %p2464_p10 }
  0x22   : > { %p2467_p3 = pnand %p2466_p2, %p2460_p13 }
  0x24   : > { %2470 = shalt.err (!%p2467_p3)
}
  0x25   : > { %s2524_s30 = smov 4096   ;;  %s2525_s5 = smov 1024  }
  0x26   : > { %s2526_s6 = smov 64   ;;  %p232_p12 = scmp.lt.s32.totalorder %s2521_s20, 5 }
  0x27   : > { %2386 = dma.hbm_to_vmem [thread:$0]  (!%p2614_p9), %s2610_s7, 16384, %s2618_s9, %s2621_s11, %s2524_s30, %s2525_s5, %s2526_s6  }
  0x28   : > { %p2936_p0 = scmp.ge.s32.totalorder %s2521_s20, 1 }
  0x2a   : > { %p233_p4 = pnand %p2936_p0, %p232_p12 }
  0x2b   : > { %s238_s8 = sand.u32 (!%p233_p4), 1, %s2505_s16  }
  0x2c   : > { %236 = sbr.rel (%p233_p4) target bundleno = 424 (0x1a8), region = 28  ;;  %s2229_s12 = sshll.u32 (!%p233_p4), %s238_s8, 10 }
  0x2d   : > { %s239_s13 = scalar_lea.sflag (!%p233_p4), [#allocation3], %s238_s8  ;;  %s2653_s14 = scalar_lea.vmem (!%p233_p4), [#allocation2], %s2229_s12 }
  0x33   : > { %2496 = dma.done.wait (%p2597_p7), %s239_s13, 16384  }
  0x34   : > { %2498 = vsyncadd (%p2597_p7), %s239_s13, 4294950912  ;;  %v2527_v0 = vmov 0   ;;  %v356_v1 = vld [vmem:[%s2653_s14] sm:$0xff]  ;;  %v357_v3 = vld [vmem:[%s2653_s14 + $0x8] sm:$0xff]  ;;  %s2230_s9 = sshll.u32 %s2513_s18, 4 }
  0x35   : > { %1156 = vmatprep.mubr.bf16.mxu0 %v2527_v0  ;;  %1197 = vmatprep.mubr.bf16.mxu1 %v2527_v0  ;;  %v364_v2 = vld [vmem:[%s2653_s14 + $0x40] sm:$0xff]  ;;  %v365_v5 = vld [vmem:[%s2653_s14 + $0x48] sm:$0xff]  ;;  %v358_v63 = vld [vmem:[%s2653_s14 + $0x10] sm:$0xff]  ;;  %p319_p7 = scmp.lt.s32.totalorder %s2230_s9, 63 }
  0x36   : > { %v2235_v4 = vcombine.high %v356_v1, %v364_v2  ;;  %v2234_v6 = vcombine.low %v356_v1, %v364_v2  ;;  %v372_v7 = vld [vmem:[%s2653_s14 + $0x80] sm:$0xff]  ;;  %v2237_v9 = vcombine.high %v357_v3, %v365_v5  ;;  %v2236_v10 = vcombine.low %v357_v3, %v365_v5  ;;  %v373_v12 = vld [vmem:[%s2653_s14 + $0x88] sm:$0xff]  ;;  %v366_v1 = vld [vmem:[%s2653_s14 + $0x50] sm:$0xff] }
  0x37   : > { %v380_v8 = vld [vmem:[%s2653_s14 + $0xc0] sm:$0xff]  ;;  %v381_v13 = vld [vmem:[%s2653_s14 + $0xc8] sm:$0xff]  ;;  %v359_v2 = vld [vmem:[%s2653_s14 + $0x18] sm:$0xff]  ;;  %s2945_s9 = smov (!%p319_p7, %s2230_s9), 63 }
  0x38   : > { %v2251_v11 = vcombine.high %v372_v7, %v380_v8  ;;  %v388_v14 = vld [vmem:[%s2653_s14 + $0x100] sm:$0xff]  ;;  %1124 = vmatprep.subr.bf16.mxu0 %v2235_v4  ;;  %v2253_v15 = vcombine.high %v373_v12, %v381_v13  ;;  %v389_v17 = vld [vmem:[%s2653_s14 + $0x108] sm:$0xff]  ;;  %1165 = vmatprep.subr.bf16.mxu1 %v2237_v9  ;;  %v2250_v19 = vcombine.low %v372_v7, %v380_v8  ;;  %v367_v3 = vld [vmem:[%s2653_s14 + $0x58] sm:$0xff]  ;;  %s2231_s10 = sshll.u32 %s2945_s9, 2  ;;  %s2859_s24 = scalar_lea.vmem %s2931_s3, %s2945_s9 }
  0x39   : > { %v396_v16 = vld [vmem:[%s2653_s14 + $0x140] sm:$0xff]  ;;  %v397_v18 = vld [vmem:[%s2653_s14 + $0x148] sm:$0xff]  ;;  %1125 = vmatpush1.bf16.msra.mxu0 %v2234_v6  ;;  %1166 = vmatpush1.bf16.msra.mxu1 %v2236_v10  ;;  %v2252_v20 = vcombine.low %v373_v12, %v381_v13  ;;  %v2239_v6 = vcombine.high %v358_v63, %v366_v1  ;;  %v2241_v7 = vcombine.high %v359_v2, %v367_v3  ;;  %v374_v8 = vld [vmem:[%s2653_s14 + $0x90] sm:$0xff]  ;;  %s2822_s15 = scalar_lea.vmem %s2930_s2, %s2231_s10  ;;  %s2871_s29 = scalar_lea.vmem %s2932_s4, %s2945_s9 }
  0x3a   : > { %1126 = vmatprep.subr.bf16.mxu0 %v2251_v11  ;;  %v2267_v21 = vcombine.high %v388_v14, %v396_v16  ;;  %1167 = vmatprep.subr.bf16.mxu1 %v2253_v15  ;;  %v2269_v22 = vcombine.high %v389_v17, %v397_v18  ;;  %v404_v23 = vld [vmem:[%s2653_s14 + $0x180] sm:$0xff]  ;;  %v405_v25 = vld [vmem:[%s2653_s14 + $0x188] sm:$0xff]  ;;  %v2266_v27 = vcombine.low %v388_v14, %v396_v16  ;;  %v382_v9 = vld [vmem:[%s2653_s14 + $0xd0] sm:$0xff] }
  0x3b   : > { %v412_v24 = vld [vmem:[%s2653_s14 + $0x1c0] sm:$0xff]  ;;  %v413_v26 = vld [vmem:[%s2653_s14 + $0x1c8] sm:$0xff]  ;;  %v2268_v28 = vcombine.low %v389_v17, %v397_v18  ;;  %v375_v10 = vld [vmem:[%s2653_s14 + $0x98] sm:$0xff]  ;;  %v2238_v13 = vcombine.low %v358_v63, %v366_v1  ;;  %v2240_v14 = vcombine.low %v359_v2, %v367_v3  ;;  %v2255_v15 = vcombine.high %v374_v8, %v382_v9 }
  0x3c   : > { %v2283_v29 = vcombine.high %v404_v23, %v412_v24  ;;  %v2285_v30 = vcombine.high %v405_v25, %v413_v26  ;;  %v420_v31 = vld [vmem:[%s2653_s14 + $0x200] sm:$0xff]  ;;  %v421_v33 = vld [vmem:[%s2653_s14 + $0x208] sm:$0xff]  ;;  %v2282_v35 = vcombine.low %v404_v23, %v412_v24  ;;  %v2284_v36 = vcombine.low %v405_v25, %v413_v26  ;;  %v383_v11 = vld [vmem:[%s2653_s14 + $0xd8] sm:$0xff] }
  0x3d   : > { %1127 = vmatpush1.bf16.msra.mxu0 %v2250_v19  ;;  %1168 = vmatpush1.bf16.msra.mxu1 %v2252_v20  ;;  %v428_v32 = vld [vmem:[%s2653_s14 + $0x240] sm:$0xff]  ;;  %v429_v34 = vld [vmem:[%s2653_s14 + $0x248] sm:$0xff]  ;;  %v2257_v16 = vcombine.high %v375_v10, %v383_v11  ;;  %v390_v17 = vld [vmem:[%s2653_s14 + $0x110] sm:$0xff] }
  0x3e   : > { %1128 = vmatprep.subr.bf16.mxu0 %v2267_v21  ;;  %1169 = vmatprep.subr.bf16.mxu1 %v2269_v22  ;;  %v2299_v37 = vcombine.high %v420_v31, %v428_v32  ;;  %v2301_v38 = vcombine.high %v421_v33, %v429_v34  ;;  %v436_v39 = vld [vmem:[%s2653_s14 + $0x280] sm:$0xff]  ;;  %v437_v41 = vld [vmem:[%s2653_s14 + $0x288] sm:$0xff]  ;;  %v2298_v43 = vcombine.low %v420_v31, %v428_v32  ;;  %v398_v18 = vld [vmem:[%s2653_s14 + $0x150] sm:$0xff] }
  0x3f   : > { %v444_v40 = vld [vmem:[%s2653_s14 + $0x2c0] sm:$0xff]  ;;  %v445_v42 = vld [vmem:[%s2653_s14 + $0x2c8] sm:$0xff]  ;;  %v2300_v44 = vcombine.low %v421_v33, %v429_v34  ;;  %v391_v19 = vld [vmem:[%s2653_s14 + $0x118] sm:$0xff]  ;;  %v2254_v21 = vcombine.low %v374_v8, %v382_v9  ;;  %v2256_v22 = vcombine.low %v375_v10, %v383_v11  ;;  %v2271_v23 = vcombine.high %v390_v17, %v398_v18 }
  0x40   : > { %v2315_v45 = vcombine.high %v436_v39, %v444_v40  ;;  %v2317_v46 = vcombine.high %v437_v41, %v445_v42  ;;  %v452_v47 = vld [vmem:[%s2653_s14 + $0x300] sm:$0xff]  ;;  %v453_v49 = vld [vmem:[%s2653_s14 + $0x308] sm:$0xff]  ;;  %v2314_v51 = vcombine.low %v436_v39, %v444_v40  ;;  %v2316_v52 = vcombine.low %v437_v41, %v445_v42  ;;  %v399_v20 = vld [vmem:[%s2653_s14 + $0x158] sm:$0xff] }
  0x41   : > { %1129 = vmatpush1.bf16.msra.mxu0 %v2266_v27  ;;  %1170 = vmatpush1.bf16.msra.mxu1 %v2268_v28  ;;  %v460_v48 = vld [vmem:[%s2653_s14 + $0x340] sm:$0xff]  ;;  %v461_v50 = vld [vmem:[%s2653_s14 + $0x348] sm:$0xff]  ;;  %v2273_v24 = vcombine.high %v391_v19, %v399_v20  ;;  %v406_v25 = vld [vmem:[%s2653_s14 + $0x190] sm:$0xff] }
  0x42   : > { %1130 = vmatprep.subr.bf16.mxu0 %v2283_v29  ;;  %1171 = vmatprep.subr.bf16.mxu1 %v2285_v30  ;;  %v2331_v53 = vcombine.high %v452_v47, %v460_v48  ;;  %v2333_v54 = vcombine.high %v453_v49, %v461_v50  ;;  %v468_v55 = vld [vmem:[%s2653_s14 + $0x380] sm:$0xff]  ;;  %v469_v57 = vld [vmem:[%s2653_s14 + $0x388] sm:$0xff]  ;;  %v2330_v59 = vcombine.low %v452_v47, %v460_v48  ;;  %v414_v26 = vld [vmem:[%s2653_s14 + $0x1d0] sm:$0xff] }
  0x43   : > { %v476_v56 = vld [vmem:[%s2653_s14 + $0x3c0] sm:$0xff]  ;;  %v477_v58 = vld [vmem:[%s2653_s14 + $0x3c8] sm:$0xff]  ;;  %v2332_v60 = vcombine.low %v453_v49, %v461_v50  ;;  %v407_v27 = vld [vmem:[%s2653_s14 + $0x198] sm:$0xff]  ;;  %v2270_v29 = vcombine.low %v390_v17, %v398_v18  ;;  %v2272_v30 = vcombine.low %v391_v19, %v399_v20  ;;  %v2287_v31 = vcombine.high %v406_v25, %v414_v26 }
  0x44   : > { %v2347_v61 = vcombine.high %v468_v55, %v476_v56  ;;  %v2349_v62 = vcombine.high %v469_v57, %v477_v58  ;;  %v2346_v4 = vcombine.low %v468_v55, %v476_v56  ;;  %v2348_v5 = vcombine.low %v469_v57, %v477_v58  ;;  %v2704_v12 = vld [vmem:[%s2928_s0] sm:$0xf]  ;;  %v415_v28 = vld [vmem:[%s2653_s14 + $0x1d8] sm:$0xff]  ;;  %v422_v33 = vld [vmem:[%s2653_s14 + $0x210] sm:$0xff] }
  0x45   : > { %1131 = vmatpush1.bf16.msra.mxu0 %v2282_v35  ;;  %1172 = vmatpush1.bf16.msra.mxu1 %v2284_v36  ;;  %v2289_v32 = vcombine.high %v407_v27, %v415_v28  ;;  %v430_v34 = vld [vmem:[%s2653_s14 + $0x250] sm:$0xff]  ;;  %v423_v35 = vld [vmem:[%s2653_s14 + $0x218] sm:$0xff]  ;;  %v360_v2 = vld [vmem:[%s2653_s14 + $0x20] sm:$0xff] }
  0x46   : > { %1132 = vmatprep.subr.bf16.mxu0 %v2299_v37  ;;  %1173 = vmatprep.subr.bf16.mxu1 %v2301_v38  ;;  %v431_v36 = vld [vmem:[%s2653_s14 + $0x258] sm:$0xff]  ;;  %v2286_v37 = vcombine.low %v406_v25, %v414_v26  ;;  %v2288_v38 = vcombine.low %v407_v27, %v415_v28  ;;  %v2303_v39 = vcombine.high %v422_v33, %v430_v34  ;;  %v438_v41 = vld [vmem:[%s2653_s14 + $0x290] sm:$0xff]  ;;  %v368_v3 = vld [vmem:[%s2653_s14 + $0x60] sm:$0xff] }
  0x47   : > { %v2305_v40 = vcombine.high %v423_v35, %v431_v36  ;;  %v446_v42 = vld [vmem:[%s2653_s14 + $0x2d0] sm:$0xff]  ;;  %v2243_v8 = vcombine.high %v360_v2, %v368_v3  ;;  %v376_v10 = vld [vmem:[%s2653_s14 + $0xa0] sm:$0xff] }
  0x48   : > { %v2319_v47 = vcombine.high %v438_v41, %v446_v42  ;;  %v454_v49 = vld [vmem:[%s2653_s14 + $0x310] sm:$0xff]  ;;  %v384_v11 = vld [vmem:[%s2653_s14 + $0xe0] sm:$0xff] }
  0x49   : > { %1133 = vmatpush1.bf16.msra.mxu0 %v2298_v43  ;;  %1174 = vmatpush1.bf16.msra.mxu1 %v2300_v44  ;;  %v439_v43 = vld [vmem:[%s2653_s14 + $0x298] sm:$0xff]  ;;  %v462_v50 = vld [vmem:[%s2653_s14 + $0x350] sm:$0xff]  ;;  %v2259_v17 = vcombine.high %v376_v10, %v384_v11  ;;  %v392_v19 = vld [vmem:[%s2653_s14 + $0x120] sm:$0xff] }
  0x4a   : > { %1134 = vmatprep.subr.bf16.mxu0 %v2315_v45  ;;  %1175 = vmatprep.subr.bf16.mxu1 %v2317_v46  ;;  %v447_v44 = vld [vmem:[%s2653_s14 + $0x2d8] sm:$0xff]  ;;  %v2302_v45 = vcombine.low %v422_v33, %v430_v34  ;;  %v2304_v46 = vcombine.low %v423_v35, %v431_v36  ;;  %v2335_v55 = vcombine.high %v454_v49, %v462_v50  ;;  %v470_v57 = vld [vmem:[%s2653_s14 + $0x390] sm:$0xff]  ;;  %v400_v20 = vld [vmem:[%s2653_s14 + $0x160] sm:$0xff] }
  0x4b   : > { %v2321_v48 = vcombine.high %v439_v43, %v447_v44  ;;  %v478_v58 = vld [vmem:[%s2653_s14 + $0x3d0] sm:$0xff]  ;;  %v2275_v25 = vcombine.high %v392_v19, %v400_v20  ;;  %v408_v27 = vld [vmem:[%s2653_s14 + $0x1a0] sm:$0xff] }
  0x4c   : > { %v2351_v63 = vcombine.high %v470_v57, %v478_v58  ;;  %v416_v28 = vld [vmem:[%s2653_s14 + $0x1e0] sm:$0xff] }
  0x4d   : > { %1135 = vmatpush1.bf16.msra.mxu0 %v2314_v51  ;;  %1176 = vmatpush1.bf16.msra.mxu1 %v2316_v52  ;;  %v455_v51 = vld [vmem:[%s2653_s14 + $0x318] sm:$0xff]  ;;  %v2291_v33 = vcombine.high %v408_v27, %v416_v28  ;;  %v424_v35 = vld [vmem:[%s2653_s14 + $0x220] sm:$0xff] }
  0x4e   : > { %1136 = vmatprep.subr.bf16.mxu0 %v2331_v53  ;;  %1177 = vmatprep.subr.bf16.mxu1 %v2333_v54  ;;  %v463_v52 = vld [vmem:[%s2653_s14 + $0x358] sm:$0xff]  ;;  %v2318_v53 = vcombine.low %v438_v41, %v446_v42  ;;  %v2320_v54 = vcombine.low %v439_v43, %v447_v44  ;;  %v432_v36 = vld [vmem:[%s2653_s14 + $0x260] sm:$0xff] }
  0x4f   : > { %v2337_v56 = vcombine.high %v455_v51, %v463_v52  ;;  %v2307_v41 = vcombine.high %v424_v35, %v432_v36  ;;  %v440_v43 = vld [vmem:[%s2653_s14 + $0x2a0] sm:$0xff] }
  0x50   : > { %v448_v44 = vld [vmem:[%s2653_s14 + $0x2e0] sm:$0xff] }
  0x51   : > { %1137 = vmatpush1.bf16.msra.mxu0 %v2330_v59  ;;  %1178 = vmatpush1.bf16.msra.mxu1 %v2332_v60  ;;  %v471_v59 = vld [vmem:[%s2653_s14 + $0x398] sm:$0xff] }
  0x52   : > { %1138 = vmatprep.subr.bf16.mxu0 %v2347_v61  ;;  %1179 = vmatprep.subr.bf16.mxu1 %v2349_v62  ;;  %v479_v60 = vld [vmem:[%s2653_s14 + $0x3d8] sm:$0xff]  ;;  %v2334_v61 = vcombine.low %v454_v49, %v462_v50  ;;  %v2336_v62 = vcombine.low %v455_v51, %v463_v52  ;;  %v2323_v49 = vcombine.high %v440_v43, %v448_v44  ;;  %v456_v51 = vld [vmem:[%s2653_s14 + $0x320] sm:$0xff] }
  0x53   : > { %v2353_v1 = vcombine.high %v471_v59, %v479_v60  ;;  %v464_v52 = vld [vmem:[%s2653_s14 + $0x360] sm:$0xff] }
  0x55   : > { %1139 = vmatpush1.bf16.msra.mxu0 %v2346_v4  ;;  %1180 = vmatpush1.bf16.msra.mxu1 %v2348_v5  ;;  %v361_v4 = vld [vmem:[%s2653_s14 + $0x28] sm:$0xff] }
  0x56   : > { %1206 = vmatprep.subr.bf16.mxu0 %v2239_v6  ;;  %1247 = vmatprep.subr.bf16.mxu1 %v2241_v7  ;;  %v369_v5 = vld [vmem:[%s2653_s14 + $0x68] sm:$0xff]  ;;  %v2350_v6 = vcombine.low %v470_v57, %v478_v58  ;;  %v2352_v7 = vcombine.low %v471_v59, %v479_v60  ;;  %v2339_v57 = vcombine.high %v456_v51, %v464_v52  ;;  %v472_v59 = vld [vmem:[%s2653_s14 + $0x3a0] sm:$0xff] }
  0x57   : > { %v2245_v9 = vcombine.high %v361_v4, %v369_v5  ;;  %v480_v60 = vld [vmem:[%s2653_s14 + $0x3e0] sm:$0xff] }
  0x58   : > { %1157 = vmatmul.mubr.bf16.vlgmr.msra.gmra.mrb[0].mxu0 %v2704_v12  ;;  %1198 = vmatmul.mubr.bf16.vlgmr.msra.gmra.mrb[0].mxu1 %v2704_v12 }
  0x59   : > { %1207 = vmatpush1.bf16.msra.mxu0 %v2238_v13  ;;  %1248 = vmatpush1.bf16.msra.mxu1 %v2240_v14  ;;  %v377_v13 = vld [vmem:[%s2653_s14 + $0xa8] sm:$0xff] }
  0x5a   : > { %1208 = vmatprep.subr.bf16.mxu0 %v2255_v15  ;;  %1249 = vmatprep.subr.bf16.mxu1 %v2257_v16  ;;  %v385_v14 = vld [vmem:[%s2653_s14 + $0xe8] sm:$0xff]  ;;  %v2242_v15 = vcombine.low %v360_v2, %v368_v3  ;;  %v2244_v16 = vcombine.low %v361_v4, %v369_v5  ;;  %v2355_v2 = vcombine.high %v472_v59, %v480_v60  ;;  %v362_v4 = vld [vmem:[%s2653_s14 + $0x30] sm:$0xff] }
  0x5b   : > { %1238 = vmatprep.mubr.bf16.mxu0 %v2527_v0  ;;  %1279 = vmatprep.mubr.bf16.mxu1 %v2527_v0  ;;  %v2261_v18 = vcombine.high %v377_v13, %v385_v14  ;;  %v370_v5 = vld [vmem:[%s2653_s14 + $0x70] sm:$0xff] }
  0x5d   : > { %1209 = vmatpush1.bf16.msra.mxu0 %v2254_v21  ;;  %1250 = vmatpush1.bf16.msra.mxu1 %v2256_v22  ;;  %v393_v21 = vld [vmem:[%s2653_s14 + $0x128] sm:$0xff] }
  0x5e   : > { %1210 = vmatprep.subr.bf16.mxu0 %v2271_v23  ;;  %1251 = vmatprep.subr.bf16.mxu1 %v2273_v24  ;;  %v401_v22 = vld [vmem:[%s2653_s14 + $0x168] sm:$0xff]  ;;  %v2258_v23 = vcombine.low %v376_v10, %v384_v11  ;;  %v2260_v24 = vcombine.low %v377_v13, %v385_v14  ;;  %v2247_v10 = vcombine.high %v362_v4, %v370_v5  ;;  %v378_v13 = vld [vmem:[%s2653_s14 + $0xb0] sm:$0xff] }
  0x5f   : > { %v2277_v26 = vcombine.high %v393_v21, %v401_v22  ;;  %v386_v14 = vld [vmem:[%s2653_s14 + $0xf0] sm:$0xff] }
  0x61   : > { %1211 = vmatpush1.bf16.msra.mxu0 %v2270_v29  ;;  %1252 = vmatpush1.bf16.msra.mxu1 %v2272_v30  ;;  %v409_v29 = vld [vmem:[%s2653_s14 + $0x1a8] sm:$0xff] }
  0x62   : > { %1212 = vmatprep.subr.bf16.mxu0 %v2287_v31  ;;  %1253 = vmatprep.subr.bf16.mxu1 %v2289_v32  ;;  %v417_v30 = vld [vmem:[%s2653_s14 + $0x1e8] sm:$0xff]  ;;  %v2274_v31 = vcombine.low %v392_v19, %v400_v20  ;;  %v2276_v32 = vcombine.low %v393_v21, %v401_v22  ;;  %v2263_v19 = vcombine.high %v378_v13, %v386_v14  ;;  %v394_v21 = vld [vmem:[%s2653_s14 + $0x130] sm:$0xff] }
  0x63   : > { %v2293_v34 = vcombine.high %v409_v29, %v417_v30  ;;  %v402_v22 = vld [vmem:[%s2653_s14 + $0x170] sm:$0xff] }
  0x65   : > { %1213 = vmatpush1.bf16.msra.mxu0 %v2286_v37  ;;  %1254 = vmatpush1.bf16.msra.mxu1 %v2288_v38  ;;  %v425_v37 = vld [vmem:[%s2653_s14 + $0x228] sm:$0xff] }
  0x66   : > { %1214 = vmatprep.subr.bf16.mxu0 %v2303_v39  ;;  %1255 = vmatprep.subr.bf16.mxu1 %v2305_v40  ;;  %v433_v38 = vld [vmem:[%s2653_s14 + $0x268] sm:$0xff]  ;;  %v2290_v39 = vcombine.low %v408_v27, %v416_v28  ;;  %v2292_v40 = vcombine.low %v409_v29, %v417_v30  ;;  %v2279_v27 = vcombine.high %v394_v21, %v402_v22  ;;  %v410_v29 = vld [vmem:[%s2653_s14 + $0x1b0] sm:$0xff] }
  0x67   : > { %v2309_v42 = vcombine.high %v425_v37, %v433_v38  ;;  %v418_v30 = vld [vmem:[%s2653_s14 + $0x1f0] sm:$0xff] }
  0x69   : > { %1215 = vmatpush1.bf16.msra.mxu0 %v2302_v45  ;;  %1256 = vmatpush1.bf16.msra.mxu1 %v2304_v46  ;;  %v441_v45 = vld [vmem:[%s2653_s14 + $0x2a8] sm:$0xff] }
  0x6a   : > { %1216 = vmatprep.subr.bf16.mxu0 %v2319_v47  ;;  %1257 = vmatprep.subr.bf16.mxu1 %v2321_v48  ;;  %v449_v46 = vld [vmem:[%s2653_s14 + $0x2e8] sm:$0xff]  ;;  %v2306_v47 = vcombine.low %v424_v35, %v432_v36  ;;  %v2308_v48 = vcombine.low %v425_v37, %v433_v38  ;;  %v2295_v35 = vcombine.high %v410_v29, %v418_v30  ;;  %v426_v37 = vld [vmem:[%s2653_s14 + $0x230] sm:$0xff] }
  0x6b   : > { %v2325_v50 = vcombine.high %v441_v45, %v449_v46  ;;  %v434_v38 = vld [vmem:[%s2653_s14 + $0x270] sm:$0xff] }
  0x6d   : > { %1217 = vmatpush1.bf16.msra.mxu0 %v2318_v53  ;;  %1258 = vmatpush1.bf16.msra.mxu1 %v2320_v54  ;;  %v457_v53 = vld [vmem:[%s2653_s14 + $0x328] sm:$0xff] }
  0x6e   : > { %1218 = vmatprep.subr.bf16.mxu0 %v2335_v55  ;;  %1259 = vmatprep.subr.bf16.mxu1 %v2337_v56  ;;  %v465_v54 = vld [vmem:[%s2653_s14 + $0x368] sm:$0xff]  ;;  %v2322_v55 = vcombine.low %v440_v43, %v448_v44  ;;  %v2324_v56 = vcombine.low %v441_v45, %v449_v46  ;;  %v442_v44 = vld [vmem:[%s2653_s14 + $0x2b0] sm:$0xff]  ;;  %v443_v46 = vld [vmem:[%s2653_s14 + $0x2b8] sm:$0xff] }
  0x6f   : > { %v2341_v58 = vcombine.high %v457_v53, %v465_v54  ;;  %v450_v45 = vld [vmem:[%s2653_s14 + $0x2f0] sm:$0xff] }
  0x71   : > { %1219 = vmatpush1.bf16.msra.mxu0 %v2334_v61  ;;  %1260 = vmatpush1.bf16.msra.mxu1 %v2336_v62  ;;  %v473_v61 = vld [vmem:[%s2653_s14 + $0x3a8] sm:$0xff] }
  0x72   : > { %1220 = vmatprep.subr.bf16.mxu0 %v2351_v63  ;;  %1261 = vmatprep.subr.bf16.mxu1 %v2353_v1  ;;  %v481_v62 = vld [vmem:[%s2653_s14 + $0x3e8] sm:$0xff]  ;;  %v2338_v63 = vcombine.low %v456_v51, %v464_v52  ;;  %v2340_v1 = vcombine.low %v457_v53, %v465_v54  ;;  %v458_v52 = vld [vmem:[%s2653_s14 + $0x330] sm:$0xff]  ;;  %v459_v54 = vld [vmem:[%s2653_s14 + $0x338] sm:$0xff] }
  0x73   : > { %v2357_v3 = vcombine.high %v473_v61, %v481_v62  ;;  %v466_v53 = vld [vmem:[%s2653_s14 + $0x370] sm:$0xff] }
  0x75   : > { %1221 = vmatpush1.bf16.msra.mxu0 %v2350_v6  ;;  %1262 = vmatpush1.bf16.msra.mxu1 %v2352_v7  ;;  %v363_v6 = vld [vmem:[%s2653_s14 + $0x38] sm:$0xff] }
  0x76   : > { %1288 = vmatprep.subr.bf16.mxu0 %v2243_v8  ;;  %1329 = vmatprep.subr.bf16.mxu1 %v2245_v9  ;;  %v371_v7 = vld [vmem:[%s2653_s14 + $0x78] sm:$0xff]  ;;  %v2354_v8 = vcombine.low %v472_v59, %v480_v60  ;;  %v2356_v9 = vcombine.low %v473_v61, %v481_v62  ;;  %v474_v60 = vld [vmem:[%s2653_s14 + $0x3b0] sm:$0xff] }
  0x77   : > { %v2249_v11 = vcombine.high %v363_v6, %v371_v7  ;;  %v482_v61 = vld [vmem:[%s2653_s14 + $0x3f0] sm:$0xff]  ;;  %v475_v62 = vld [vmem:[%s2653_s14 + $0x3b8] sm:$0xff] }
  0x78   : > { %1239 = vmatmul.mubr.bf16.vlgmr.msra.gmra.mrb[4].mxu0 %v2704_v12  ;;  %1280 = vmatmul.mubr.bf16.vlgmr.msra.gmra.mrb[4].mxu1 %v2704_v12 }
  0x79   : > { %1289 = vmatpush1.bf16.msra.mxu0 %v2242_v15  ;;  %1330 = vmatpush1.bf16.msra.mxu1 %v2244_v16  ;;  %v379_v15 = vld [vmem:[%s2653_s14 + $0xb8] sm:$0xff] }
  0x7a   : > { %1290 = vmatprep.subr.bf16.mxu0 %v2259_v17  ;;  %1331 = vmatprep.subr.bf16.mxu1 %v2261_v18  ;;  %v387_v16 = vld [vmem:[%s2653_s14 + $0xf8] sm:$0xff]  ;;  %v2246_v17 = vcombine.low %v362_v4, %v370_v5  ;;  %v2248_v18 = vcombine.low %v363_v6, %v371_v7  ;;  %v2358_v5 = vcombine.low %v474_v60, %v482_v61  ;;  %v2528_v7 = vmov 1966171168  }
  0x7b   : > { %1320 = vmatprep.mubr.bf16.mxu0 %v2527_v0  ;;  %1361 = vmatprep.mubr.bf16.mxu1 %v2527_v0  ;;  %v2265_v20 = vcombine.high %v379_v15, %v387_v16 }
  0x7d   : > { %1291 = vmatpush1.bf16.msra.mxu0 %v2258_v23  ;;  %1332 = vmatpush1.bf16.msra.mxu1 %v2260_v24  ;;  %v395_v23 = vld [vmem:[%s2653_s14 + $0x138] sm:$0xff] }
  0x7e   : > { %1292 = vmatprep.subr.bf16.mxu0 %v2275_v25  ;;  %1333 = vmatprep.subr.bf16.mxu1 %v2277_v26  ;;  %v403_v24 = vld [vmem:[%s2653_s14 + $0x178] sm:$0xff]  ;;  %v2262_v25 = vcombine.low %v378_v13, %v386_v14  ;;  %v2264_v26 = vcombine.low %v379_v15, %v387_v16 }
  0x7f   : > { %v2281_v28 = vcombine.high %v395_v23, %v403_v24 }
  0x81   : > { %1293 = vmatpush1.bf16.msra.mxu0 %v2274_v31  ;;  %1334 = vmatpush1.bf16.msra.mxu1 %v2276_v32  ;;  %v411_v31 = vld [vmem:[%s2653_s14 + $0x1b8] sm:$0xff] }
  0x82   : > { %1294 = vmatprep.subr.bf16.mxu0 %v2291_v33  ;;  %1335 = vmatprep.subr.bf16.mxu1 %v2293_v34  ;;  %v419_v32 = vld [vmem:[%s2653_s14 + $0x1f8] sm:$0xff]  ;;  %v2278_v33 = vcombine.low %v394_v21, %v402_v22  ;;  %v2280_v34 = vcombine.low %v395_v23, %v403_v24 }
  0x83   : > { %v2297_v36 = vcombine.high %v411_v31, %v419_v32 }
  0x85   : > { %1295 = vmatpush1.bf16.msra.mxu0 %v2290_v39  ;;  %1336 = vmatpush1.bf16.msra.mxu1 %v2292_v40  ;;  %v427_v39 = vld [vmem:[%s2653_s14 + $0x238] sm:$0xff] }
  0x86   : > { %1296 = vmatprep.subr.bf16.mxu0 %v2307_v41  ;;  %1337 = vmatprep.subr.bf16.mxu1 %v2309_v42  ;;  %v435_v40 = vld [vmem:[%s2653_s14 + $0x278] sm:$0xff]  ;;  %v2294_v41 = vcombine.low %v410_v29, %v418_v30  ;;  %v2311_v42 = vcombine.high %v426_v37, %v434_v38 }
  0x87   : > { %v2313_v43 = vcombine.high %v427_v39, %v435_v40 }
  0x89   : > { %1297 = vmatpush1.bf16.msra.mxu0 %v2306_v47  ;;  %1338 = vmatpush1.bf16.msra.mxu1 %v2308_v48  ;;  %v451_v47 = vld [vmem:[%s2653_s14 + $0x2f8] sm:$0xff]  ;;  %v2310_v48 = vcombine.low %v426_v37, %v434_v38 }
  0x8a   : > { %1298 = vmatprep.subr.bf16.mxu0 %v2323_v49  ;;  %1339 = vmatprep.subr.bf16.mxu1 %v2325_v50  ;;  %v2312_v49 = vcombine.low %v427_v39, %v435_v40  ;;  %v2327_v50 = vcombine.high %v442_v44, %v450_v45  ;;  %v2329_v51 = vcombine.high %v443_v46, %v451_v47 }
  0x8d   : > { %1299 = vmatpush1.bf16.msra.mxu0 %v2322_v55  ;;  %1340 = vmatpush1.bf16.msra.mxu1 %v2324_v56  ;;  %v467_v55 = vld [vmem:[%s2653_s14 + $0x378] sm:$0xff]  ;;  %v2326_v56 = vcombine.low %v442_v44, %v450_v45 }
  0x8e   : > { %1300 = vmatprep.subr.bf16.mxu0 %v2339_v57  ;;  %1341 = vmatprep.subr.bf16.mxu1 %v2341_v58  ;;  %v2328_v57 = vcombine.low %v443_v46, %v451_v47  ;;  %v2343_v58 = vcombine.high %v458_v52, %v466_v53  ;;  %v2345_v59 = vcombine.high %v459_v54, %v467_v55 }
  0x91   : > { %1301 = vmatpush1.bf16.msra.mxu0 %v2338_v63  ;;  %1342 = vmatpush1.bf16.msra.mxu1 %v2340_v1  ;;  %v483_v63 = vld [vmem:[%s2653_s14 + $0x3f8] sm:$0xff]  ;;  %v2342_v1 = vcombine.low %v458_v52, %v466_v53 }
  0x92   : > { %1302 = vmatprep.subr.bf16.mxu0 %v2355_v2  ;;  %1343 = vmatprep.subr.bf16.mxu1 %v2357_v3  ;;  %v2344_v2 = vcombine.low %v459_v54, %v467_v55  ;;  %v2359_v3 = vcombine.high %v474_v60, %v482_v61  ;;  %v2361_v4 = vcombine.high %v475_v62, %v483_v63 }
  0x93   : > { %v2360_v6 = vcombine.low %v475_v62, %v483_v63 }
  0x95   : > { %1303 = vmatpush1.bf16.msra.mxu0 %v2354_v8  ;;  %1344 = vmatpush1.bf16.msra.mxu1 %v2356_v9  ;;  %v1569_v8 = vunpack.c.l.s4 %v2528_v7  ;;  %v1571_v9 = vlaneseq }
  0x96   : > { %1370 = vmatprep.subr.bf16.mxu0 %v2247_v10  ;;  %1411 = vmatprep.subr.bf16.mxu1 %v2249_v11 }
  0x97   : > { %v1570_v10 = vunpack.c.0.s8 %v1569_v8  ;;  %v1572_v11 = vshrl.u32 %v1571_v9, 7 }
  0x98   : > { %1321 = vmatmul.mubr.bf16.vlgmr.msra.gmra.mrb[8].mxu0 %v2704_v12  ;;  %1362 = vmatmul.mubr.bf16.vlgmr.msra.gmra.mrb[8].mxu1 %v2704_v12 }
  0x99   : > { %1371 = vmatpush1.bf16.msra.mxu0 %v2246_v17  ;;  %1412 = vmatpush1.bf16.msra.mxu1 %v2248_v18  ;;  %v2814_v18 = vsub.s32 %v1570_v10, %v1572_v11 }
  0x9a   : > { %1372 = vmatprep.subr.bf16.mxu0 %v2263_v19  ;;  %1413 = vmatprep.subr.bf16.mxu1 %v2265_v20 }
  0x9b   : > { %1402 = vmatprep.mubr.bf16.mxu0 %v2527_v0  ;;  %1443 = vmatprep.mubr.bf16.mxu1 %v2527_v0  ;;  %v2296_v0 = vcombine.low %v411_v31, %v419_v32 }
  0x9d   : > { %1373 = vmatpush1.bf16.msra.mxu0 %v2262_v25  ;;  %1414 = vmatpush1.bf16.msra.mxu1 %v2264_v26 }
  0x9e   : > { %1374 = vmatprep.subr.bf16.mxu0 %v2279_v27  ;;  %1415 = vmatprep.subr.bf16.mxu1 %v2281_v28 }
  0xa1   : > { %1375 = vmatpush1.bf16.msra.mxu0 %v2278_v33  ;;  %1416 = vmatpush1.bf16.msra.mxu1 %v2280_v34 }
  0xa2   : > { %1376 = vmatprep.subr.bf16.mxu0 %v2295_v35  ;;  %1417 = vmatprep.subr.bf16.mxu1 %v2297_v36 }
  0xa5   : > { %1377 = vmatpush1.bf16.msra.mxu0 %v2294_v41  ;;  %1418 = vmatpush1.bf16.msra.mxu1 %v2296_v0 }
  0xa6   : > { %1378 = vmatprep.subr.bf16.mxu0 %v2311_v42  ;;  %1419 = vmatprep.subr.bf16.mxu1 %v2313_v43 }
  0xa9   : > { %1379 = vmatpush1.bf16.msra.mxu0 %v2310_v48  ;;  %1420 = vmatpush1.bf16.msra.mxu1 %v2312_v49 }
  0xaa   : > { %1380 = vmatprep.subr.bf16.mxu0 %v2327_v50  ;;  %1421 = vmatprep.subr.bf16.mxu1 %v2329_v51 }
  0xad   : > { %1381 = vmatpush1.bf16.msra.mxu0 %v2326_v56  ;;  %1422 = vmatpush1.bf16.msra.mxu1 %v2328_v57 }
  0xae   : > { %1382 = vmatprep.subr.bf16.mxu0 %v2343_v58  ;;  %1423 = vmatprep.subr.bf16.mxu1 %v2345_v59 }
  0xb1   : > { %1383 = vmatpush1.bf16.msra.mxu0 %v2342_v1  ;;  %1424 = vmatpush1.bf16.msra.mxu1 %v2344_v2 }
  0xb2   : > { %1384 = vmatprep.subr.bf16.mxu0 %v2359_v3  ;;  %1425 = vmatprep.subr.bf16.mxu1 %v2361_v4 }
  0xb5   : > { %1385 = vmatpush1.bf16.msra.mxu0 %v2358_v5  ;;  %1426 = vmatpush1.bf16.msra.mxu1 %v2360_v6 }
  0xb8   : > { %1403 = vmatmul.mubr.bf16.vlgmr.msra.gmra.mrb[12].mxu0 %v2704_v12  ;;  %1444 = vmatmul.mubr.bf16.vlgmr.msra.gmra.mrb[12].mxu1 %v2704_v12 }
 0x12b   : > { %v1158_v13 = vpop.f32.mrb[0].mxu0  ;;  %v2812_v16 = vpop.f32.mrb[0].mxu1 }
 0x12c   : > { %v1452_v14 = vrot.slane %v1158_v13, 4  ;;  %v1666_v15 = vmul.f32 %v1158_v13, %v1158_v13  ;;  %v1160_v17 = vpop.f32.mrb[1].mxu0  ;;  %v1464_v12 = vrot.slane %v2812_v16, 4  ;;  %v1668_v19 = vmul.f32 %v2812_v16, %v2812_v16  ;;  %v1201_v22 = vpop.f32.mrb[1].mxu1 }
 0x12d   : > { %v1458_v20 = vrot.slane %v1160_v17, 4  ;;  %v1667_v21 = vmul.f32 %v1160_v17, %v1160_v17  ;;  %v1162_v23 = vpop.f32.mrb[2].mxu0  ;;  %v2373_v26 = vpack.c.bf16 %v1160_v17, %v1158_v13  ;;  %v1470_v27 = vrot.slane %v1201_v22, 4  ;;  %v1203_v28 = vpop.f32.mrb[2].mxu1 }
 0x12e   : > { %v1453_v24 = vadd.f32 %v1452_v14, %v1158_v13  ;;  %v1682_v25 = vrot.slane %v1666_v15, 4  ;;  %v1163_v29 = vpop.f32.mrb[3].mxu0  ;;  %v1465_v30 = vadd.f32 %v1464_v12, %v2812_v16  ;;  %v1694_v31 = vrot.slane %v1668_v19, 4  ;;  %v1204_v34 = vpop.f32.mrb[3].mxu1 }
 0x12f   : > { %v1459_v32 = vadd.f32 %v1458_v20, %v1160_v17  ;;  %v1688_v33 = vrot.slane %v1667_v21, 4  ;;  %1960 = vst [vmem:[%s2822_s15] sm:$0xff] %v2373_v26  ;;  %v1471_v37 = vadd.f32 %v1470_v27, %v1201_v22  ;;  %v1669_v38 = vmul.f32 %v1201_v22, %v1201_v22 }
 0x130   : > { %v1454_v35 = vrot.slane %v1453_v24, 2  ;;  %v1683_v36 = vadd.f32 %v1682_v25, %v1666_v15  ;;  %v1466_v39 = vrot.slane %v1465_v30, 2  ;;  %v1695_v40 = vadd.f32 %v1694_v31, %v1668_v19 }
 0x131   : > { %v1460_v41 = vrot.slane %v1459_v32, 2  ;;  %v1689_v0 = vadd.f32 %v1688_v33, %v1667_v21  ;;  %v1472_v44 = vrot.slane %v1471_v37, 2  ;;  %v1700_v45 = vrot.slane %v1669_v38, 4 }
 0x132   : > { %v1455_v42 = vadd.f32 %v1454_v35, %v1453_v24  ;;  %v1684_v43 = vrot.slane %v1683_v36, 2  ;;  %v1467_v46 = vadd.f32 %v1466_v39, %v1465_v30  ;;  %v1696_v47 = vrot.slane %v1695_v40, 2 }
 0x133   : > { %v1461_v48 = vadd.f32 %v1460_v41, %v1459_v32  ;;  %v1690_v49 = vrot.slane %v1689_v0, 2  ;;  %v1473_v52 = vadd.f32 %v1472_v44, %v1471_v37  ;;  %v1701_v53 = vadd.f32 %v1700_v45, %v1669_v38 }
 0x134   : > { %v1456_v50 = vrot.slane %v1455_v42, 1  ;;  %v1685_v51 = vadd.f32 %v1684_v43, %v1683_v36  ;;  %v1468_v54 = vrot.slane %v1467_v46, 1  ;;  %v1697_v55 = vadd.f32 %v1696_v47, %v1695_v40 }
 0x135   : > { %v1462_v56 = vrot.slane %v1461_v48, 1  ;;  %v1691_v57 = vadd.f32 %v1690_v49, %v1689_v0  ;;  %v1474_v60 = vrot.slane %v1473_v52, 1  ;;  %v1702_v61 = vrot.slane %v1701_v53, 2 }
 0x136   : > { %v1457_v58 = vadd.f32 %v1456_v50, %v1455_v42  ;;  %v1686_v59 = vrot.slane %v1685_v51, 1  ;;  %v1469_v62 = vadd.f32 %v1468_v54, %v1467_v46  ;;  %v1698_v63 = vrot.slane %v1697_v55, 1 }
 0x137   : > { %v1463_v1 = vadd.f32 %v1462_v56, %v1461_v48  ;;  %v1692_v2 = vrot.slane %v1691_v57, 1  ;;  %v1475_v4 = vadd.f32 %v1474_v60, %v1473_v52  ;;  %v1703_v5 = vadd.f32 %v1702_v61, %v1701_v53 }
 0x138   : > { %v1687_v3 = vadd.f32 %v1686_v59, %v1685_v51  ;;  %v2374_v6 = vpack.c.bf16 %v1201_v22, %v2812_v16  ;;  %v1699_v9 = vadd.f32 %v1698_v63, %v1697_v55 }
 0x139   : > { %v1564_v7 = vcombine.low %v1457_v58, %v1463_v1  ;;  %v1693_v8 = vadd.f32 %v1692_v2, %v1691_v57  ;;  %v1565_v10 = vcombine.low %v1469_v62, %v1475_v4  ;;  %v1704_v11 = vrot.slane %v1703_v5, 1 }
 0x13a   : > { %1961 = vst [vmem:[%s2822_s15 + $0x8] sm:$0xff] %v2374_v6 }
 0x13b   : > { %v2829_v13 = vrot.slane %v1564_v7, %v2814_v18  ;;  %v1794_v14 = vcombine.low %v1687_v3, %v1693_v8  ;;  %v2832_v15 = vrot.slane %v1565_v10, %v2814_v18  ;;  %v1705_v17 = vadd.f32 %v1704_v11, %v1703_v5 }
 0x13d   : > { %v2835_v12 = vrot.slane %v1794_v14, %v2814_v18  ;;  %v1596_v16 = vcombine.low %v2829_v13, %v2832_v15  ;;  %v1795_v19 = vcombine.low %v1699_v9, %v1705_v17 }
 0x13f   : > { %v2840_v20 = vrot.slane %v1795_v19, %v2814_v18 }
 0x141   : > { %v1826_v21 = vcombine.low %v2835_v12, %v2840_v20 }
 0x14b   : > { %v1240_v22 = vpop.f32.mrb[4].mxu0  ;;  %v1281_v25 = vpop.f32.mrb[4].mxu1 }
 0x14c   : > { %v1476_v23 = vrot.slane %v1240_v22, 4  ;;  %v1670_v24 = vmul.f32 %v1240_v22, %v1240_v22  ;;  %v1242_v26 = vpop.f32.mrb[5].mxu0  ;;  %v1488_v27 = vrot.slane %v1281_v25, 4  ;;  %v1672_v28 = vmul.f32 %v1281_v25, %v1281_v25  ;;  %v1283_v31 = vpop.f32.mrb[5].mxu1 }
 0x14d   : > { %v1482_v29 = vrot.slane %v1242_v26, 4  ;;  %v1671_v30 = vmul.f32 %v1242_v26, %v1242_v26  ;;  %v1244_v32 = vpop.f32.mrb[6].mxu0  ;;  %v2375_v35 = vpack.c.bf16 %v1242_v26, %v1240_v22  ;;  %v1494_v36 = vrot.slane %v1283_v31, 4  ;;  %v1285_v37 = vpop.f32.mrb[6].mxu1 }
 0x14e   : > { %v1477_v33 = vadd.f32 %v1476_v23, %v1240_v22  ;;  %v1706_v34 = vrot.slane %v1670_v24, 4  ;;  %v1245_v38 = vpop.f32.mrb[7].mxu0  ;;  %v1489_v39 = vadd.f32 %v1488_v27, %v1281_v25  ;;  %v1718_v40 = vrot.slane %v1672_v28, 4  ;;  %v1286_v42 = vpop.f32.mrb[7].mxu1 }
 0x14f   : > { %v1483_v41 = vadd.f32 %v1482_v29, %v1242_v26  ;;  %v1712_v0 = vrot.slane %v1671_v30, 4  ;;  %1962 = vst [vmem:[%s2822_s15 + $0x10] sm:$0xff] %v2375_v35  ;;  %v1495_v45 = vadd.f32 %v1494_v36, %v1283_v31  ;;  %v1673_v46 = vmul.f32 %v1283_v31, %v1283_v31 }
 0x150   : > { %v1478_v43 = vrot.slane %v1477_v33, 2  ;;  %v1707_v44 = vadd.f32 %v1706_v34, %v1670_v24  ;;  %v1490_v47 = vrot.slane %v1489_v39, 2  ;;  %v1719_v48 = vadd.f32 %v1718_v40, %v1672_v28 }
 0x151   : > { %v1484_v49 = vrot.slane %v1483_v41, 2  ;;  %v1713_v50 = vadd.f32 %v1712_v0, %v1671_v30  ;;  %v1496_v53 = vrot.slane %v1495_v45, 2  ;;  %v1724_v54 = vrot.slane %v1673_v46, 4 }
 0x152   : > { %v1479_v51 = vadd.f32 %v1478_v43, %v1477_v33  ;;  %v1708_v52 = vrot.slane %v1707_v44, 2  ;;  %v1491_v55 = vadd.f32 %v1490_v47, %v1489_v39  ;;  %v1720_v56 = vrot.slane %v1719_v48, 2 }
 0x153   : > { %v1485_v57 = vadd.f32 %v1484_v49, %v1483_v41  ;;  %v1714_v58 = vrot.slane %v1713_v50, 2  ;;  %v1497_v61 = vadd.f32 %v1496_v53, %v1495_v45  ;;  %v1725_v62 = vadd.f32 %v1724_v54, %v1673_v46 }
 0x154   : > { %v1480_v59 = vrot.slane %v1479_v51, 1  ;;  %v1709_v60 = vadd.f32 %v1708_v52, %v1707_v44  ;;  %v1492_v63 = vrot.slane %v1491_v55, 1  ;;  %v1721_v1 = vadd.f32 %v1720_v56, %v1719_v48 }
 0x155   : > { %v1486_v2 = vrot.slane %v1485_v57, 1  ;;  %v1715_v3 = vadd.f32 %v1714_v58, %v1713_v50  ;;  %v1498_v6 = vrot.slane %v1497_v61, 1  ;;  %v1726_v7 = vrot.slane %v1725_v62, 2 }
 0x156   : > { %v1481_v4 = vadd.f32 %v1480_v59, %v1479_v51  ;;  %v1710_v5 = vrot.slane %v1709_v60, 1  ;;  %v1493_v8 = vadd.f32 %v1492_v63, %v1491_v55  ;;  %v1722_v9 = vrot.slane %v1721_v1, 1 }
 0x157   : > { %v1487_v10 = vadd.f32 %v1486_v2, %v1485_v57  ;;  %v1716_v11 = vrot.slane %v1715_v3, 1  ;;  %v1499_v17 = vadd.f32 %v1498_v6, %v1497_v61  ;;  %v1727_v19 = vadd.f32 %v1726_v7, %v1725_v62 }
 0x158   : > { %v1711_v14 = vadd.f32 %v1710_v5, %v1709_v60  ;;  %v2376_v22 = vpack.c.bf16 %v1283_v31, %v1281_v25  ;;  %v1723_v26 = vadd.f32 %v1722_v9, %v1721_v1  ;;  %v1604_v25 = vrot.slane %v1596_v16, %v2814_v18 }
 0x159   : > { %v1566_v23 = vcombine.low %v1481_v4, %v1487_v10  ;;  %v1717_v24 = vadd.f32 %v1716_v11, %v1715_v3  ;;  %v1567_v27 = vcombine.low %v1493_v8, %v1499_v17  ;;  %v1728_v28 = vrot.slane %v1727_v19, 1 }
 0x15a   : > { %1963 = vst [vmem:[%s2822_s15 + $0x18] sm:$0xff] %v2376_v22  ;;  %v1834_v40 = vrot.slane %v1826_v21, %v2814_v18 }
 0x15b   : > { %v1588_v29 = vrot.slane %v1566_v23, %v2814_v18  ;;  %v1796_v30 = vcombine.low %v1711_v14, %v1717_v24  ;;  %v1595_v32 = vrot.slane %v1567_v27, %v2814_v18  ;;  %v1729_v33 = vadd.f32 %v1728_v28, %v1727_v19 }
 0x15d   : > { %v1818_v34 = vrot.slane %v1796_v30, %v2814_v18  ;;  %v1597_v35 = vcombine.low %v1588_v29, %v1595_v32  ;;  %v1797_v36 = vcombine.low %v1723_v26, %v1729_v33 }
 0x15f   : > { %v1611_v31 = vrot.slane %v1597_v35, %v2814_v18  ;;  %v1825_v37 = vrot.slane %v1797_v36, %v2814_v18 }
 0x161   : > { %v1612_v38 = vcombine.low %v1604_v25, %v1611_v31  ;;  %v1827_v39 = vcombine.low %v1818_v34, %v1825_v37 }
 0x163   : > { %1664 = vst [vmem:[%s2859_s24] sm:$0xff] %v1612_v38  ;;  %v1841_v13 = vrot.slane %v1827_v39, %v2814_v18 }
 0x165   : > { %v1842_v15 = vcombine.low %v1834_v40, %v1841_v13 }
 0x167   : > { %1894 = vst [vmem:[%s2871_s29] sm:$0xff] %v1842_v15 }
 0x16b   : > { %v1322_v16 = vpop.f32.mrb[8].mxu0  ;;  %v1363_v42 = vpop.f32.mrb[8].mxu1 }
 0x16c   : > { %v1500_v41 = vrot.slane %v1322_v16, 4  ;;  %v1674_v0 = vmul.f32 %v1322_v16, %v1322_v16  ;;  %v1324_v43 = vpop.f32.mrb[9].mxu0  ;;  %v1512_v44 = vrot.slane %v1363_v42, 4  ;;  %v1676_v45 = vmul.f32 %v1363_v42, %v1363_v42  ;;  %v1365_v21 = vpop.f32.mrb[9].mxu1 }
 0x16d   : > { %v1506_v12 = vrot.slane %v1324_v43, 4  ;;  %v1675_v20 = vmul.f32 %v1324_v43, %v1324_v43  ;;  %v1326_v46 = vpop.f32.mrb[10].mxu0  ;;  %v2377_v49 = vpack.c.bf16 %v1324_v43, %v1322_v16  ;;  %v1518_v50 = vrot.slane %v1365_v21, 4  ;;  %v1367_v51 = vpop.f32.mrb[10].mxu1 }
 0x16e   : > { %v1501_v47 = vadd.f32 %v1500_v41, %v1322_v16  ;;  %v1730_v48 = vrot.slane %v1674_v0, 4  ;;  %v1327_v52 = vpop.f32.mrb[11].mxu0  ;;  %v1513_v53 = vadd.f32 %v1512_v44, %v1363_v42  ;;  %v1742_v54 = vrot.slane %v1676_v45, 4  ;;  %v1368_v57 = vpop.f32.mrb[11].mxu1 }
 0x16f   : > { %v1507_v55 = vadd.f32 %v1506_v12, %v1324_v43  ;;  %v1736_v56 = vrot.slane %v1675_v20, 4  ;;  %1964 = vst [vmem:[%s2822_s15 + $0x20] sm:$0xff] %v2377_v49  ;;  %v1519_v60 = vadd.f32 %v1518_v50, %v1365_v21  ;;  %v1677_v61 = vmul.f32 %v1365_v21, %v1365_v21 }
 0x170   : > { %v1502_v58 = vrot.slane %v1501_v47, 2  ;;  %v1731_v59 = vadd.f32 %v1730_v48, %v1674_v0  ;;  %v1514_v62 = vrot.slane %v1513_v53, 2  ;;  %v1743_v63 = vadd.f32 %v1742_v54, %v1676_v45 }
 0x171   : > { %v1508_v1 = vrot.slane %v1507_v55, 2  ;;  %v1737_v2 = vadd.f32 %v1736_v56, %v1675_v20  ;;  %v1520_v5 = vrot.slane %v1519_v60, 2  ;;  %v1748_v6 = vrot.slane %v1677_v61, 4 }
 0x172   : > { %v1503_v3 = vadd.f32 %v1502_v58, %v1501_v47  ;;  %v1732_v4 = vrot.slane %v1731_v59, 2  ;;  %v1515_v7 = vadd.f32 %v1514_v62, %v1513_v53  ;;  %v1744_v8 = vrot.slane %v1743_v63, 2 }
 0x173   : > { %v1509_v9 = vadd.f32 %v1508_v1, %v1507_v55  ;;  %v1738_v10 = vrot.slane %v1737_v2, 2  ;;  %v1521_v17 = vadd.f32 %v1520_v5, %v1519_v60  ;;  %v1749_v19 = vadd.f32 %v1748_v6, %v1677_v61 }
 0x174   : > { %v1504_v11 = vrot.slane %v1503_v3, 1  ;;  %v1733_v14 = vadd.f32 %v1732_v4, %v1731_v59  ;;  %v1516_v22 = vrot.slane %v1515_v7, 1  ;;  %v1745_v23 = vadd.f32 %v1744_v8, %v1743_v63 }
 0x175   : > { %v1510_v24 = vrot.slane %v1509_v9, 1  ;;  %v1739_v26 = vadd.f32 %v1738_v10, %v1737_v2  ;;  %v1522_v29 = vrot.slane %v1521_v17, 1  ;;  %v1750_v30 = vrot.slane %v1749_v19, 2 }
 0x176   : > { %v1505_v27 = vadd.f32 %v1504_v11, %v1503_v3  ;;  %v1734_v28 = vrot.slane %v1733_v14, 1  ;;  %v1517_v32 = vadd.f32 %v1516_v22, %v1515_v7  ;;  %v1746_v33 = vrot.slane %v1745_v23, 1 }
 0x177   : > { %v1511_v34 = vadd.f32 %v1510_v24, %v1509_v9  ;;  %v1740_v35 = vrot.slane %v1739_v26, 1  ;;  %v1523_v25 = vadd.f32 %v1522_v29, %v1521_v17  ;;  %v1751_v31 = vadd.f32 %v1750_v30, %v1749_v19 }
 0x178   : > { %v1735_v36 = vadd.f32 %v1734_v28, %v1733_v14  ;;  %v2378_v37 = vpack.c.bf16 %v1365_v21, %v1363_v42  ;;  %v1747_v40 = vadd.f32 %v1746_v33, %v1745_v23 }
 0x179   : > { %v1613_v38 = vcombine.low %v1505_v27, %v1511_v34  ;;  %v1741_v39 = vadd.f32 %v1740_v35, %v1739_v26  ;;  %v1614_v13 = vcombine.low %v1517_v32, %v1523_v25  ;;  %v1752_v15 = vrot.slane %v1751_v31, 1 }
 0x17a   : > { %1965 = vst [vmem:[%s2822_s15 + $0x28] sm:$0xff] %v2378_v37 }
 0x17b   : > { %v2877_v16 = vrot.slane %v1613_v38, %v2814_v18  ;;  %v1843_v41 = vcombine.low %v1735_v36, %v1741_v39  ;;  %v2880_v0 = vrot.slane %v1614_v13, %v2814_v18  ;;  %v1753_v43 = vadd.f32 %v1752_v15, %v1751_v31 }
 0x17d   : > { %v2883_v44 = vrot.slane %v1843_v41, %v2814_v18  ;;  %v1645_v42 = vcombine.low %v2877_v16, %v2880_v0  ;;  %v1844_v45 = vcombine.low %v1747_v40, %v1753_v43 }
 0x17f   : > { %v2888_v12 = vrot.slane %v1844_v45, %v2814_v18 }
 0x181   : > { %v1875_v20 = vcombine.low %v2883_v44, %v2888_v12 }
 0x18b   : > { %v1404_v21 = vpop.f32.mrb[12].mxu0  ;;  %v1445_v48 = vpop.f32.mrb[12].mxu1 }
 0x18c   : > { %v1524_v46 = vrot.slane %v1404_v21, 4  ;;  %v1678_v47 = vmul.f32 %v1404_v21, %v1404_v21  ;;  %v1406_v49 = vpop.f32.mrb[13].mxu0  ;;  %v1536_v50 = vrot.slane %v1445_v48, 4  ;;  %v1680_v51 = vmul.f32 %v1445_v48, %v1445_v48  ;;  %v1447_v54 = vpop.f32.mrb[13].mxu1 }
 0x18d   : > { %v1530_v52 = vrot.slane %v1406_v49, 4  ;;  %v1679_v53 = vmul.f32 %v1406_v49, %v1406_v49  ;;  %v1408_v55 = vpop.f32.mrb[14].mxu0  ;;  %v2379_v58 = vpack.c.bf16 %v1406_v49, %v1404_v21  ;;  %v1542_v59 = vrot.slane %v1447_v54, 4  ;;  %v1449_v60 = vpop.f32.mrb[14].mxu1 }
 0x18e   : > { %v1525_v56 = vadd.f32 %v1524_v46, %v1404_v21  ;;  %v1754_v57 = vrot.slane %v1678_v47, 4  ;;  %v1409_v61 = vpop.f32.mrb[15].mxu0  ;;  %v1537_v62 = vadd.f32 %v1536_v50, %v1445_v48  ;;  %v1766_v63 = vrot.slane %v1680_v51, 4  ;;  %v1450_v3 = vpop.f32.mrb[15].mxu1 }
 0x18f   : > { %v1531_v1 = vadd.f32 %v1530_v52, %v1406_v49  ;;  %v1760_v2 = vrot.slane %v1679_v53, 4  ;;  %1966 = vst [vmem:[%s2822_s15 + $0x30] sm:$0xff] %v2379_v58  ;;  %v1543_v6 = vadd.f32 %v1542_v59, %v1447_v54  ;;  %v1681_v7 = vmul.f32 %v1447_v54, %v1447_v54 }
 0x190   : > { %v1526_v4 = vrot.slane %v1525_v56, 2  ;;  %v1755_v5 = vadd.f32 %v1754_v57, %v1678_v47  ;;  %v1538_v8 = vrot.slane %v1537_v62, 2  ;;  %v1767_v9 = vadd.f32 %v1766_v63, %v1680_v51 }
 0x191   : > { %v1532_v10 = vrot.slane %v1531_v1, 2  ;;  %v1761_v11 = vadd.f32 %v1760_v2, %v1679_v53  ;;  %v1544_v19 = vrot.slane %v1543_v6, 2  ;;  %v1772_v22 = vrot.slane %v1681_v7, 4 }
 0x192   : > { %v1527_v14 = vadd.f32 %v1526_v4, %v1525_v56  ;;  %v1756_v17 = vrot.slane %v1755_v5, 2  ;;  %v1539_v23 = vadd.f32 %v1538_v8, %v1537_v62  ;;  %v1768_v24 = vrot.slane %v1767_v9, 2 }
 0x193   : > { %v1533_v26 = vadd.f32 %v1532_v10, %v1531_v1  ;;  %v1762_v27 = vrot.slane %v1761_v11, 2  ;;  %v1545_v30 = vadd.f32 %v1544_v19, %v1543_v6  ;;  %v1773_v32 = vadd.f32 %v1772_v22, %v1681_v7 }
 0x194   : > { %v1528_v28 = vrot.slane %v1527_v14, 1  ;;  %v1757_v29 = vadd.f32 %v1756_v17, %v1755_v5  ;;  %v1540_v33 = vrot.slane %v1539_v23, 1  ;;  %v1769_v34 = vadd.f32 %v1768_v24, %v1767_v9 }
 0x195   : > { %v1534_v35 = vrot.slane %v1533_v26, 1  ;;  %v1763_v36 = vadd.f32 %v1762_v27, %v1761_v11  ;;  %v1546_v37 = vrot.slane %v1545_v30, 1  ;;  %v1774_v38 = vrot.slane %v1773_v32, 2 }
 0x196   : > { %v1529_v25 = vadd.f32 %v1528_v28, %v1527_v14  ;;  %v1758_v31 = vrot.slane %v1757_v29, 1  ;;  %v1541_v39 = vadd.f32 %v1540_v33, %v1539_v23  ;;  %v1770_v40 = vrot.slane %v1769_v34, 1 }
 0x197   : > { %v1535_v13 = vadd.f32 %v1534_v35, %v1533_v26  ;;  %v1764_v15 = vrot.slane %v1763_v36, 1  ;;  %v1547_v43 = vadd.f32 %v1546_v37, %v1545_v30  ;;  %v1775_v45 = vadd.f32 %v1774_v38, %v1773_v32 }
 0x198   : > { %v1759_v41 = vadd.f32 %v1758_v31, %v1757_v29  ;;  %v2380_v21 = vpack.c.bf16 %v1447_v54, %v1445_v48  ;;  %v1771_v49 = vadd.f32 %v1770_v40, %v1769_v34  ;;  %v1653_v48 = vrot.slane %v1645_v42, %v2814_v18 }
 0x199   : > { %v1615_v46 = vcombine.low %v1529_v25, %v1535_v13  ;;  %v1765_v47 = vadd.f32 %v1764_v15, %v1763_v36  ;;  %v1616_v50 = vcombine.low %v1541_v39, %v1547_v43  ;;  %v1776_v51 = vrot.slane %v1775_v45, 1 }
 0x19a   : > { %1967 = vst [vmem:[%s2822_s15 + $0x38] sm:$0xff] %v2380_v21  ;;  %v1883_v63 = vrot.slane %v1875_v20, %v2814_v18 }
 0x19b   : > { %v1637_v52 = vrot.slane %v1615_v46, %v2814_v18  ;;  %v1845_v53 = vcombine.low %v1759_v41, %v1765_v47  ;;  %v1644_v55 = vrot.slane %v1616_v50, %v2814_v18  ;;  %v1777_v56 = vadd.f32 %v1776_v51, %v1775_v45 }
 0x19d   : > { %v1867_v57 = vrot.slane %v1845_v53, %v2814_v18  ;;  %v1646_v58 = vcombine.low %v1637_v52, %v1644_v55  ;;  %v1846_v59 = vcombine.low %v1771_v49, %v1777_v56 }
 0x19f   : > { %v1660_v54 = vrot.slane %v1646_v58, %v2814_v18  ;;  %v1874_v60 = vrot.slane %v1846_v59, %v2814_v18 }
 0x1a1   : > { %v1661_v61 = vcombine.low %v1653_v48, %v1660_v54  ;;  %v1876_v62 = vcombine.low %v1867_v57, %v1874_v60 }
 0x1a3   : > { %1665 = vst [vmem:[%s2859_s24 + $0x8] sm:$0xff] %v1661_v61  ;;  %v1890_v1 = vrot.slane %v1876_v62, %v2814_v18 }
 0x1a5   : > { %v1891_v2 = vcombine.low %v1883_v63, %v1890_v1 }
 0x1a7   : > { %1895 = vst [vmem:[%s2871_s29 + $0x8] sm:$0xff] %v1891_v2 }
 0x1a8 PF: > { %s18_s20 = sadd.s32 1, %s2521_s20   ;;  %s2937_s15 = smov %s2505_s16 }
 0x1a9   : > { %p15_p9 = scmp.ge.s32.totalorder %s18_s20, 6   ;;  %s2938_s16 = smov %s2509_s17 }
 0x1aa   : > { %s2939_s17 = smov %s2603_s27  ;;  %s2940_s18 = smov %s2517_s19 }
 0x1ab   : > { %s2941_s19 = smov %s2943_s22  ;;  %17 = sbr.rel (!%p15_p9) target bundleno = 4 (0x4), region = 95 }
 0x1b2   :  { %2068 = vsyncpa [#allocation3], 1 }
 0x1b3   :  { %2070 = vsyncpa [#allocation3 + $0x1], 1 }

// kernel: generator_forward.5
= control target key start
LH: loop header
LB: loop body
LE: loop exit
PB: predicated region body
PF: predicated region fallthrough
CT: control target
= control target key end

     0   :  { %s3704_s15 = smov 0   ;;  %s3706_s16 = smov 0   ;;  %s4098_s0 = inlined_call_operand.vmem [shape: bf16[4,32,2048], index: 0, kind: input, shape index: {}]   ;;  %s4099_s1 = inlined_call_operand.vmem [shape: bf16[4,2048,256], index: 1, kind: input, shape index: {}]   ;;  %s4100_s2 = inlined_call_operand.vmem [shape: bf16[4,32,256], index: 2, kind: output, shape index: {0}]   ;;  %s4101_s3 = inlined_call_operand.vmem [shape: f32[4,1,1,256], index: 3, kind: output, shape index: {1}]   ;;  %s4102_s4 = inlined_call_operand.vmem [shape: f32[4,1,1,256], index: 4, kind: output, shape index: {2}]  }
   0x1   :  { %s3708_s17 = smov 0  }
   0x2 LB: > { %s34_s18 = sadd.s32 1, %s3672_s16  ;;  %p2879_p0 = scmp.ge.s32.totalorder %s3676_s17, 1  ;;  %s3676_s17 = sphi %s3708_s17, %s15_s17   ;;  %s3672_s16 = sphi %s3706_s16, %s4104_s16   ;;  %s3668_s15 = sphi %s3704_s15, %s4103_s15  }
   0x3   : > { %p36_p1 = scmp.ge.s32.totalorder %s34_s18, 4  ;;  %p223_p2 = scmp.lt.s32.totalorder %s3676_s17, 5 }
   0x5   : > { %s4106_s18 = smov (%p36_p1, %s34_s18), 0  ;;  %p224_p3 = pnand %p2879_p0, %p223_p2 }
   0x6   : > { %p297_p4 = scmp.lt.s32.totalorder (!%p224_p3), %s3668_s15, 3 }
   0x7   : > { %227 = sbr.rel (%p224_p3) target bundleno = 523 (0x20b), region = 28 }
   0xe   : > { %s4108_s15 = smov (!%p297_p4, %s3668_s15), 3 }
   0xf   : > { %s3183_s19 = sshll.u32 %s4108_s15, 11  ;;  %s3182_s23 = sshll.u32 %s4108_s15, 8 }
  0x10   : > { %s3728_s22 = scalar_lea.vmem %s4099_s1, %s3183_s19  ;;  %s3778_s26 = scalar_lea.vmem %s4098_s0, %s3182_s23 }
  0x11   : > { %v3270_v0 = vld [vmem:[%s3728_s22 + $0x4] ss:$8 sps:$4 sm:$0xff]   ;;  %v3274_v2 = vld [vmem:[%s3728_s22] ss:$8 sps:$4 sm:$0xff]   ;;  %v3276_v4 = vld [vmem:[%s3728_s22 + $0x14] ss:$8 sps:$4 sm:$0xff]  }
  0x12   : > { %v3272_v1 = vld [vmem:[%s3728_s22 + $0x404] ss:$8 sps:$4 sm:$0xff]   ;;  %2087 = vmatprep.subr.bf16.mxu1 %v3270_v0  ;;  %v3275_v3 = vld [vmem:[%s3728_s22 + $0x400] ss:$8 sps:$4 sm:$0xff]   ;;  %v3278_v5 = vld [vmem:[%s3728_s22 + $0x414] ss:$8 sps:$4 sm:$0xff]  }
  0x13   : > { %2299 = vmatprep.subr.bf16.mxu0 %v3272_v1  ;;  %2088 = vmatpush1.bf16.msra.mxu1 %v3274_v2  ;;  %v3280_v6 = vld [vmem:[%s3728_s22 + $0x10] ss:$8 sps:$4 sm:$0xff]   ;;  %v3282_v8 = vld [vmem:[%s3728_s22 + $0x24] ss:$8 sps:$4 sm:$0xff]   ;;  %v3286_v10 = vld [vmem:[%s3728_s22 + $0x20] ss:$8 sps:$4 sm:$0xff]  }
  0x14   : > { %2300 = vmatpush1.bf16.msra.mxu0 %v3275_v3  ;;  %2089 = vmatprep.subr.bf16.mxu1 %v3276_v4  ;;  %v3281_v7 = vld [vmem:[%s3728_s22 + $0x410] ss:$8 sps:$4 sm:$0xff]   ;;  %v3284_v9 = vld [vmem:[%s3728_s22 + $0x424] ss:$8 sps:$4 sm:$0xff]   ;;  %v3287_v11 = vld [vmem:[%s3728_s22 + $0x420] ss:$8 sps:$4 sm:$0xff]  }
  0x15   : > { %2301 = vmatprep.subr.bf16.mxu0 %v3278_v5  ;;  %v3288_v12 = vld [vmem:[%s3728_s22 + $0x34] ss:$8 sps:$4 sm:$0xff]   ;;  %v3292_v14 = vld [vmem:[%s3728_s22 + $0x30] ss:$8 sps:$4 sm:$0xff]   ;;  %v3294_v16 = vld [vmem:[%s3728_s22 + $0x44] ss:$8 sps:$4 sm:$0xff]  }
  0x16   : > { %v3290_v13 = vld [vmem:[%s3728_s22 + $0x434] ss:$8 sps:$4 sm:$0xff]   ;;  %v3293_v15 = vld [vmem:[%s3728_s22 + $0x430] ss:$8 sps:$4 sm:$0xff]   ;;  %v3296_v17 = vld [vmem:[%s3728_s22 + $0x444] ss:$8 sps:$4 sm:$0xff]  }
  0x17   : > { %2090 = vmatpush1.bf16.msra.mxu1 %v3280_v6  ;;  %v3298_v18 = vld [vmem:[%s3728_s22 + $0x40] ss:$8 sps:$4 sm:$0xff]   ;;  %v3300_v20 = vld [vmem:[%s3728_s22 + $0x54] ss:$8 sps:$4 sm:$0xff]   ;;  %v3304_v22 = vld [vmem:[%s3728_s22 + $0x50] ss:$8 sps:$4 sm:$0xff]  }
  0x18   : > { %2302 = vmatpush1.bf16.msra.mxu0 %v3281_v7  ;;  %2091 = vmatprep.subr.bf16.mxu1 %v3282_v8  ;;  %v3299_v19 = vld [vmem:[%s3728_s22 + $0x440] ss:$8 sps:$4 sm:$0xff]   ;;  %v3302_v21 = vld [vmem:[%s3728_s22 + $0x454] ss:$8 sps:$4 sm:$0xff]   ;;  %v3305_v23 = vld [vmem:[%s3728_s22 + $0x450] ss:$8 sps:$4 sm:$0xff]  }
  0x19   : > { %2303 = vmatprep.subr.bf16.mxu0 %v3284_v9  ;;  %v3306_v24 = vld [vmem:[%s3728_s22 + $0x64] ss:$8 sps:$4 sm:$0xff]   ;;  %v3310_v26 = vld [vmem:[%s3728_s22 + $0x60] ss:$8 sps:$4 sm:$0xff]   ;;  %v3312_v28 = vld [vmem:[%s3728_s22 + $0x74] ss:$8 sps:$4 sm:$0xff]  }
  0x1a   : > { %v3308_v25 = vld [vmem:[%s3728_s22 + $0x464] ss:$8 sps:$4 sm:$0xff]   ;;  %v3311_v27 = vld [vmem:[%s3728_s22 + $0x460] ss:$8 sps:$4 sm:$0xff]   ;;  %v3314_v29 = vld [vmem:[%s3728_s22 + $0x474] ss:$8 sps:$4 sm:$0xff]  }
  0x1b   : > { %2092 = vmatpush1.bf16.msra.mxu1 %v3286_v10  ;;  %v3316_v30 = vld [vmem:[%s3728_s22 + $0x70] ss:$8 sps:$4 sm:$0xff]   ;;  %v3318_v32 = vld [vmem:[%s3728_s22 + $0x84] ss:$8 sps:$4 sm:$0xff]   ;;  %v3322_v34 = vld [vmem:[%s3728_s22 + $0x80] ss:$8 sps:$4 sm:$0xff]  }
  0x1c   : > { %2304 = vmatpush1.bf16.msra.mxu0 %v3287_v11  ;;  %2093 = vmatprep.subr.bf16.mxu1 %v3288_v12  ;;  %v3317_v31 = vld [vmem:[%s3728_s22 + $0x470] ss:$8 sps:$4 sm:$0xff]   ;;  %v3320_v33 = vld [vmem:[%s3728_s22 + $0x484] ss:$8 sps:$4 sm:$0xff]   ;;  %v3323_v35 = vld [vmem:[%s3728_s22 + $0x480] ss:$8 sps:$4 sm:$0xff]  }
  0x1d   : > { %2305 = vmatprep.subr.bf16.mxu0 %v3290_v13  ;;  %v3324_v36 = vld [vmem:[%s3728_s22 + $0x94] ss:$8 sps:$4 sm:$0xff]   ;;  %v3328_v38 = vld [vmem:[%s3728_s22 + $0x90] ss:$8 sps:$4 sm:$0xff]   ;;  %v3330_v40 = vld [vmem:[%s3728_s22 + $0xa4] ss:$8 sps:$4 sm:$0xff]  }
  0x1e   : > { %v3326_v37 = vld [vmem:[%s3728_s22 + $0x494] ss:$8 sps:$4 sm:$0xff]   ;;  %v3329_v39 = vld [vmem:[%s3728_s22 + $0x490] ss:$8 sps:$4 sm:$0xff]   ;;  %v3332_v41 = vld [vmem:[%s3728_s22 + $0x4a4] ss:$8 sps:$4 sm:$0xff]  }
  0x1f   : > { %2094 = vmatpush1.bf16.msra.mxu1 %v3292_v14  ;;  %v3334_v42 = vld [vmem:[%s3728_s22 + $0xa0] ss:$8 sps:$4 sm:$0xff]   ;;  %v3336_v44 = vld [vmem:[%s3728_s22 + $0xb4] ss:$8 sps:$4 sm:$0xff]   ;;  %v3340_v46 = vld [vmem:[%s3728_s22 + $0xb0] ss:$8 sps:$4 sm:$0xff]  }
  0x20   : > { %2306 = vmatpush1.bf16.msra.mxu0 %v3293_v15  ;;  %2095 = vmatprep.subr.bf16.mxu1 %v3294_v16  ;;  %v3335_v43 = vld [vmem:[%s3728_s22 + $0x4a0] ss:$8 sps:$4 sm:$0xff]   ;;  %v3338_v45 = vld [vmem:[%s3728_s22 + $0x4b4] ss:$8 sps:$4 sm:$0xff]   ;;  %v3341_v47 = vld [vmem:[%s3728_s22 + $0x4b0] ss:$8 sps:$4 sm:$0xff]  }
  0x21   : > { %2307 = vmatprep.subr.bf16.mxu0 %v3296_v17  ;;  %v359_v48 = vld [vmem:[%s3778_s26] sm:$0xff]  ;;  %v3348_v58 = vld [vmem:[%s3728_s22 + $0xd4] ss:$8 sps:$4 sm:$0xff]   ;;  %v3352_v60 = vld [vmem:[%s3728_s22 + $0xd0] ss:$8 sps:$4 sm:$0xff]   ;;  %s3184_s27 = sshll.u32 %s4108_s15, 5 }
  0x22   : > { %v367_v49 = vld [vmem:[%s3778_s26 + $0x40] sm:$0xff]  ;;  %v3350_v59 = vld [vmem:[%s3728_s22 + $0x4d4] ss:$8 sps:$4 sm:$0xff]   ;;  %v3353_v61 = vld [vmem:[%s3728_s22 + $0x4d0] ss:$8 sps:$4 sm:$0xff]   ;;  %s4076_s30 = scalar_lea.vmem %s4100_s2, %s3184_s27  ;;  %s2886_s5 = sshll.u32 %s4108_s15, 1 }
  0x23   : > { %2096 = vmatpush1.bf16.msra.mxu1 %v3298_v18  ;;  %v3342_v50 = vld [vmem:[%s3728_s22 + $0xc4] ss:$8 sps:$4 sm:$0xff]   ;;  %v2889_v52 = vcombine.high %v359_v48, %v367_v49  ;;  %v3346_v56 = vld [vmem:[%s3728_s22 + $0xc0] ss:$8 sps:$4 sm:$0xff]   ;;  %v3360_v2 = vld [vmem:[%s3728_s22 + $0xf4] ss:$8 sps:$4 sm:$0xff]   ;;  %v2888_v8 = vcombine.low %v359_v48, %v367_v49  ;;  %s344_s8 = scalar_lea.vmem %s4101_s3, %s2886_s5  ;;  %s357_s11 = scalar_lea.vmem %s4102_s4, %s2886_s5 }
  0x24   : > { %2308 = vmatpush1.bf16.msra.mxu0 %v3299_v19  ;;  %2097 = vmatprep.subr.bf16.mxu1 %v3300_v20  ;;  %v3344_v51 = vld [vmem:[%s3728_s22 + $0x4c4] ss:$8 sps:$4 sm:$0xff]   ;;  %v3347_v57 = vld [vmem:[%s3728_s22 + $0x4c0] ss:$8 sps:$4 sm:$0xff]   ;;  %v3362_v3 = vld [vmem:[%s3728_s22 + $0x4f4] ss:$8 sps:$4 sm:$0xff]  }
  0x25   : > { %2309 = vmatprep.subr.bf16.mxu0 %v3302_v21  ;;  %v363_v53 = vld [vmem:[%s3778_s26 + $0x20] sm:$0xff]  ;;  %2119 = vmatprep.mubr.bf16.mxu1 %v2889_v52  ;;  %v3364_v4 = vld [vmem:[%s3728_s22 + $0xf0] ss:$8 sps:$4 sm:$0xff]   ;;  %v3374_v12 = vld [vmem:[%s3728_s22 + $0x114] ss:$8 sps:$4 sm:$0xff]  }
  0x26   : > { %v371_v54 = vld [vmem:[%s3778_s26 + $0x60] sm:$0xff]  ;;  %v3365_v5 = vld [vmem:[%s3728_s22 + $0x4f0] ss:$8 sps:$4 sm:$0xff]   ;;  %v3377_v13 = vld [vmem:[%s3728_s22 + $0x514] ss:$8 sps:$4 sm:$0xff]  }
  0x27   : > { %2098 = vmatpush1.bf16.msra.mxu1 %v3304_v22  ;;  %v2897_v55 = vcombine.high %v363_v53, %v371_v54  ;;  %v3354_v62 = vld [vmem:[%s3728_s22 + $0xe4] ss:$8 sps:$4 sm:$0xff]   ;;  %v3358_v0 = vld [vmem:[%s3728_s22 + $0xe0] ss:$8 sps:$4 sm:$0xff]   ;;  %v2896_v10 = vcombine.low %v363_v53, %v371_v54  ;;  %v3372_v14 = vld [vmem:[%s3728_s22 + $0x110] ss:$8 sps:$4 sm:$0xff]  }
  0x28   : > { %2310 = vmatpush1.bf16.msra.mxu0 %v3305_v23  ;;  %2099 = vmatprep.subr.bf16.mxu1 %v3306_v24  ;;  %v3356_v63 = vld [vmem:[%s3728_s22 + $0x4e4] ss:$8 sps:$4 sm:$0xff]   ;;  %v3359_v1 = vld [vmem:[%s3728_s22 + $0x4e0] ss:$8 sps:$4 sm:$0xff]   ;;  %v3375_v15 = vld [vmem:[%s3728_s22 + $0x510] ss:$8 sps:$4 sm:$0xff]  }
  0x29   : > { %2311 = vmatprep.subr.bf16.mxu0 %v3308_v25  ;;  %2331 = vmatprep.mubr.bf16.mxu0 %v2897_v55  ;;  %v3368_v6 = vld [vmem:[%s3728_s22 + $0x104] ss:$8 sps:$4 sm:$0xff]   ;;  %v3366_v9 = vld [vmem:[%s3728_s22 + $0x100] ss:$8 sps:$4 sm:$0xff]   ;;  %v3386_v20 = vld [vmem:[%s3728_s22 + $0x134] ss:$8 sps:$4 sm:$0xff]  }
  0x2a   : > { %v3371_v7 = vld [vmem:[%s3728_s22 + $0x504] ss:$8 sps:$4 sm:$0xff]   ;;  %v3369_v11 = vld [vmem:[%s3728_s22 + $0x500] ss:$8 sps:$4 sm:$0xff]   ;;  %v3389_v21 = vld [vmem:[%s3728_s22 + $0x534] ss:$8 sps:$4 sm:$0xff]  }
  0x2b   : > { %2100 = vmatpush1.bf16.msra.mxu1 %v3310_v26  ;;  %v3380_v16 = vld [vmem:[%s3728_s22 + $0x124] ss:$8 sps:$4 sm:$0xff]   ;;  %v3378_v18 = vld [vmem:[%s3728_s22 + $0x120] ss:$8 sps:$4 sm:$0xff]   ;;  %v3384_v22 = vld [vmem:[%s3728_s22 + $0x130] ss:$8 sps:$4 sm:$0xff]  }
  0x2c   : > { %2312 = vmatpush1.bf16.msra.mxu0 %v3311_v27  ;;  %2101 = vmatprep.subr.bf16.mxu1 %v3312_v28  ;;  %v3383_v17 = vld [vmem:[%s3728_s22 + $0x524] ss:$8 sps:$4 sm:$0xff]   ;;  %v3381_v19 = vld [vmem:[%s3728_s22 + $0x520] ss:$8 sps:$4 sm:$0xff]   ;;  %v3387_v23 = vld [vmem:[%s3728_s22 + $0x530] ss:$8 sps:$4 sm:$0xff]  }
  0x2d   : > { %2313 = vmatprep.subr.bf16.mxu0 %v3314_v29  ;;  %v3392_v24 = vld [vmem:[%s3728_s22 + $0x144] ss:$8 sps:$4 sm:$0xff]   ;;  %v3390_v26 = vld [vmem:[%s3728_s22 + $0x140] ss:$8 sps:$4 sm:$0xff]   ;;  %v3398_v28 = vld [vmem:[%s3728_s22 + $0x154] ss:$8 sps:$4 sm:$0xff]  }
  0x2e   : > { %v3395_v25 = vld [vmem:[%s3728_s22 + $0x544] ss:$8 sps:$4 sm:$0xff]   ;;  %v3393_v27 = vld [vmem:[%s3728_s22 + $0x540] ss:$8 sps:$4 sm:$0xff]   ;;  %v3401_v29 = vld [vmem:[%s3728_s22 + $0x554] ss:$8 sps:$4 sm:$0xff]  }
  0x2f   : > { %2102 = vmatpush1.bf16.msra.mxu1 %v3316_v30  ;;  %v375_v30 = vld [vmem:[%s3778_s26 + $0x80] sm:$0xff]  ;;  %v3847_v49 = vld [vmem:[%s3778_s26 + $0x28] sm:$0xff]  ;;  %v3411_v52 = vld [vmem:[%s3728_s22 + $0x570] ss:$8 sps:$4 sm:$0xff]  }
  0x30   : > { %2314 = vmatpush1.bf16.msra.mxu0 %v3317_v31  ;;  %2103 = vmatprep.subr.bf16.mxu1 %v3318_v32  ;;  %v383_v31 = vld [vmem:[%s3778_s26 + $0xc0] sm:$0xff]  ;;  %v3396_v32 = vld [vmem:[%s3728_s22 + $0x150] ss:$8 sps:$4 sm:$0xff]  }
  0x31   : > { %2315 = vmatprep.subr.bf16.mxu0 %v3320_v33  ;;  %v2905_v33 = vcombine.high %v375_v30, %v383_v31  ;;  %v3416_v54 = vld [vmem:[%s3728_s22 + $0x184] ss:$8 sps:$4 sm:$0xff]  }
  0x32   : > { %v3419_v55 = vld [vmem:[%s3728_s22 + $0x584] ss:$8 sps:$4 sm:$0xff]  }
  0x33   : > { %2104 = vmatpush1.bf16.msra.mxu1 %v3322_v34  ;;  %v3399_v34 = vld [vmem:[%s3728_s22 + $0x550] ss:$8 sps:$4 sm:$0xff]  }
  0x34   : > { %2316 = vmatpush1.bf16.msra.mxu0 %v3323_v35  ;;  %2105 = vmatprep.subr.bf16.mxu1 %v3324_v36  ;;  %v379_v35 = vld [vmem:[%s3778_s26 + $0xa0] sm:$0xff] }
  0x35   : > { %2317 = vmatprep.subr.bf16.mxu0 %v3326_v37  ;;  %v387_v36 = vld [vmem:[%s3778_s26 + $0xe0] sm:$0xff]  ;;  %v2904_v37 = vcombine.low %v375_v30, %v383_v31  ;;  %v3470_v30 = vld [vmem:[%s3728_s22 + $0x214] ss:$8 sps:$4 sm:$0xff]  }
  0x36   : > { %v3473_v31 = vld [vmem:[%s3728_s22 + $0x614] ss:$8 sps:$4 sm:$0xff]  }
  0x37   : > { %2106 = vmatpush1.bf16.msra.mxu1 %v3328_v38  ;;  %v3404_v38 = vld [vmem:[%s3728_s22 + $0x164] ss:$8 sps:$4 sm:$0xff]  }
  0x38   : > { %2318 = vmatpush1.bf16.msra.mxu0 %v3329_v39  ;;  %2107 = vmatprep.subr.bf16.mxu1 %v3330_v40  ;;  %v2913_v39 = vcombine.high %v379_v35, %v387_v36  ;;  %v2912_v40 = vcombine.low %v379_v35, %v387_v36  ;;  %v3468_v36 = vld [vmem:[%s3728_s22 + $0x210] ss:$8 sps:$4 sm:$0xff]  }
  0x39   : > { %2319 = vmatprep.subr.bf16.mxu0 %v3332_v41  ;;  %v3407_v41 = vld [vmem:[%s3728_s22 + $0x564] ss:$8 sps:$4 sm:$0xff]  }
  0x3b   : > { %2108 = vmatpush1.bf16.msra.mxu1 %v3334_v42  ;;  %v3402_v42 = vld [vmem:[%s3728_s22 + $0x160] ss:$8 sps:$4 sm:$0xff]  }
  0x3c   : > { %2320 = vmatpush1.bf16.msra.mxu0 %v3335_v43  ;;  %2109 = vmatprep.subr.bf16.mxu1 %v3336_v44  ;;  %v3405_v43 = vld [vmem:[%s3728_s22 + $0x560] ss:$8 sps:$4 sm:$0xff]  }
  0x3d   : > { %2321 = vmatprep.subr.bf16.mxu0 %v3338_v45  ;;  %v3837_v44 = vld [vmem:[%s3778_s26 + $0x8] sm:$0xff] }
  0x3e   : > { %v3840_v45 = vld [vmem:[%s3778_s26 + $0x48] sm:$0xff] }
  0x3f   : > { %2110 = vmatpush1.bf16.msra.mxu1 %v3340_v46  ;;  %v3410_v46 = vld [vmem:[%s3728_s22 + $0x174] ss:$8 sps:$4 sm:$0xff]   ;;  %v2891_v48 = vcombine.high %v3837_v44, %v3840_v45 }
  0x40   : > { %2322 = vmatpush1.bf16.msra.mxu0 %v3341_v47  ;;  %2111 = vmatprep.subr.bf16.mxu1 %v3342_v50  ;;  %v3413_v47 = vld [vmem:[%s3728_s22 + $0x574] ss:$8 sps:$4 sm:$0xff]   ;;  %v3850_v50 = vld [vmem:[%s3778_s26 + $0x68] sm:$0xff] }
  0x41   : > { %2323 = vmatprep.subr.bf16.mxu0 %v3344_v51  ;;  %v3408_v51 = vld [vmem:[%s3728_s22 + $0x170] ss:$8 sps:$4 sm:$0xff]   ;;  %v2899_v53 = vcombine.high %v3847_v49, %v3850_v50 }
  0x43   : > { %2112 = vmatpush1.bf16.msra.mxu1 %v3346_v56  ;;  %v3414_v56 = vld [vmem:[%s3728_s22 + $0x180] ss:$8 sps:$4 sm:$0xff]  }
  0x44   : > { %2324 = vmatpush1.bf16.msra.mxu0 %v3347_v57  ;;  %2113 = vmatprep.subr.bf16.mxu1 %v3348_v58  ;;  %v3417_v57 = vld [vmem:[%s3728_s22 + $0x580] ss:$8 sps:$4 sm:$0xff]   ;;  %v3422_v58 = vld [vmem:[%s3728_s22 + $0x194] ss:$8 sps:$4 sm:$0xff]  }
  0x45   : > { %2325 = vmatprep.subr.bf16.mxu0 %v3350_v59  ;;  %v3425_v59 = vld [vmem:[%s3728_s22 + $0x594] ss:$8 sps:$4 sm:$0xff]  }
  0x47   : > { %2114 = vmatpush1.bf16.msra.mxu1 %v3352_v60  ;;  %v3420_v60 = vld [vmem:[%s3728_s22 + $0x190] ss:$8 sps:$4 sm:$0xff]  }
  0x48   : > { %2326 = vmatpush1.bf16.msra.mxu0 %v3353_v61  ;;  %2115 = vmatprep.subr.bf16.mxu1 %v3354_v62  ;;  %v3423_v61 = vld [vmem:[%s3728_s22 + $0x590] ss:$8 sps:$4 sm:$0xff]   ;;  %v3428_v62 = vld [vmem:[%s3728_s22 + $0x1a4] ss:$8 sps:$4 sm:$0xff]  }
  0x49   : > { %2327 = vmatprep.subr.bf16.mxu0 %v3356_v63  ;;  %v3431_v63 = vld [vmem:[%s3728_s22 + $0x5a4] ss:$8 sps:$4 sm:$0xff]  }
  0x4b   : > { %2116 = vmatpush1.bf16.msra.mxu1 %v3358_v0  ;;  %v3426_v0 = vld [vmem:[%s3728_s22 + $0x1a0] ss:$8 sps:$4 sm:$0xff]  }
  0x4c   : > { %2328 = vmatpush1.bf16.msra.mxu0 %v3359_v1  ;;  %2117 = vmatprep.subr.bf16.mxu1 %v3360_v2  ;;  %v3429_v1 = vld [vmem:[%s3728_s22 + $0x5a0] ss:$8 sps:$4 sm:$0xff]   ;;  %v3434_v2 = vld [vmem:[%s3728_s22 + $0x1b4] ss:$8 sps:$4 sm:$0xff]  }
  0x4d   : > { %2329 = vmatprep.subr.bf16.mxu0 %v3362_v3  ;;  %v3437_v3 = vld [vmem:[%s3728_s22 + $0x5b4] ss:$8 sps:$4 sm:$0xff]  }
  0x4f   : > { %2118 = vmatpush1.bf16.msra.mxu1 %v3364_v4  ;;  %v3432_v4 = vld [vmem:[%s3728_s22 + $0x1b0] ss:$8 sps:$4 sm:$0xff]  }
  0x50   : > { %2330 = vmatpush1.bf16.msra.mxu0 %v3365_v5  ;;  %2140 = vmatprep.subr.bf16.mxu1 %v3368_v6  ;;  %v3435_v5 = vld [vmem:[%s3728_s22 + $0x5b0] ss:$8 sps:$4 sm:$0xff]   ;;  %v3440_v6 = vld [vmem:[%s3728_s22 + $0x1c4] ss:$8 sps:$4 sm:$0xff]  }
  0x51   : > { %2352 = vmatprep.subr.bf16.mxu0 %v3371_v7  ;;  %v3443_v7 = vld [vmem:[%s3728_s22 + $0x5c4] ss:$8 sps:$4 sm:$0xff]  }
  0x52   : > { %2120 = vmatmul.mubr.bf16.vlgmr.msra.gmra.mrb[0].mxu1 %v2888_v8  ;;  %v3438_v8 = vld [vmem:[%s3728_s22 + $0x1c0] ss:$8 sps:$4 sm:$0xff]  }
  0x53   : > { %2332 = vmatmul.mubr.bf16.vlgmr.msra.gmra.mrb[0].mxu0 %v2896_v10  ;;  %2141 = vmatpush1.bf16.msra.mxu1 %v3366_v9  ;;  %v3441_v9 = vld [vmem:[%s3728_s22 + $0x5c0] ss:$8 sps:$4 sm:$0xff]   ;;  %v3446_v10 = vld [vmem:[%s3728_s22 + $0x1d4] ss:$8 sps:$4 sm:$0xff]  }
  0x54   : > { %2353 = vmatpush1.bf16.msra.mxu0 %v3369_v11  ;;  %2142 = vmatprep.subr.bf16.mxu1 %v3374_v12  ;;  %v3449_v11 = vld [vmem:[%s3728_s22 + $0x5d4] ss:$8 sps:$4 sm:$0xff]   ;;  %v3444_v12 = vld [vmem:[%s3728_s22 + $0x1d0] ss:$8 sps:$4 sm:$0xff]  }
  0x55   : > { %2354 = vmatprep.subr.bf16.mxu0 %v3377_v13  ;;  %2129 = vmatprep.mubr.bf16.mxu1 %v2905_v33  ;;  %v3447_v13 = vld [vmem:[%s3728_s22 + $0x5d0] ss:$8 sps:$4 sm:$0xff]   ;;  %v388_v33 = vld [vmem:[%s3778_s26 + $0xe8] sm:$0xff] }
  0x56   : > { %2341 = vmatprep.mubr.bf16.mxu0 %v2913_v39  ;;  %v3479_v39 = vld [vmem:[%s3728_s22 + $0x624] ss:$8 sps:$4 sm:$0xff]  }
  0x57   : > { %2143 = vmatpush1.bf16.msra.mxu1 %v3372_v14  ;;  %v3452_v14 = vld [vmem:[%s3728_s22 + $0x1e4] ss:$8 sps:$4 sm:$0xff]  }
  0x58   : > { %2355 = vmatpush1.bf16.msra.mxu0 %v3375_v15  ;;  %2144 = vmatprep.subr.bf16.mxu1 %v3380_v16  ;;  %v3455_v15 = vld [vmem:[%s3728_s22 + $0x5e4] ss:$8 sps:$4 sm:$0xff]   ;;  %v3450_v16 = vld [vmem:[%s3728_s22 + $0x1e0] ss:$8 sps:$4 sm:$0xff]  }
  0x59   : > { %2356 = vmatprep.subr.bf16.mxu0 %v3383_v17  ;;  %v3453_v17 = vld [vmem:[%s3728_s22 + $0x5e0] ss:$8 sps:$4 sm:$0xff]  }
  0x5a   : > { %2130 = vmatmul.mubr.bf16.gmra.mrb[4].mxu1 %v2904_v37  ;;  %v3471_v37 = vld [vmem:[%s3728_s22 + $0x610] ss:$8 sps:$4 sm:$0xff]  }
  0x5b   : > { %2145 = vmatpush1.bf16.msra.mxu1 %v3378_v18  ;;  %2342 = vmatmul.mubr.bf16.gmra.mrb[4].mxu0 %v2912_v40  ;;  %v3458_v18 = vld [vmem:[%s3728_s22 + $0x1f4] ss:$8 sps:$4 sm:$0xff]   ;;  %v3474_v40 = vld [vmem:[%s3728_s22 + $0x220] ss:$8 sps:$4 sm:$0xff]  }
  0x5c   : > { %2357 = vmatpush1.bf16.msra.mxu0 %v3381_v19  ;;  %2146 = vmatprep.subr.bf16.mxu1 %v3386_v20  ;;  %v3461_v19 = vld [vmem:[%s3728_s22 + $0x5f4] ss:$8 sps:$4 sm:$0xff]   ;;  %v3456_v20 = vld [vmem:[%s3728_s22 + $0x1f0] ss:$8 sps:$4 sm:$0xff]  }
  0x5d   : > { %2358 = vmatprep.subr.bf16.mxu0 %v3389_v21  ;;  %2172 = vmatprep.mubr.bf16.mxu1 %v2891_v48  ;;  %v3459_v21 = vld [vmem:[%s3728_s22 + $0x5f0] ss:$8 sps:$4 sm:$0xff]   ;;  %v3482_v48 = vld [vmem:[%s3728_s22 + $0x234] ss:$8 sps:$4 sm:$0xff]  }
  0x5e   : > { %2384 = vmatprep.mubr.bf16.mxu0 %v2899_v53  ;;  %v3483_v53 = vld [vmem:[%s3728_s22 + $0x630] ss:$8 sps:$4 sm:$0xff]  }
  0x5f   : > { %2147 = vmatpush1.bf16.msra.mxu1 %v3384_v22  ;;  %v3464_v22 = vld [vmem:[%s3728_s22 + $0x204] ss:$8 sps:$4 sm:$0xff]  }
  0x60   : > { %2359 = vmatpush1.bf16.msra.mxu0 %v3387_v23  ;;  %2148 = vmatprep.subr.bf16.mxu1 %v3392_v24  ;;  %v3467_v23 = vld [vmem:[%s3728_s22 + $0x604] ss:$8 sps:$4 sm:$0xff]   ;;  %v3462_v24 = vld [vmem:[%s3728_s22 + $0x200] ss:$8 sps:$4 sm:$0xff]  }
  0x61   : > { %2360 = vmatprep.subr.bf16.mxu0 %v3395_v25  ;;  %v3465_v25 = vld [vmem:[%s3728_s22 + $0x600] ss:$8 sps:$4 sm:$0xff]  }
  0x63   : > { %2149 = vmatpush1.bf16.msra.mxu1 %v3390_v26  ;;  %v376_v26 = vld [vmem:[%s3778_s26 + $0x88] sm:$0xff] }
  0x64   : > { %2361 = vmatpush1.bf16.msra.mxu0 %v3393_v27  ;;  %2150 = vmatprep.subr.bf16.mxu1 %v3398_v28  ;;  %v2890_v27 = vcombine.low %v3837_v44, %v3840_v45  ;;  %v2898_v28 = vcombine.low %v3847_v49, %v3850_v50  ;;  %v3912_v45 = vld [vmem:[%s3778_s26 + $0x50] sm:$0xff] }
  0x65   : > { %2362 = vmatprep.subr.bf16.mxu0 %v3401_v29  ;;  %v384_v29 = vld [vmem:[%s3778_s26 + $0xc8] sm:$0xff]  ;;  %v3485_v49 = vld [vmem:[%s3728_s22 + $0x634] ss:$8 sps:$4 sm:$0xff]  }
  0x67   : > { %2151 = vmatpush1.bf16.msra.mxu1 %v3396_v32  ;;  %v380_v32 = vld [vmem:[%s3778_s26 + $0xa8] sm:$0xff] }
  0x68   : > { %2363 = vmatpush1.bf16.msra.mxu0 %v3399_v34  ;;  %2152 = vmatprep.subr.bf16.mxu1 %v3404_v38  ;;  %v2907_v34 = vcombine.high %v376_v26, %v384_v29  ;;  %v2915_v35 = vcombine.high %v380_v32, %v388_v33  ;;  %v3476_v38 = vld [vmem:[%s3728_s22 + $0x224] ss:$8 sps:$4 sm:$0xff]   ;;  %v2914_v44 = vcombine.low %v380_v32, %v388_v33  ;;  %v3546_v32 = vld [vmem:[%s3728_s22 + $0x2e0] ss:$8 sps:$4 sm:$0xff]  }
  0x69   : > { %2364 = vmatprep.subr.bf16.mxu0 %v3407_v41  ;;  %v3477_v41 = vld [vmem:[%s3728_s22 + $0x620] ss:$8 sps:$4 sm:$0xff]  }
  0x6a   : > { %v3549_v33 = vld [vmem:[%s3728_s22 + $0x6e0] ss:$8 sps:$4 sm:$0xff]  }
  0x6b   : > { %2153 = vmatpush1.bf16.msra.mxu1 %v3402_v42  ;;  %v3909_v42 = vld [vmem:[%s3778_s26 + $0x10] sm:$0xff] }
  0x6c   : > { %2365 = vmatpush1.bf16.msra.mxu0 %v3405_v43  ;;  %2154 = vmatprep.subr.bf16.mxu1 %v3410_v46  ;;  %v2906_v43 = vcombine.low %v376_v26, %v384_v29  ;;  %v3915_v46 = vld [vmem:[%s3778_s26 + $0x30] sm:$0xff]  ;;  %v2893_v50 = vcombine.high %v3909_v42, %v3912_v45 }
  0x6d   : > { %2366 = vmatprep.subr.bf16.mxu0 %v3413_v47  ;;  %v3918_v47 = vld [vmem:[%s3778_s26 + $0x70] sm:$0xff] }
  0x6e   : > { %v3542_v26 = vld [vmem:[%s3728_s22 + $0x2d4] ss:$8 sps:$4 sm:$0xff]   ;;  %v3543_v29 = vld [vmem:[%s3728_s22 + $0x6d0] ss:$8 sps:$4 sm:$0xff]  }
  0x6f   : > { %2155 = vmatpush1.bf16.msra.mxu1 %v3408_v51  ;;  %v2901_v51 = vcombine.high %v3915_v46, %v3918_v47 }
  0x70   : > { %2367 = vmatpush1.bf16.msra.mxu0 %v3411_v52  ;;  %2156 = vmatprep.subr.bf16.mxu1 %v3416_v54  ;;  %v3480_v52 = vld [vmem:[%s3728_s22 + $0x230] ss:$8 sps:$4 sm:$0xff]   ;;  %v3488_v54 = vld [vmem:[%s3728_s22 + $0x244] ss:$8 sps:$4 sm:$0xff]  }
  0x71   : > { %2368 = vmatprep.subr.bf16.mxu0 %v3419_v55  ;;  %v3491_v55 = vld [vmem:[%s3728_s22 + $0x644] ss:$8 sps:$4 sm:$0xff]  }
  0x73   : > { %2157 = vmatpush1.bf16.msra.mxu1 %v3414_v56  ;;  %v3486_v56 = vld [vmem:[%s3728_s22 + $0x240] ss:$8 sps:$4 sm:$0xff]  }
  0x74   : > { %2369 = vmatpush1.bf16.msra.mxu0 %v3417_v57  ;;  %2158 = vmatprep.subr.bf16.mxu1 %v3422_v58  ;;  %v3489_v57 = vld [vmem:[%s3728_s22 + $0x640] ss:$8 sps:$4 sm:$0xff]   ;;  %v3494_v58 = vld [vmem:[%s3728_s22 + $0x254] ss:$8 sps:$4 sm:$0xff]  }
  0x75   : > { %2370 = vmatprep.subr.bf16.mxu0 %v3425_v59  ;;  %v3497_v59 = vld [vmem:[%s3728_s22 + $0x654] ss:$8 sps:$4 sm:$0xff]  }
  0x77   : > { %2159 = vmatpush1.bf16.msra.mxu1 %v3420_v60  ;;  %v3492_v60 = vld [vmem:[%s3728_s22 + $0x250] ss:$8 sps:$4 sm:$0xff]  }
  0x78   : > { %2371 = vmatpush1.bf16.msra.mxu0 %v3423_v61  ;;  %2160 = vmatprep.subr.bf16.mxu1 %v3428_v62  ;;  %v3495_v61 = vld [vmem:[%s3728_s22 + $0x650] ss:$8 sps:$4 sm:$0xff]   ;;  %v3500_v62 = vld [vmem:[%s3728_s22 + $0x264] ss:$8 sps:$4 sm:$0xff]  }
  0x79   : > { %2372 = vmatprep.subr.bf16.mxu0 %v3431_v63  ;;  %v3503_v63 = vld [vmem:[%s3728_s22 + $0x664] ss:$8 sps:$4 sm:$0xff]  }
  0x7b   : > { %2161 = vmatpush1.bf16.msra.mxu1 %v3426_v0  ;;  %v3498_v0 = vld [vmem:[%s3728_s22 + $0x260] ss:$8 sps:$4 sm:$0xff]  }
  0x7c   : > { %2373 = vmatpush1.bf16.msra.mxu0 %v3429_v1  ;;  %2162 = vmatprep.subr.bf16.mxu1 %v3434_v2  ;;  %v3501_v1 = vld [vmem:[%s3728_s22 + $0x660] ss:$8 sps:$4 sm:$0xff]   ;;  %v3506_v2 = vld [vmem:[%s3728_s22 + $0x274] ss:$8 sps:$4 sm:$0xff]  }
  0x7d   : > { %2374 = vmatprep.subr.bf16.mxu0 %v3437_v3  ;;  %v3509_v3 = vld [vmem:[%s3728_s22 + $0x674] ss:$8 sps:$4 sm:$0xff]  }
  0x7f   : > { %2163 = vmatpush1.bf16.msra.mxu1 %v3432_v4  ;;  %v3504_v4 = vld [vmem:[%s3728_s22 + $0x270] ss:$8 sps:$4 sm:$0xff]  }
  0x80   : > { %2375 = vmatpush1.bf16.msra.mxu0 %v3435_v5  ;;  %2164 = vmatprep.subr.bf16.mxu1 %v3440_v6  ;;  %v3507_v5 = vld [vmem:[%s3728_s22 + $0x670] ss:$8 sps:$4 sm:$0xff]   ;;  %v3512_v6 = vld [vmem:[%s3728_s22 + $0x284] ss:$8 sps:$4 sm:$0xff]  }
  0x81   : > { %2376 = vmatprep.subr.bf16.mxu0 %v3443_v7  ;;  %v3515_v7 = vld [vmem:[%s3728_s22 + $0x684] ss:$8 sps:$4 sm:$0xff]  }
  0x83   : > { %2165 = vmatpush1.bf16.msra.mxu1 %v3438_v8  ;;  %v3510_v8 = vld [vmem:[%s3728_s22 + $0x280] ss:$8 sps:$4 sm:$0xff]  }
  0x84   : > { %2377 = vmatpush1.bf16.msra.mxu0 %v3441_v9  ;;  %2166 = vmatprep.subr.bf16.mxu1 %v3446_v10  ;;  %v3513_v9 = vld [vmem:[%s3728_s22 + $0x680] ss:$8 sps:$4 sm:$0xff]   ;;  %v3518_v10 = vld [vmem:[%s3728_s22 + $0x294] ss:$8 sps:$4 sm:$0xff]  }
  0x85   : > { %2378 = vmatprep.subr.bf16.mxu0 %v3449_v11  ;;  %v3521_v11 = vld [vmem:[%s3728_s22 + $0x694] ss:$8 sps:$4 sm:$0xff]  }
  0x87   : > { %2167 = vmatpush1.bf16.msra.mxu1 %v3444_v12  ;;  %v3516_v12 = vld [vmem:[%s3728_s22 + $0x290] ss:$8 sps:$4 sm:$0xff]  }
  0x88   : > { %2379 = vmatpush1.bf16.msra.mxu0 %v3447_v13  ;;  %2168 = vmatprep.subr.bf16.mxu1 %v3452_v14  ;;  %v3519_v13 = vld [vmem:[%s3728_s22 + $0x690] ss:$8 sps:$4 sm:$0xff]   ;;  %v3524_v14 = vld [vmem:[%s3728_s22 + $0x2a4] ss:$8 sps:$4 sm:$0xff]  }
  0x89   : > { %2380 = vmatprep.subr.bf16.mxu0 %v3455_v15  ;;  %v3527_v15 = vld [vmem:[%s3728_s22 + $0x6a4] ss:$8 sps:$4 sm:$0xff]  }
  0x8b   : > { %2169 = vmatpush1.bf16.msra.mxu1 %v3450_v16  ;;  %v3522_v16 = vld [vmem:[%s3728_s22 + $0x2a0] ss:$8 sps:$4 sm:$0xff]  }
  0x8c   : > { %2381 = vmatpush1.bf16.msra.mxu0 %v3453_v17  ;;  %2170 = vmatprep.subr.bf16.mxu1 %v3458_v18  ;;  %v3525_v17 = vld [vmem:[%s3728_s22 + $0x6a0] ss:$8 sps:$4 sm:$0xff]   ;;  %v3530_v18 = vld [vmem:[%s3728_s22 + $0x2b4] ss:$8 sps:$4 sm:$0xff]  }
  0x8d   : > { %2382 = vmatprep.subr.bf16.mxu0 %v3461_v19  ;;  %v3533_v19 = vld [vmem:[%s3728_s22 + $0x6b4] ss:$8 sps:$4 sm:$0xff]  }
  0x8f   : > { %2171 = vmatpush1.bf16.msra.mxu1 %v3456_v20  ;;  %v3528_v20 = vld [vmem:[%s3728_s22 + $0x2b0] ss:$8 sps:$4 sm:$0xff]  }
  0x90   : > { %2383 = vmatpush1.bf16.msra.mxu0 %v3459_v21  ;;  %2193 = vmatprep.subr.bf16.mxu1 %v3464_v22  ;;  %v3531_v21 = vld [vmem:[%s3728_s22 + $0x6b0] ss:$8 sps:$4 sm:$0xff]   ;;  %v3536_v22 = vld [vmem:[%s3728_s22 + $0x2c4] ss:$8 sps:$4 sm:$0xff]  }
  0x91   : > { %2405 = vmatprep.subr.bf16.mxu0 %v3467_v23  ;;  %v3539_v23 = vld [vmem:[%s3728_s22 + $0x6c4] ss:$8 sps:$4 sm:$0xff]  }
  0x92   : > { %2173 = vmatmul.mubr.bf16.vlgmr.msra.gmra.mrb[0].mxu1 %v2890_v27  ;;  %v3545_v27 = vld [vmem:[%s3728_s22 + $0x6d4] ss:$8 sps:$4 sm:$0xff]  }
  0x93   : > { %2385 = vmatmul.mubr.bf16.vlgmr.msra.gmra.mrb[0].mxu0 %v2898_v28  ;;  %2194 = vmatpush1.bf16.msra.mxu1 %v3462_v24  ;;  %v3534_v24 = vld [vmem:[%s3728_s22 + $0x2c0] ss:$8 sps:$4 sm:$0xff]   ;;  %v3540_v28 = vld [vmem:[%s3728_s22 + $0x2d0] ss:$8 sps:$4 sm:$0xff]  }
  0x94   : > { %2406 = vmatpush1.bf16.msra.mxu0 %v3465_v25  ;;  %2195 = vmatprep.subr.bf16.mxu1 %v3470_v30  ;;  %v3537_v25 = vld [vmem:[%s3728_s22 + $0x6c0] ss:$8 sps:$4 sm:$0xff]   ;;  %v3548_v30 = vld [vmem:[%s3728_s22 + $0x2e4] ss:$8 sps:$4 sm:$0xff]  }
  0x95   : > { %2407 = vmatprep.subr.bf16.mxu0 %v3473_v31  ;;  %2182 = vmatprep.mubr.bf16.mxu1 %v2907_v34  ;;  %v3551_v31 = vld [vmem:[%s3728_s22 + $0x6e4] ss:$8 sps:$4 sm:$0xff]   ;;  %v3554_v34 = vld [vmem:[%s3728_s22 + $0x2f4] ss:$8 sps:$4 sm:$0xff]  }
  0x96   : > { %2394 = vmatprep.mubr.bf16.mxu0 %v2915_v35  ;;  %v3557_v35 = vld [vmem:[%s3728_s22 + $0x6f4] ss:$8 sps:$4 sm:$0xff]  }
  0x97   : > { %2196 = vmatpush1.bf16.msra.mxu1 %v3468_v36  ;;  %v3552_v36 = vld [vmem:[%s3728_s22 + $0x2f0] ss:$8 sps:$4 sm:$0xff]  }
  0x98   : > { %2408 = vmatpush1.bf16.msra.mxu0 %v3471_v37  ;;  %2197 = vmatprep.subr.bf16.mxu1 %v3476_v38  ;;  %v3555_v37 = vld [vmem:[%s3728_s22 + $0x6f0] ss:$8 sps:$4 sm:$0xff]   ;;  %v3560_v38 = vld [vmem:[%s3728_s22 + $0x304] ss:$8 sps:$4 sm:$0xff]  }
  0x99   : > { %2409 = vmatprep.subr.bf16.mxu0 %v3479_v39  ;;  %v3563_v39 = vld [vmem:[%s3728_s22 + $0x704] ss:$8 sps:$4 sm:$0xff]  }
  0x9a   : > { %2183 = vmatmul.mubr.bf16.gmra.mrb[4].mxu1 %v2906_v43  ;;  %v2900_v43 = vcombine.low %v3915_v46, %v3918_v47  ;;  %v3564_v46 = vld [vmem:[%s3728_s22 + $0x310] ss:$8 sps:$4 sm:$0xff]  }
  0x9b   : > { %2395 = vmatmul.mubr.bf16.gmra.mrb[4].mxu0 %v2914_v44  ;;  %2198 = vmatpush1.bf16.msra.mxu1 %v3474_v40  ;;  %v377_v40 = vld [vmem:[%s3778_s26 + $0x90] sm:$0xff] }
  0x9c   : > { %2410 = vmatpush1.bf16.msra.mxu0 %v3477_v41  ;;  %2199 = vmatprep.subr.bf16.mxu1 %v3482_v48  ;;  %v2892_v41 = vcombine.low %v3909_v42, %v3912_v45  ;;  %v385_v44 = vld [vmem:[%s3778_s26 + $0xd0] sm:$0xff] }
  0x9d   : > { %2411 = vmatprep.subr.bf16.mxu0 %v3485_v49  ;;  %2225 = vmatprep.mubr.bf16.mxu1 %v2893_v50  ;;  %v381_v48 = vld [vmem:[%s3778_s26 + $0xb0] sm:$0xff]  ;;  %v3558_v50 = vld [vmem:[%s3728_s22 + $0x300] ss:$8 sps:$4 sm:$0xff]   ;;  %v2909_v42 = vcombine.high %v377_v40, %v385_v44 }
  0x9e   : > { %2437 = vmatprep.mubr.bf16.mxu0 %v2901_v51  ;;  %v389_v49 = vld [vmem:[%s3778_s26 + $0xf0] sm:$0xff]  ;;  %v3561_v51 = vld [vmem:[%s3728_s22 + $0x700] ss:$8 sps:$4 sm:$0xff]  }
  0x9f   : > { %2200 = vmatpush1.bf16.msra.mxu1 %v3480_v52  ;;  %v3566_v52 = vld [vmem:[%s3728_s22 + $0x314] ss:$8 sps:$4 sm:$0xff]   ;;  %v2917_v45 = vcombine.high %v381_v48, %v389_v49  ;;  %v3567_v47 = vld [vmem:[%s3728_s22 + $0x710] ss:$8 sps:$4 sm:$0xff]  }
  0xa0   : > { %2412 = vmatpush1.bf16.msra.mxu0 %v3483_v53  ;;  %2201 = vmatprep.subr.bf16.mxu1 %v3488_v54  ;;  %v3569_v53 = vld [vmem:[%s3728_s22 + $0x714] ss:$8 sps:$4 sm:$0xff]   ;;  %v3572_v54 = vld [vmem:[%s3728_s22 + $0x324] ss:$8 sps:$4 sm:$0xff]  }
  0xa1   : > { %2413 = vmatprep.subr.bf16.mxu0 %v3491_v55  ;;  %v3575_v55 = vld [vmem:[%s3728_s22 + $0x724] ss:$8 sps:$4 sm:$0xff]  }
  0xa3   : > { %2202 = vmatpush1.bf16.msra.mxu1 %v3486_v56  ;;  %v3995_v56 = vld [vmem:[%s3778_s26 + $0x18] sm:$0xff] }
  0xa4   : > { %2414 = vmatpush1.bf16.msra.mxu0 %v3489_v57  ;;  %2203 = vmatprep.subr.bf16.mxu1 %v3494_v58  ;;  %v2908_v57 = vcombine.low %v377_v40, %v385_v44  ;;  %v2916_v58 = vcombine.low %v381_v48, %v389_v49  ;;  %v3630_v40 = vld [vmem:[%s3728_s22 + $0x3c0] ss:$8 sps:$4 sm:$0xff]   ;;  %v3641_v44 = vld [vmem:[%s3728_s22 + $0x7d4] ss:$8 sps:$4 sm:$0xff]   ;;  %v3636_v48 = vld [vmem:[%s3728_s22 + $0x3d0] ss:$8 sps:$4 sm:$0xff]  }
  0xa5   : > { %2415 = vmatprep.subr.bf16.mxu0 %v3497_v59  ;;  %v3998_v59 = vld [vmem:[%s3778_s26 + $0x58] sm:$0xff] }
  0xa6   : > { %v3639_v49 = vld [vmem:[%s3728_s22 + $0x7d0] ss:$8 sps:$4 sm:$0xff]  }
  0xa7   : > { %2204 = vmatpush1.bf16.msra.mxu1 %v3492_v60  ;;  %v4001_v60 = vld [vmem:[%s3778_s26 + $0x38] sm:$0xff] }
  0xa8   : > { %2416 = vmatpush1.bf16.msra.mxu0 %v3495_v61  ;;  %2205 = vmatprep.subr.bf16.mxu1 %v3500_v62  ;;  %v4004_v61 = vld [vmem:[%s3778_s26 + $0x78] sm:$0xff]  ;;  %v3570_v62 = vld [vmem:[%s3728_s22 + $0x320] ss:$8 sps:$4 sm:$0xff]  }
  0xa9   : > { %2417 = vmatprep.subr.bf16.mxu0 %v3503_v63  ;;  %v3573_v63 = vld [vmem:[%s3728_s22 + $0x720] ss:$8 sps:$4 sm:$0xff]  }
  0xab   : > { %2206 = vmatpush1.bf16.msra.mxu1 %v3498_v0  ;;  %v3578_v0 = vld [vmem:[%s3728_s22 + $0x334] ss:$8 sps:$4 sm:$0xff]  }
  0xac   : > { %2418 = vmatpush1.bf16.msra.mxu0 %v3501_v1  ;;  %2207 = vmatprep.subr.bf16.mxu1 %v3506_v2  ;;  %v3581_v1 = vld [vmem:[%s3728_s22 + $0x734] ss:$8 sps:$4 sm:$0xff]   ;;  %v2895_v2 = vcombine.high %v3995_v56, %v3998_v59 }
  0xad   : > { %2419 = vmatprep.subr.bf16.mxu0 %v3509_v3  ;;  %v2903_v3 = vcombine.high %v4001_v60, %v4004_v61 }
  0xaf   : > { %2208 = vmatpush1.bf16.msra.mxu1 %v3504_v4  ;;  %v3576_v4 = vld [vmem:[%s3728_s22 + $0x330] ss:$8 sps:$4 sm:$0xff]  }
  0xb0   : > { %2420 = vmatpush1.bf16.msra.mxu0 %v3507_v5  ;;  %2209 = vmatprep.subr.bf16.mxu1 %v3512_v6  ;;  %v3579_v5 = vld [vmem:[%s3728_s22 + $0x730] ss:$8 sps:$4 sm:$0xff]   ;;  %v3584_v6 = vld [vmem:[%s3728_s22 + $0x344] ss:$8 sps:$4 sm:$0xff]  }
  0xb1   : > { %2421 = vmatprep.subr.bf16.mxu0 %v3515_v7  ;;  %v3587_v7 = vld [vmem:[%s3728_s22 + $0x744] ss:$8 sps:$4 sm:$0xff]  }
  0xb3   : > { %2210 = vmatpush1.bf16.msra.mxu1 %v3510_v8  ;;  %v3582_v8 = vld [vmem:[%s3728_s22 + $0x340] ss:$8 sps:$4 sm:$0xff]  }
  0xb4   : > { %2422 = vmatpush1.bf16.msra.mxu0 %v3513_v9  ;;  %2211 = vmatprep.subr.bf16.mxu1 %v3518_v10  ;;  %v3585_v9 = vld [vmem:[%s3728_s22 + $0x740] ss:$8 sps:$4 sm:$0xff]   ;;  %v3590_v10 = vld [vmem:[%s3728_s22 + $0x354] ss:$8 sps:$4 sm:$0xff]  }
  0xb5   : > { %2423 = vmatprep.subr.bf16.mxu0 %v3521_v11  ;;  %v3593_v11 = vld [vmem:[%s3728_s22 + $0x754] ss:$8 sps:$4 sm:$0xff]  }
  0xb7   : > { %2212 = vmatpush1.bf16.msra.mxu1 %v3516_v12  ;;  %v3588_v12 = vld [vmem:[%s3728_s22 + $0x350] ss:$8 sps:$4 sm:$0xff]  }
  0xb8   : > { %2424 = vmatpush1.bf16.msra.mxu0 %v3519_v13  ;;  %2213 = vmatprep.subr.bf16.mxu1 %v3524_v14  ;;  %v3591_v13 = vld [vmem:[%s3728_s22 + $0x750] ss:$8 sps:$4 sm:$0xff]   ;;  %v3596_v14 = vld [vmem:[%s3728_s22 + $0x364] ss:$8 sps:$4 sm:$0xff]  }
  0xb9   : > { %2425 = vmatprep.subr.bf16.mxu0 %v3527_v15  ;;  %v3599_v15 = vld [vmem:[%s3728_s22 + $0x764] ss:$8 sps:$4 sm:$0xff]  }
  0xbb   : > { %2214 = vmatpush1.bf16.msra.mxu1 %v3522_v16  ;;  %v3594_v16 = vld [vmem:[%s3728_s22 + $0x360] ss:$8 sps:$4 sm:$0xff]  }
  0xbc   : > { %2426 = vmatpush1.bf16.msra.mxu0 %v3525_v17  ;;  %2215 = vmatprep.subr.bf16.mxu1 %v3530_v18  ;;  %v3597_v17 = vld [vmem:[%s3728_s22 + $0x760] ss:$8 sps:$4 sm:$0xff]   ;;  %v3602_v18 = vld [vmem:[%s3728_s22 + $0x374] ss:$8 sps:$4 sm:$0xff]  }
  0xbd   : > { %2427 = vmatprep.subr.bf16.mxu0 %v3533_v19  ;;  %v3605_v19 = vld [vmem:[%s3728_s22 + $0x774] ss:$8 sps:$4 sm:$0xff]  }
  0xbf   : > { %2216 = vmatpush1.bf16.msra.mxu1 %v3528_v20  ;;  %v3600_v20 = vld [vmem:[%s3728_s22 + $0x370] ss:$8 sps:$4 sm:$0xff]  }
  0xc0   : > { %2428 = vmatpush1.bf16.msra.mxu0 %v3531_v21  ;;  %2217 = vmatprep.subr.bf16.mxu1 %v3536_v22  ;;  %v3603_v21 = vld [vmem:[%s3728_s22 + $0x770] ss:$8 sps:$4 sm:$0xff]   ;;  %v3608_v22 = vld [vmem:[%s3728_s22 + $0x384] ss:$8 sps:$4 sm:$0xff]  }
  0xc1   : > { %2429 = vmatprep.subr.bf16.mxu0 %v3539_v23  ;;  %v3611_v23 = vld [vmem:[%s3728_s22 + $0x784] ss:$8 sps:$4 sm:$0xff]  }
  0xc3   : > { %2218 = vmatpush1.bf16.msra.mxu1 %v3534_v24  ;;  %v3606_v24 = vld [vmem:[%s3728_s22 + $0x380] ss:$8 sps:$4 sm:$0xff]  }
  0xc4   : > { %2430 = vmatpush1.bf16.msra.mxu0 %v3537_v25  ;;  %2219 = vmatprep.subr.bf16.mxu1 %v3542_v26  ;;  %v3609_v25 = vld [vmem:[%s3728_s22 + $0x780] ss:$8 sps:$4 sm:$0xff]   ;;  %v3614_v26 = vld [vmem:[%s3728_s22 + $0x394] ss:$8 sps:$4 sm:$0xff]  }
  0xc5   : > { %2431 = vmatprep.subr.bf16.mxu0 %v3545_v27  ;;  %v3617_v27 = vld [vmem:[%s3728_s22 + $0x794] ss:$8 sps:$4 sm:$0xff]  }
  0xc7   : > { %2220 = vmatpush1.bf16.msra.mxu1 %v3540_v28  ;;  %v3612_v28 = vld [vmem:[%s3728_s22 + $0x390] ss:$8 sps:$4 sm:$0xff]  }
  0xc8   : > { %2432 = vmatpush1.bf16.msra.mxu0 %v3543_v29  ;;  %2221 = vmatprep.subr.bf16.mxu1 %v3548_v30  ;;  %v3615_v29 = vld [vmem:[%s3728_s22 + $0x790] ss:$8 sps:$4 sm:$0xff]   ;;  %v3620_v30 = vld [vmem:[%s3728_s22 + $0x3a4] ss:$8 sps:$4 sm:$0xff]  }
  0xc9   : > { %2433 = vmatprep.subr.bf16.mxu0 %v3551_v31  ;;  %v3623_v31 = vld [vmem:[%s3728_s22 + $0x7a4] ss:$8 sps:$4 sm:$0xff]  }
  0xcb   : > { %2222 = vmatpush1.bf16.msra.mxu1 %v3546_v32  ;;  %v3618_v32 = vld [vmem:[%s3728_s22 + $0x3a0] ss:$8 sps:$4 sm:$0xff]  }
  0xcc   : > { %2434 = vmatpush1.bf16.msra.mxu0 %v3549_v33  ;;  %2223 = vmatprep.subr.bf16.mxu1 %v3554_v34  ;;  %v3621_v33 = vld [vmem:[%s3728_s22 + $0x7a0] ss:$8 sps:$4 sm:$0xff]   ;;  %v3626_v34 = vld [vmem:[%s3728_s22 + $0x3b4] ss:$8 sps:$4 sm:$0xff]  }
  0xcd   : > { %2435 = vmatprep.subr.bf16.mxu0 %v3557_v35  ;;  %v3629_v35 = vld [vmem:[%s3728_s22 + $0x7b4] ss:$8 sps:$4 sm:$0xff]  }
  0xcf   : > { %2224 = vmatpush1.bf16.msra.mxu1 %v3552_v36  ;;  %v3624_v36 = vld [vmem:[%s3728_s22 + $0x3b0] ss:$8 sps:$4 sm:$0xff]  }
  0xd0   : > { %2436 = vmatpush1.bf16.msra.mxu0 %v3555_v37  ;;  %2246 = vmatprep.subr.bf16.mxu1 %v3560_v38  ;;  %v3627_v37 = vld [vmem:[%s3728_s22 + $0x7b0] ss:$8 sps:$4 sm:$0xff]   ;;  %v3632_v38 = vld [vmem:[%s3728_s22 + $0x3c4] ss:$8 sps:$4 sm:$0xff]  }
  0xd1   : > { %2458 = vmatprep.subr.bf16.mxu0 %v3563_v39  ;;  %v3635_v39 = vld [vmem:[%s3728_s22 + $0x7c4] ss:$8 sps:$4 sm:$0xff]  }
  0xd2   : > { %2226 = vmatmul.mubr.bf16.vlgmr.msra.gmra.mrb[0].mxu1 %v2892_v41  ;;  %v3633_v41 = vld [vmem:[%s3728_s22 + $0x7c0] ss:$8 sps:$4 sm:$0xff]  }
  0xd3   : > { %2438 = vmatmul.mubr.bf16.vlgmr.msra.gmra.mrb[0].mxu0 %v2900_v43  ;;  %2247 = vmatpush1.bf16.msra.mxu1 %v3558_v50  ;;  %v3638_v43 = vld [vmem:[%s3728_s22 + $0x3d4] ss:$8 sps:$4 sm:$0xff]   ;;  %v3644_v50 = vld [vmem:[%s3728_s22 + $0x3e4] ss:$8 sps:$4 sm:$0xff]  }
  0xd4   : > { %2459 = vmatpush1.bf16.msra.mxu0 %v3561_v51  ;;  %2248 = vmatprep.subr.bf16.mxu1 %v3566_v52  ;;  %v3647_v51 = vld [vmem:[%s3728_s22 + $0x7e4] ss:$8 sps:$4 sm:$0xff]   ;;  %v3642_v52 = vld [vmem:[%s3728_s22 + $0x3e0] ss:$8 sps:$4 sm:$0xff]  }
  0xd5   : > { %2460 = vmatprep.subr.bf16.mxu0 %v3569_v53  ;;  %2235 = vmatprep.mubr.bf16.mxu1 %v2909_v42  ;;  %v3645_v53 = vld [vmem:[%s3728_s22 + $0x7e0] ss:$8 sps:$4 sm:$0xff]   ;;  %v3650_v42 = vld [vmem:[%s3728_s22 + $0x3f4] ss:$8 sps:$4 sm:$0xff]  }
  0xd6   : > { %2447 = vmatprep.mubr.bf16.mxu0 %v2917_v45  ;;  %v3653_v45 = vld [vmem:[%s3728_s22 + $0x7f4] ss:$8 sps:$4 sm:$0xff]  }
  0xd7   : > { %2249 = vmatpush1.bf16.msra.mxu1 %v3564_v46  ;;  %v3648_v46 = vld [vmem:[%s3728_s22 + $0x3f0] ss:$8 sps:$4 sm:$0xff]  }
  0xd8   : > { %2461 = vmatpush1.bf16.msra.mxu0 %v3567_v47  ;;  %2250 = vmatprep.subr.bf16.mxu1 %v3572_v54  ;;  %v3651_v47 = vld [vmem:[%s3728_s22 + $0x7f0] ss:$8 sps:$4 sm:$0xff]  }
  0xd9   : > { %2462 = vmatprep.subr.bf16.mxu0 %v3575_v55  ;;  %v378_v54 = vld [vmem:[%s3778_s26 + $0x98] sm:$0xff] }
  0xda   : > { %2236 = vmatmul.mubr.bf16.gmra.mrb[4].mxu1 %v2908_v57  ;;  %v386_v55 = vld [vmem:[%s3778_s26 + $0xd8] sm:$0xff] }
  0xdb   : > { %2448 = vmatmul.mubr.bf16.gmra.mrb[4].mxu0 %v2916_v58  ;;  %2251 = vmatpush1.bf16.msra.mxu1 %v3570_v62  ;;  %v382_v57 = vld [vmem:[%s3778_s26 + $0xb8] sm:$0xff]  ;;  %v2894_v62 = vcombine.low %v3995_v56, %v3998_v59 }
  0xdc   : > { %2463 = vmatpush1.bf16.msra.mxu0 %v3573_v63  ;;  %2252 = vmatprep.subr.bf16.mxu1 %v3578_v0  ;;  %v390_v58 = vld [vmem:[%s3778_s26 + $0xf8] sm:$0xff]  ;;  %v2902_v63 = vcombine.low %v4001_v60, %v4004_v61  ;;  %v2911_v0 = vcombine.high %v378_v54, %v386_v55 }
  0xdd   : > { %2464 = vmatprep.subr.bf16.mxu0 %v3581_v1  ;;  %2278 = vmatprep.mubr.bf16.mxu1 %v2895_v2  ;;  %v2919_v1 = vcombine.high %v382_v57, %v390_v58  ;;  %v2910_v2 = vcombine.low %v378_v54, %v386_v55  ;;  %v2535_v55 = vlaneseq }
  0xde   : > { %2490 = vmatprep.mubr.bf16.mxu0 %v2903_v3  ;;  %v2918_v3 = vcombine.low %v382_v57, %v390_v58 }
  0xdf   : > { %2253 = vmatpush1.bf16.msra.mxu1 %v3576_v4  ;;  %vm2549_vm0 = vcmp.lt.s32.totalorder %v2535_v55, 256 }
  0xe0   : > { %2465 = vmatpush1.bf16.msra.mxu0 %v3579_v5  ;;  %2254 = vmatprep.subr.bf16.mxu1 %v3584_v6 }
  0xe1   : > { %2466 = vmatprep.subr.bf16.mxu0 %v3587_v7 }
  0xe3   : > { %2255 = vmatpush1.bf16.msra.mxu1 %v3582_v8 }
  0xe4   : > { %2467 = vmatpush1.bf16.msra.mxu0 %v3585_v9  ;;  %2256 = vmatprep.subr.bf16.mxu1 %v3590_v10 }
  0xe5   : > { %2468 = vmatprep.subr.bf16.mxu0 %v3593_v11 }
  0xe7   : > { %2257 = vmatpush1.bf16.msra.mxu1 %v3588_v12 }
  0xe8   : > { %2469 = vmatpush1.bf16.msra.mxu0 %v3591_v13  ;;  %2258 = vmatprep.subr.bf16.mxu1 %v3596_v14 }
  0xe9   : > { %2470 = vmatprep.subr.bf16.mxu0 %v3599_v15 }
  0xeb   : > { %2259 = vmatpush1.bf16.msra.mxu1 %v3594_v16 }
  0xec   : > { %2471 = vmatpush1.bf16.msra.mxu0 %v3597_v17  ;;  %2260 = vmatprep.subr.bf16.mxu1 %v3602_v18 }
  0xed   : > { %2472 = vmatprep.subr.bf16.mxu0 %v3605_v19 }
  0xef   : > { %2261 = vmatpush1.bf16.msra.mxu1 %v3600_v20 }
  0xf0   : > { %2473 = vmatpush1.bf16.msra.mxu0 %v3603_v21  ;;  %2262 = vmatprep.subr.bf16.mxu1 %v3608_v22 }
  0xf1   : > { %2474 = vmatprep.subr.bf16.mxu0 %v3611_v23 }
  0xf3   : > { %2263 = vmatpush1.bf16.msra.mxu1 %v3606_v24 }
  0xf4   : > { %2475 = vmatpush1.bf16.msra.mxu0 %v3609_v25  ;;  %2264 = vmatprep.subr.bf16.mxu1 %v3614_v26 }
  0xf5   : > { %2476 = vmatprep.subr.bf16.mxu0 %v3617_v27 }
  0xf7   : > { %2265 = vmatpush1.bf16.msra.mxu1 %v3612_v28 }
  0xf8   : > { %2477 = vmatpush1.bf16.msra.mxu0 %v3615_v29  ;;  %2266 = vmatprep.subr.bf16.mxu1 %v3620_v30 }
  0xf9   : > { %2478 = vmatprep.subr.bf16.mxu0 %v3623_v31 }
  0xfb   : > { %2267 = vmatpush1.bf16.msra.mxu1 %v3618_v32 }
  0xfc   : > { %2479 = vmatpush1.bf16.msra.mxu0 %v3621_v33  ;;  %2268 = vmatprep.subr.bf16.mxu1 %v3626_v34 }
  0xfd   : > { %2480 = vmatprep.subr.bf16.mxu0 %v3629_v35 }
  0xff   : > { %2269 = vmatpush1.bf16.msra.mxu1 %v3624_v36 }
 0x100   : > { %2481 = vmatpush1.bf16.msra.mxu0 %v3627_v37  ;;  %2270 = vmatprep.subr.bf16.mxu1 %v3632_v38 }
 0x101   : > { %2482 = vmatprep.subr.bf16.mxu0 %v3635_v39 }
 0x103   : > { %2271 = vmatpush1.bf16.msra.mxu1 %v3630_v40 }
 0x104   : > { %2483 = vmatpush1.bf16.msra.mxu0 %v3633_v41  ;;  %2272 = vmatprep.subr.bf16.mxu1 %v3638_v43 }
 0x105   : > { %2484 = vmatprep.subr.bf16.mxu0 %v3641_v44 }
 0x107   : > { %2273 = vmatpush1.bf16.msra.mxu1 %v3636_v48 }
 0x108   : > { %2485 = vmatpush1.bf16.msra.mxu0 %v3639_v49  ;;  %2274 = vmatprep.subr.bf16.mxu1 %v3644_v50 }
 0x109   : > { %2486 = vmatprep.subr.bf16.mxu0 %v3647_v51 }
 0x10b   : > { %2275 = vmatpush1.bf16.msra.mxu1 %v3642_v52 }
 0x10c   : > { %2487 = vmatpush1.bf16.msra.mxu0 %v3645_v53  ;;  %2276 = vmatprep.subr.bf16.mxu1 %v3650_v42 }
 0x10d   : > { %2488 = vmatprep.subr.bf16.mxu0 %v3653_v45 }
 0x10f   : > { %2277 = vmatpush1.bf16.msra.mxu1 %v3648_v46 }
 0x110   : > { %2489 = vmatpush1.bf16.msra.mxu0 %v3651_v47  ;;  %v3678_v47 = vmov 1966171168  }
 0x111   : > { %v2533_v54 = vunpack.c.l.s4 %v3678_v47 }
 0x112   : > { %2279 = vmatmul.mubr.bf16.vlgmr.msra.gmra.mrb[0].mxu1 %v2894_v62 }
 0x113   : > { %2491 = vmatmul.mubr.bf16.vlgmr.msra.gmra.mrb[0].mxu0 %v2902_v63  ;;  %2288 = vmatprep.mubr.bf16.mxu1 %v2911_v0 }
 0x114   : > { %2500 = vmatprep.mubr.bf16.mxu0 %v2919_v1 }
 0x11a   : > { %2289 = vmatmul.mubr.bf16.gmra.mrb[4].mxu1 %v2910_v2 }
 0x11b   : > { %2501 = vmatmul.mubr.bf16.gmra.mrb[4].mxu0 %v2918_v3 }
 0x1e5   : > { %v2280_v4 = vpop.f32.mrb[0].mxu1 }
 0x1e6   : > { %v2492_v5 = vpop.f32.mrb[0].mxu0  ;;  %v2282_v59 = vpop.f32.mrb[1].mxu1 }
 0x1e7   : > { %v3189_v56 = vadd.f32 %v2492_v5, %v2280_v4  ;;  %v2494_v6 = vpop.f32.mrb[1].mxu0  ;;  %v2284_v60 = vpop.f32.mrb[2].mxu1  ;;  %v2534_v4 = vunpack.c.0.s8 %v2533_v54  ;;  %v2536_v5 = vshrl.u32 %v2535_v55, 7 }
 0x1e8   : > { %v3190_v7 = vadd.f32 %v2494_v6, %v2282_v59  ;;  %v2496_v61 = vpop.f32.mrb[2].mxu0  ;;  %v2286_v9 = vpop.f32.mrb[3].mxu1 }
 0x1e9   : > { %v3191_v8 = vadd.f32 %v2496_v61, %v2284_v60  ;;  %v2498_v10 = vpop.f32.mrb[3].mxu0  ;;  %v2552_v13 = vmul.f32 %v3189_v56, %v3189_v56 }
 0x1ea   : > { %v3185_v11 = vpack.c.bf16 %v3190_v7, %v3189_v56  ;;  %v3192_v12 = vadd.f32 %v2498_v10, %v2286_v9  ;;  %v2553_v16 = vmul.f32 %v3190_v7, %v3190_v7  ;;  %v2537_v10 = vsub.s32 %v2534_v4, %v2536_v5 }
 0x1eb   : > { %v2511_v14 = vadd.f32 %v3191_v8, %v3189_v56  ;;  %v2554_v15 = vmul.f32 %v3191_v8, %v3191_v8 }
 0x1ec   : > { %2621 = vst [vmem:[%s4076_s30] sm:$0xff] %v3185_v11  ;;  %v2520_v17 = vadd.f32 %v3192_v12, %v3190_v7  ;;  %v2555_v18 = vmul.f32 %v3192_v12, %v3192_v12  ;;  %v3186_v19 = vpack.c.bf16 %v3192_v12, %v3191_v8 }
 0x1ed   : > { %v2560_v20 = vadd.f32 %v2554_v15, %v2552_v13  ;;  %v2290_v22 = vpop.f32.mrb[4].mxu1 }
 0x1ee   : > { %v2569_v21 = vadd.f32 %v2555_v18, %v2553_v16  ;;  %2622 = vst [vmem:[%s4076_s30 + $0x8] sm:$0xff] %v3186_v19  ;;  %v2502_v23 = vpop.f32.mrb[4].mxu0  ;;  %v2292_v25 = vpop.f32.mrb[5].mxu1 }
 0x1ef   : > { %v3193_v24 = vadd.f32 %v2502_v23, %v2290_v22  ;;  %v2504_v26 = vpop.f32.mrb[5].mxu0  ;;  %v2294_v28 = vpop.f32.mrb[6].mxu1 }
 0x1f0   : > { %v3194_v27 = vadd.f32 %v2504_v26, %v2292_v25  ;;  %v2506_v29 = vpop.f32.mrb[6].mxu0  ;;  %v2296_v33 = vpop.f32.mrb[7].mxu1 }
 0x1f1   : > { %v2512_v30 = vadd.f32 %v3193_v24, %v2511_v14  ;;  %v2556_v31 = vmul.f32 %v3193_v24, %v3193_v24  ;;  %v3195_v32 = vadd.f32 %v2506_v29, %v2294_v28  ;;  %v2508_v34 = vpop.f32.mrb[7].mxu0 }
 0x1f2   : > { %v2521_v35 = vadd.f32 %v3194_v27, %v2520_v17  ;;  %v2557_v36 = vmul.f32 %v3194_v27, %v3194_v27  ;;  %v3187_v37 = vpack.c.bf16 %v3194_v27, %v3193_v24  ;;  %v3196_v38 = vadd.f32 %v2508_v34, %v2296_v33 }
 0x1f3   : > { %v2561_v39 = vadd.f32 %v2560_v20, %v2556_v31  ;;  %v2513_v40 = vadd.f32 %v3195_v32, %v2512_v30  ;;  %v2558_v41 = vmul.f32 %v3195_v32, %v3195_v32 }
 0x1f4   : > { %v2570_v43 = vadd.f32 %v2569_v21, %v2557_v36  ;;  %2623 = vst [vmem:[%s4076_s30 + $0x10] sm:$0xff] %v3187_v37  ;;  %v2522_v44 = vadd.f32 %v3196_v38, %v2521_v35  ;;  %v2559_v48 = vmul.f32 %v3196_v38, %v3196_v38  ;;  %v3188_v49 = vpack.c.bf16 %v3196_v38, %v3195_v32 }
 0x1f5   : > { %v2514_v50 = vrot.slane %v2513_v40, 4  ;;  %v2562_v51 = vadd.f32 %v2561_v39, %v2558_v41 }
 0x1f6   : > { %v2523_v52 = vrot.slane %v2522_v44, 4  ;;  %v2571_v53 = vadd.f32 %v2570_v43, %v2559_v48  ;;  %2624 = vst [vmem:[%s4076_s30 + $0x18] sm:$0xff] %v3188_v49 }
 0x1f7   : > { %v2515_v42 = vadd.f32 %v2514_v50, %v2513_v40  ;;  %v2563_v45 = vrot.slane %v2562_v51, 4 }
 0x1f8   : > { %v2524_v46 = vadd.f32 %v2523_v52, %v2522_v44  ;;  %v2572_v57 = vrot.slane %v2571_v53, 4 }
 0x1f9   : > { %v2516_v58 = vrot.slane %v2515_v42, 2  ;;  %v2564_v62 = vadd.f32 %v2563_v45, %v2562_v51 }
 0x1fa   : > { %v2525_v63 = vrot.slane %v2524_v46, 2  ;;  %v2573_v0 = vadd.f32 %v2572_v57, %v2571_v53 }
 0x1fb   : > { %v2517_v1 = vadd.f32 %v2516_v58, %v2515_v42  ;;  %v2565_v2 = vrot.slane %v2564_v62, 2 }
 0x1fc   : > { %v2526_v3 = vadd.f32 %v2525_v63, %v2524_v46  ;;  %v2574_v56 = vrot.slane %v2573_v0, 2 }
 0x1fd   : > { %v2518_v59 = vrot.slane %v2517_v1, 1  ;;  %v2566_v6 = vadd.f32 %v2565_v2, %v2564_v62 }
 0x1fe   : > { %v2527_v7 = vrot.slane %v2526_v3, 1  ;;  %v2575_v60 = vadd.f32 %v2574_v56, %v2573_v0 }
 0x1ff   : > { %v2519_v61 = vadd.f32 %v2518_v59, %v2517_v1  ;;  %v2567_v8 = vrot.slane %v2566_v6, 1 }
 0x200   : > { %v2528_v9 = vadd.f32 %v2527_v7, %v2526_v3  ;;  %v2576_v11 = vrot.slane %v2575_v60, 1 }
 0x201   : > { %v2568_v12 = vadd.f32 %v2567_v8, %v2566_v6 }
 0x202   : > { %v2531_v13 = vcombine.low %v2519_v61, %v2528_v9  ;;  %v2577_v14 = vadd.f32 %v2576_v11, %v2575_v60 }
 0x204   : > { %v2538_v15 = vrot.slane %v2531_v13, %v2537_v10  ;;  %v2580_v16 = vcombine.low %v2568_v12, %v2577_v14 }
 0x206   : > { %v2545_v17 = vrot.slane %v2538_v15, %v2537_v10  ;;  %v2587_v18 = vrot.slane %v2580_v16, %v2537_v10 }
 0x208   : > { %2551 = vst.msk [vmem:[%s344_s8] sm:$0x3] %vm2549_vm0, %v2545_v17  ;;  %v2594_v19 = vrot.slane %v2587_v18, %v2537_v10 }
 0x20a   : > { %2596 = vst.msk [vmem:[%s357_s11] sm:$0x3] %vm2549_vm0, %v2594_v19 }
 0x20b PF: > { %s15_s17 = sadd.s32 1, %s3676_s17   ;;  %s4103_s15 = smov %s3672_s16 }
 0x20c   : > { %p12_p5 = scmp.ge.s32.totalorder %s15_s17, 6   ;;  %s4104_s16 = smov %s4106_s18 }
 0x20e   :  { %14 = sbr.rel (!%p12_p5) target bundleno = 2 (0x2), region = 85 }

// kernel: generator_forward.6
= control target key start
LH: loop header
LB: loop body
LE: loop exit
PB: predicated region body
PF: predicated region fallthrough
CT: control target
= control target key end

     0   :  { %s2587_s15 = smov 0   ;;  %s2589_s16 = smov 0   ;;  %s2829_s0 = inlined_call_operand.vmem [shape: bf16[4,128,1024], index: 0, kind: input, shape index: {}]   ;;  %s2830_s1 = inlined_call_operand.vmem [shape: bf16[4,1024,128], index: 1, kind: input, shape index: {}]   ;;  %s2831_s2 = inlined_call_operand.vmem [shape: bf16[4,128,128], index: 2, kind: output, shape index: {0}]   ;;  %s2832_s3 = inlined_call_operand.vmem [shape: f32[4,1,1,128], index: 3, kind: output, shape index: {1}]   ;;  %s2833_s4 = inlined_call_operand.vmem [shape: f32[4,1,1,128], index: 4, kind: output, shape index: {2}]  }
   0x1   :  { %s2591_s17 = smov 0  }
   0x2 LB: > { %s34_s18 = sadd.s32 1, %s2556_s16  ;;  %p1975_p0 = scmp.ge.s32.totalorder %s2560_s17, 1  ;;  %s2560_s17 = sphi %s2591_s17, %s15_s17   ;;  %s2556_s16 = sphi %s2589_s16, %s2835_s16   ;;  %s2552_s15 = sphi %s2587_s15, %s2834_s15  }
   0x3   : > { %p36_p1 = scmp.ge.s32.totalorder %s34_s18, 4  ;;  %p221_p2 = scmp.lt.s32.totalorder %s2560_s17, 5 }
   0x5   : > { %s2837_s18 = smov (%p36_p1, %s34_s18), 0  ;;  %p222_p3 = pnand %p1975_p0, %p221_p2 }
   0x6   : > { %p286_p4 = scmp.lt.s32.totalorder (!%p222_p3), %s2552_s15, 3 }
   0x7   : > { %225 = sbr.rel (%p222_p3) target bundleno = 409 (0x199), region = 28 }
   0xe   : > { %s2839_s15 = smov (!%p286_p4, %s2552_s15), 3 }
   0xf   : > { %s2128_s19 = sshll.u32 %s2839_s15, 9  ;;  %s2130_s26 = sshll.u32 %s2839_s15, 6 }
  0x10   : > { %s2613_s22 = scalar_lea.vmem %s2830_s1, %s2128_s19  ;;  %s2650_s25 = scalar_lea.vmem %s2829_s0, %s2128_s19 }
  0x11   : > { %v2474_v0 = vld [vmem:[%s2613_s22 + $0x40] sm:$0xff]   ;;  %v2478_v4 = vld [vmem:[%s2613_s22 + $0x48] sm:$0xff]   ;;  %v2482_v8 = vld [vmem:[%s2613_s22 + $0x50] sm:$0xff]   ;;  %s2788_s29 = scalar_lea.vmem %s2831_s2, %s2130_s26  ;;  %s325_s6 = scalar_lea.vmem %s2832_s3, %s2839_s15 }
  0x12   : > { %v2475_v1 = vld [vmem:[%s2613_s22 + $0xc0] sm:$0xff]   ;;  %2194 = vmatprep.subr.bf16.mxu0 %v2474_v0  ;;  %v2479_v5 = vld [vmem:[%s2613_s22 + $0xc8] sm:$0xff]   ;;  %v2483_v9 = vld [vmem:[%s2613_s22 + $0xd0] sm:$0xff]   ;;  %s334_s9 = scalar_lea.vmem %s2833_s4, %s2839_s15 }
  0x13   : > { %v2476_v2 = vld [vmem:[%s2613_s22] sm:$0xff]   ;;  %2258 = vmatprep.subr.bf16.mxu1 %v2475_v1  ;;  %v2480_v6 = vld [vmem:[%s2613_s22 + $0x8] sm:$0xff]   ;;  %v2484_v10 = vld [vmem:[%s2613_s22 + $0x10] sm:$0xff]  }
  0x14   : > { %v2477_v3 = vld [vmem:[%s2613_s22 + $0x80] sm:$0xff]   ;;  %2195 = vmatpush3.bf16.msra.mxu0 %v2476_v2  ;;  %v2481_v7 = vld [vmem:[%s2613_s22 + $0x88] sm:$0xff]   ;;  %v2485_v11 = vld [vmem:[%s2613_s22 + $0x90] sm:$0xff]  }
  0x15   : > { %2259 = vmatpush3.bf16.msra.mxu1 %v2477_v3  ;;  %2196 = vmatprep.subr.bf16.mxu0 %v2478_v4  ;;  %v2486_v12 = vld [vmem:[%s2613_s22 + $0x58] sm:$0xff]   ;;  %v2490_v16 = vld [vmem:[%s2613_s22 + $0x60] sm:$0xff]   ;;  %v2494_v20 = vld [vmem:[%s2613_s22 + $0x68] sm:$0xff]  }
  0x16   : > { %2260 = vmatprep.subr.bf16.mxu1 %v2479_v5  ;;  %v2487_v13 = vld [vmem:[%s2613_s22 + $0xd8] sm:$0xff]   ;;  %v2491_v17 = vld [vmem:[%s2613_s22 + $0xe0] sm:$0xff]   ;;  %v2495_v21 = vld [vmem:[%s2613_s22 + $0xe8] sm:$0xff]  }
  0x17   : > { %v2488_v14 = vld [vmem:[%s2613_s22 + $0x18] sm:$0xff]   ;;  %v2492_v18 = vld [vmem:[%s2613_s22 + $0x20] sm:$0xff]   ;;  %v2496_v22 = vld [vmem:[%s2613_s22 + $0x28] sm:$0xff]  }
  0x18   : > { %2197 = vmatpush3.bf16.msra.mxu0 %v2480_v6  ;;  %v2489_v15 = vld [vmem:[%s2613_s22 + $0x98] sm:$0xff]   ;;  %v2493_v19 = vld [vmem:[%s2613_s22 + $0xa0] sm:$0xff]   ;;  %v2497_v23 = vld [vmem:[%s2613_s22 + $0xa8] sm:$0xff]  }
  0x19   : > { %2261 = vmatpush3.bf16.msra.mxu1 %v2481_v7  ;;  %2198 = vmatprep.subr.bf16.mxu0 %v2482_v8  ;;  %v2498_v24 = vld [vmem:[%s2613_s22 + $0x70] sm:$0xff]   ;;  %v2502_v28 = vld [vmem:[%s2613_s22 + $0x78] sm:$0xff]   ;;  %v336_v32 = vld [vmem:[%s2650_s25] sm:$0xff] }
  0x1a   : > { %2262 = vmatprep.subr.bf16.mxu1 %v2483_v9  ;;  %v2499_v25 = vld [vmem:[%s2613_s22 + $0xf0] sm:$0xff]   ;;  %v2503_v29 = vld [vmem:[%s2613_s22 + $0xf8] sm:$0xff]   ;;  %v340_v33 = vld [vmem:[%s2650_s25 + $0x20] sm:$0xff] }
  0x1b   : > { %v2500_v26 = vld [vmem:[%s2613_s22 + $0x30] sm:$0xff]   ;;  %v2504_v30 = vld [vmem:[%s2613_s22 + $0x38] sm:$0xff]   ;;  %v337_v34 = vld [vmem:[%s2650_s25 + $0x8] sm:$0xff]  ;;  %v1982_v35 = vcombine.low %v336_v32, %v340_v33  ;;  %v1983_v36 = vcombine.high %v336_v32, %v340_v33 }
  0x1c   : > { %2199 = vmatpush3.bf16.msra.mxu0 %v2484_v10  ;;  %v2501_v27 = vld [vmem:[%s2613_s22 + $0xb0] sm:$0xff]   ;;  %v2505_v31 = vld [vmem:[%s2613_s22 + $0xb8] sm:$0xff]   ;;  %v341_v37 = vld [vmem:[%s2650_s25 + $0x28] sm:$0xff] }
  0x1d   : > { %2263 = vmatpush3.bf16.msra.mxu1 %v2485_v11  ;;  %2200 = vmatprep.subr.bf16.mxu0 %v2486_v12  ;;  %v1984_v38 = vcombine.low %v337_v34, %v341_v37  ;;  %v1985_v39 = vcombine.high %v337_v34, %v341_v37  ;;  %v2506_v40 = vld [vmem:[%s2613_s22 + $0x140] sm:$0xff]   ;;  %v345_v47 = vld [vmem:[%s2650_s25 + $0x48] sm:$0xff]  ;;  %v2514_v62 = vld [vmem:[%s2613_s22 + $0x150] sm:$0xff]  }
  0x1e   : > { %2264 = vmatprep.subr.bf16.mxu1 %v2487_v13  ;;  %1264 = vmatprep.mubr.bf16.mxu0 %v1983_v36  ;;  %v2507_v41 = vld [vmem:[%s2613_s22 + $0x100] sm:$0xff]   ;;  %v349_v48 = vld [vmem:[%s2650_s25 + $0x68] sm:$0xff]  ;;  %v2515_v63 = vld [vmem:[%s2613_s22 + $0x110] sm:$0xff]  }
  0x1f   : > { %1361 = vmatprep.mubr.bf16.mxu1 %v1985_v39  ;;  %v2508_v42 = vld [vmem:[%s2613_s22 + $0x1c0] sm:$0xff]   ;;  %v1993_v49 = vcombine.high %v345_v47, %v349_v48  ;;  %v2510_v50 = vld [vmem:[%s2613_s22 + $0x148] sm:$0xff]   ;;  %v1992_v53 = vcombine.low %v345_v47, %v349_v48  ;;  %v2516_v0 = vld [vmem:[%s2613_s22 + $0x1d0] sm:$0xff]  }
  0x20   : > { %2201 = vmatpush3.bf16.msra.mxu0 %v2488_v14  ;;  %v2509_v43 = vld [vmem:[%s2613_s22 + $0x180] sm:$0xff]   ;;  %v2511_v52 = vld [vmem:[%s2613_s22 + $0x108] sm:$0xff]   ;;  %v2517_v1 = vld [vmem:[%s2613_s22 + $0x190] sm:$0xff]  }
  0x21   : > { %2265 = vmatpush3.bf16.msra.mxu1 %v2489_v15  ;;  %2202 = vmatprep.subr.bf16.mxu0 %v2490_v16  ;;  %v344_v44 = vld [vmem:[%s2650_s25 + $0x40] sm:$0xff]  ;;  %v2512_v54 = vld [vmem:[%s2613_s22 + $0x1c8] sm:$0xff]   ;;  %v2518_v10 = vld [vmem:[%s2613_s22 + $0x158] sm:$0xff]  }
  0x22   : > { %2266 = vmatprep.subr.bf16.mxu1 %v2491_v17  ;;  %v348_v45 = vld [vmem:[%s2650_s25 + $0x60] sm:$0xff]  ;;  %v2513_v55 = vld [vmem:[%s2613_s22 + $0x188] sm:$0xff]   ;;  %v2519_v11 = vld [vmem:[%s2613_s22 + $0x118] sm:$0xff]  }
  0x23   : > { %v1991_v46 = vcombine.high %v344_v44, %v348_v45  ;;  %v1990_v51 = vcombine.low %v344_v44, %v348_v45  ;;  %v352_v56 = vld [vmem:[%s2650_s25 + $0x80] sm:$0xff]  ;;  %v353_v58 = vld [vmem:[%s2650_s25 + $0x88] sm:$0xff]  ;;  %v2520_v12 = vld [vmem:[%s2613_s22 + $0x1d8] sm:$0xff]  }
  0x24   : > { %2203 = vmatpush3.bf16.msra.mxu0 %v2492_v18  ;;  %v356_v57 = vld [vmem:[%s2650_s25 + $0xa0] sm:$0xff]  ;;  %v357_v59 = vld [vmem:[%s2650_s25 + $0xa8] sm:$0xff]  ;;  %v2521_v13 = vld [vmem:[%s2613_s22 + $0x198] sm:$0xff]  }
  0x25   : > { %2267 = vmatpush3.bf16.msra.mxu1 %v2493_v19  ;;  %2204 = vmatprep.subr.bf16.mxu0 %v2494_v20  ;;  %v1999_v60 = vcombine.high %v352_v56, %v356_v57  ;;  %v2001_v61 = vcombine.high %v353_v58, %v357_v59  ;;  %v1998_v2 = vcombine.low %v352_v56, %v356_v57  ;;  %v360_v3 = vld [vmem:[%s2650_s25 + $0xc0] sm:$0xff]  ;;  %v361_v5 = vld [vmem:[%s2650_s25 + $0xc8] sm:$0xff]  ;;  %v2531_v39 = vld [vmem:[%s2613_s22 + $0x130] sm:$0xff]  }
  0x26   : > { %2268 = vmatprep.subr.bf16.mxu1 %v2495_v21  ;;  %v364_v4 = vld [vmem:[%s2650_s25 + $0xe0] sm:$0xff]  ;;  %v2000_v6 = vcombine.low %v353_v58, %v357_v59  ;;  %v365_v8 = vld [vmem:[%s2650_s25 + $0xe8] sm:$0xff]  ;;  %v2535_v48 = vld [vmem:[%s2613_s22 + $0x138] sm:$0xff]  }
  0x27   : > { %v2007_v7 = vcombine.high %v360_v3, %v364_v4  ;;  %v2009_v9 = vcombine.high %v361_v5, %v365_v8  ;;  %v368_v14 = vld [vmem:[%s2650_s25 + $0x100] sm:$0xff]  ;;  %v369_v16 = vld [vmem:[%s2650_s25 + $0x108] sm:$0xff]  ;;  %v2006_v19 = vcombine.low %v360_v3, %v364_v4  ;;  %v2008_v21 = vcombine.low %v361_v5, %v365_v8  ;;  %v347_v8 = vld [vmem:[%s2650_s25 + $0x58] sm:$0xff] }
  0x28   : > { %2205 = vmatpush3.bf16.msra.mxu0 %v2496_v22  ;;  %v372_v15 = vld [vmem:[%s2650_s25 + $0x120] sm:$0xff]  ;;  %v373_v17 = vld [vmem:[%s2650_s25 + $0x128] sm:$0xff] }
  0x29   : > { %2269 = vmatpush3.bf16.msra.mxu1 %v2497_v23  ;;  %2206 = vmatprep.subr.bf16.mxu0 %v2498_v24  ;;  %v2522_v18 = vld [vmem:[%s2613_s22 + $0x160] sm:$0xff]   ;;  %v2015_v22 = vcombine.high %v368_v14, %v372_v15  ;;  %v2017_v24 = vcombine.high %v369_v16, %v373_v17  ;;  %v2528_v32 = vld [vmem:[%s2613_s22 + $0x1e8] sm:$0xff]   ;;  %v2014_v34 = vcombine.low %v368_v14, %v372_v15  ;;  %v354_v14 = vld [vmem:[%s2650_s25 + $0x90] sm:$0xff] }
  0x2a   : > { %2270 = vmatprep.subr.bf16.mxu1 %v2499_v25  ;;  %v2523_v20 = vld [vmem:[%s2613_s22 + $0x120] sm:$0xff]   ;;  %v2529_v33 = vld [vmem:[%s2613_s22 + $0x1a8] sm:$0xff]   ;;  %v358_v15 = vld [vmem:[%s2650_s25 + $0xb0] sm:$0xff] }
  0x2b   : > { %v2524_v23 = vld [vmem:[%s2613_s22 + $0x1e0] sm:$0xff]   ;;  %v385_v44 = vld [vmem:[%s2650_s25 + $0x188] sm:$0xff] }
  0x2c   : > { %2207 = vmatpush3.bf16.msra.mxu0 %v2500_v26  ;;  %v2525_v25 = vld [vmem:[%s2613_s22 + $0x1a0] sm:$0xff]   ;;  %v389_v45 = vld [vmem:[%s2650_s25 + $0x1a8] sm:$0xff] }
  0x2d   : > { %2271 = vmatpush3.bf16.msra.mxu1 %v2501_v27  ;;  %2208 = vmatprep.subr.bf16.mxu0 %v2502_v28  ;;  %v376_v26 = vld [vmem:[%s2650_s25 + $0x140] sm:$0xff]  ;;  %v2526_v28 = vld [vmem:[%s2613_s22 + $0x168] sm:$0xff]   ;;  %v2032_v59 = vcombine.low %v385_v44, %v389_v45 }
  0x2e   : > { %2272 = vmatprep.subr.bf16.mxu1 %v2503_v29  ;;  %v380_v27 = vld [vmem:[%s2650_s25 + $0x160] sm:$0xff]  ;;  %v377_v29 = vld [vmem:[%s2650_s25 + $0x148] sm:$0xff] }
  0x2f   : > { %v2023_v36 = vcombine.high %v376_v26, %v380_v27  ;;  %v2022_v47 = vcombine.low %v376_v26, %v380_v27  ;;  %v393_v56 = vld [vmem:[%s2650_s25 + $0x1c8] sm:$0xff]  ;;  %v2002_v26 = vcombine.low %v354_v14, %v358_v15 }
  0x30   : > { %2209 = vmatpush3.bf16.msra.mxu0 %v2504_v30  ;;  %v381_v30 = vld [vmem:[%s2650_s25 + $0x168] sm:$0xff] }
  0x31   : > { %2273 = vmatpush3.bf16.msra.mxu1 %v2505_v31  ;;  %2322 = vmatprep.subr.bf16.mxu0 %v2506_v40  ;;  %v2527_v31 = vld [vmem:[%s2613_s22 + $0x128] sm:$0xff]   ;;  %v2025_v37 = vcombine.high %v377_v29, %v381_v30  ;;  %v2532_v40 = vld [vmem:[%s2613_s22 + $0x1f0] sm:$0xff]  }
  0x32   : > { %2386 = vmatprep.subr.bf16.mxu1 %v2508_v42  ;;  %v388_v42 = vld [vmem:[%s2650_s25 + $0x1a0] sm:$0xff]  ;;  %v397_v57 = vld [vmem:[%s2650_s25 + $0x1e8] sm:$0xff] }
  0x33   : > { %1265 = vmatmul.mubr.bf16.vlgmr.msra.gmra.mrb[0].mxu0 %v1982_v35  ;;  %v2016_v35 = vcombine.low %v369_v16, %v373_v17  ;;  %v2040_v3 = vcombine.low %v393_v56, %v397_v57  ;;  %v355_v16 = vld [vmem:[%s2650_s25 + $0x98] sm:$0xff] }
  0x34   : > { %1362 = vmatmul.mubr.bf16.vlgmr.msra.gmra.mrb[0].mxu1 %v1984_v38  ;;  %2323 = vmatpush3.bf16.msra.mxu0 %v2507_v41  ;;  %v2530_v38 = vld [vmem:[%s2613_s22 + $0x170] sm:$0xff]   ;;  %v384_v41 = vld [vmem:[%s2650_s25 + $0x180] sm:$0xff]  ;;  %v359_v17 = vld [vmem:[%s2650_s25 + $0xb8] sm:$0xff] }
  0x35   : > { %2387 = vmatpush3.bf16.msra.mxu1 %v2509_v43  ;;  %1272 = vmatprep.mubr.bf16.mxu0 %v1991_v46  ;;  %v2533_v43 = vld [vmem:[%s2613_s22 + $0x1b0] sm:$0xff]   ;;  %v2534_v46 = vld [vmem:[%s2613_s22 + $0x178] sm:$0xff]   ;;  %v2030_v58 = vcombine.low %v384_v41, %v388_v42  ;;  %v2004_v27 = vcombine.low %v355_v16, %v359_v17 }
  0x36   : > { %1369 = vmatprep.mubr.bf16.mxu1 %v1993_v49  ;;  %2324 = vmatprep.subr.bf16.mxu0 %v2510_v50  ;;  %v2024_v49 = vcombine.low %v377_v29, %v381_v30  ;;  %v2031_v50 = vcombine.high %v384_v41, %v388_v42  ;;  %v370_v30 = vld [vmem:[%s2650_s25 + $0x110] sm:$0xff]  ;;  %v383_v41 = vld [vmem:[%s2650_s25 + $0x178] sm:$0xff] }
  0x37   : > { %2388 = vmatprep.subr.bf16.mxu1 %v2512_v54  ;;  %v392_v54 = vld [vmem:[%s2650_s25 + $0x1c0] sm:$0xff] }
  0x38   : > { %2325 = vmatpush3.bf16.msra.mxu0 %v2511_v52  ;;  %v2033_v52 = vcombine.high %v385_v44, %v389_v45 }
  0x39   : > { %2389 = vmatpush3.bf16.msra.mxu1 %v2513_v55  ;;  %2326 = vmatprep.subr.bf16.mxu0 %v2514_v62  ;;  %v396_v55 = vld [vmem:[%s2650_s25 + $0x1e0] sm:$0xff]  ;;  %v338_v62 = vld [vmem:[%s2650_s25 + $0x10] sm:$0xff] }
  0x3a   : > { %2390 = vmatprep.subr.bf16.mxu1 %v2516_v0  ;;  %v339_v0 = vld [vmem:[%s2650_s25 + $0x18] sm:$0xff] }
  0x3b   : > { %1273 = vmatmul.mubr.bf16.gmra.mrb[4].mxu0 %v1990_v51  ;;  %v2536_v51 = vld [vmem:[%s2613_s22 + $0x1f8] sm:$0xff]  }
  0x3c   : > { %1370 = vmatmul.mubr.bf16.gmra.mrb[4].mxu1 %v1992_v53  ;;  %1280 = vmatprep.mubr.bf16.mxu0 %v1999_v60  ;;  %v2537_v53 = vld [vmem:[%s2613_s22 + $0x1b8] sm:$0xff]   ;;  %v2039_v60 = vcombine.high %v392_v54, %v396_v55 }
  0x3d   : > { %1377 = vmatprep.mubr.bf16.mxu1 %v2001_v61  ;;  %2327 = vmatpush3.bf16.msra.mxu0 %v2515_v63  ;;  %v2041_v61 = vcombine.high %v393_v56, %v397_v57  ;;  %v342_v63 = vld [vmem:[%s2650_s25 + $0x30] sm:$0xff]  ;;  %v395_v56 = vld [vmem:[%s2650_s25 + $0x1d8] sm:$0xff] }
  0x3e   : > { %2391 = vmatpush3.bf16.msra.mxu1 %v2517_v1  ;;  %2328 = vmatprep.subr.bf16.mxu0 %v2518_v10  ;;  %v343_v1 = vld [vmem:[%s2650_s25 + $0x38] sm:$0xff]  ;;  %v1987_v4 = vcombine.high %v338_v62, %v342_v63  ;;  %v1986_v10 = vcombine.low %v338_v62, %v342_v63 }
  0x3f   : > { %2392 = vmatprep.subr.bf16.mxu1 %v2520_v12  ;;  %v1989_v5 = vcombine.high %v339_v0, %v343_v1  ;;  %v399_v57 = vld [vmem:[%s2650_s25 + $0x1f8] sm:$0xff] }
  0x40   : > { %v2044_v63 = vcombine.low %v395_v56, %v399_v57 }
  0x41   : > { %2329 = vmatpush3.bf16.msra.mxu0 %v2519_v11  ;;  %v1988_v11 = vcombine.low %v339_v0, %v343_v1 }
  0x42   : > { %2393 = vmatpush3.bf16.msra.mxu1 %v2521_v13  ;;  %2330 = vmatprep.subr.bf16.mxu0 %v2522_v18 }
  0x43   : > { %1281 = vmatmul.mubr.bf16.gmra.mrb[8].mxu0 %v1998_v2  ;;  %2394 = vmatprep.subr.bf16.mxu1 %v2524_v23  ;;  %v2038_v2 = vcombine.low %v392_v54, %v396_v55  ;;  %v366_v23 = vld [vmem:[%s2650_s25 + $0xf0] sm:$0xff] }
  0x44   : > { %1378 = vmatmul.mubr.bf16.gmra.mrb[8].mxu1 %v2000_v6  ;;  %1288 = vmatprep.mubr.bf16.mxu0 %v2007_v7  ;;  %v346_v6 = vld [vmem:[%s2650_s25 + $0x50] sm:$0xff] }
  0x45   : > { %1385 = vmatprep.mubr.bf16.mxu1 %v2009_v9  ;;  %2331 = vmatpush3.bf16.msra.mxu0 %v2523_v20  ;;  %v350_v7 = vld [vmem:[%s2650_s25 + $0x70] sm:$0xff]  ;;  %v351_v9 = vld [vmem:[%s2650_s25 + $0x78] sm:$0xff]  ;;  %v2003_v20 = vcombine.high %v354_v14, %v358_v15 }
  0x46   : > { %2395 = vmatpush3.bf16.msra.mxu1 %v2525_v25  ;;  %2332 = vmatprep.subr.bf16.mxu0 %v2526_v28  ;;  %v1995_v12 = vcombine.high %v346_v6, %v350_v7  ;;  %v1997_v13 = vcombine.high %v347_v8, %v351_v9  ;;  %v1994_v18 = vcombine.low %v346_v6, %v350_v7  ;;  %v367_v25 = vld [vmem:[%s2650_s25 + $0xf8] sm:$0xff]  ;;  %v394_v54 = vld [vmem:[%s2650_s25 + $0x1d0] sm:$0xff] }
  0x47   : > { %2396 = vmatprep.subr.bf16.mxu1 %v2528_v32  ;;  %v371_v32 = vld [vmem:[%s2650_s25 + $0x118] sm:$0xff]  ;;  %v398_v55 = vld [vmem:[%s2650_s25 + $0x1f0] sm:$0xff] }
  0x48   : > { %v2042_v62 = vcombine.low %v394_v54, %v398_v55 }
  0x49   : > { %2333 = vmatpush3.bf16.msra.mxu0 %v2527_v31  ;;  %v374_v31 = vld [vmem:[%s2650_s25 + $0x130] sm:$0xff] }
  0x4a   : > { %2397 = vmatpush3.bf16.msra.mxu1 %v2529_v33  ;;  %2334 = vmatprep.subr.bf16.mxu0 %v2530_v38  ;;  %v375_v33 = vld [vmem:[%s2650_s25 + $0x138] sm:$0xff]  ;;  %v378_v38 = vld [vmem:[%s2650_s25 + $0x150] sm:$0xff]  ;;  %v2018_v42 = vcombine.low %v370_v30, %v374_v31 }
  0x4b   : > { %1289 = vmatmul.mubr.bf16.gmra.mrb[12].mxu0 %v2006_v19  ;;  %2398 = vmatprep.subr.bf16.mxu1 %v2532_v40  ;;  %v1996_v19 = vcombine.low %v347_v8, %v351_v9  ;;  %v379_v40 = vld [vmem:[%s2650_s25 + $0x158] sm:$0xff] }
  0x4c   : > { %1386 = vmatmul.mubr.bf16.gmra.mrb[12].mxu1 %v2008_v21  ;;  %1296 = vmatprep.mubr.bf16.mxu0 %v2015_v22  ;;  %v2005_v21 = vcombine.high %v355_v16, %v359_v17  ;;  %v362_v22 = vld [vmem:[%s2650_s25 + $0xd0] sm:$0xff]  ;;  %v2029_v45 = vcombine.high %v379_v40, %v383_v41 }
  0x4d   : > { %1393 = vmatprep.mubr.bf16.mxu1 %v2017_v24  ;;  %2335 = vmatpush3.bf16.msra.mxu0 %v2531_v39  ;;  %v363_v24 = vld [vmem:[%s2650_s25 + $0xd8] sm:$0xff]  ;;  %v2011_v28 = vcombine.high %v362_v22, %v366_v23  ;;  %v382_v39 = vld [vmem:[%s2650_s25 + $0x170] sm:$0xff] }
  0x4e   : > { %2399 = vmatpush3.bf16.msra.mxu1 %v2533_v43  ;;  %2336 = vmatprep.subr.bf16.mxu0 %v2534_v46  ;;  %v2013_v29 = vcombine.high %v363_v24, %v367_v25  ;;  %v2020_v43 = vcombine.low %v371_v32, %v375_v33  ;;  %v2027_v44 = vcombine.high %v378_v38, %v382_v39  ;;  %v386_v46 = vld [vmem:[%s2650_s25 + $0x190] sm:$0xff] }
  0x4f   : > { %2400 = vmatprep.subr.bf16.mxu1 %v2536_v51  ;;  %v2028_v51 = vcombine.low %v379_v40, %v383_v41 }
  0x51   : > { %2337 = vmatpush3.bf16.msra.mxu0 %v2535_v48  ;;  %v387_v48 = vld [vmem:[%s2650_s25 + $0x198] sm:$0xff] }
  0x52   : > { %2401 = vmatpush3.bf16.msra.mxu1 %v2537_v53 }
  0x53   : > { %1297 = vmatmul.mubr.bf16.gmra.mrb[16].mxu0 %v2014_v34  ;;  %v2010_v34 = vcombine.low %v362_v22, %v366_v23 }
  0x54   : > { %1394 = vmatmul.mubr.bf16.gmra.mrb[16].mxu1 %v2016_v35  ;;  %1304 = vmatprep.mubr.bf16.mxu0 %v2023_v36  ;;  %v2012_v35 = vcombine.low %v363_v24, %v367_v25  ;;  %v2019_v36 = vcombine.high %v370_v30, %v374_v31 }
  0x55   : > { %1401 = vmatprep.mubr.bf16.mxu1 %v2025_v37  ;;  %v2021_v37 = vcombine.high %v371_v32, %v375_v33 }
  0x5b   : > { %1305 = vmatmul.mubr.bf16.gmra.mrb[20].mxu0 %v2022_v47  ;;  %v390_v47 = vld [vmem:[%s2650_s25 + $0x1b0] sm:$0xff] }
  0x5c   : > { %1402 = vmatmul.mubr.bf16.gmra.mrb[20].mxu1 %v2024_v49  ;;  %1312 = vmatprep.mubr.bf16.mxu0 %v2031_v50  ;;  %v391_v49 = vld [vmem:[%s2650_s25 + $0x1b8] sm:$0xff]  ;;  %v2026_v50 = vcombine.low %v378_v38, %v382_v39 }
  0x5d   : > { %1409 = vmatprep.mubr.bf16.mxu1 %v2033_v52  ;;  %v2035_v52 = vcombine.high %v386_v46, %v390_v47  ;;  %v2037_v53 = vcombine.high %v387_v48, %v391_v49 }
  0x63   : > { %1313 = vmatmul.mubr.bf16.gmra.mrb[24].mxu0 %v2030_v58  ;;  %v2034_v58 = vcombine.low %v386_v46, %v390_v47 }
  0x64   : > { %1410 = vmatmul.mubr.bf16.gmra.mrb[24].mxu1 %v2032_v59  ;;  %1320 = vmatprep.mubr.bf16.mxu0 %v2039_v60  ;;  %v2036_v59 = vcombine.low %v387_v48, %v391_v49  ;;  %v2043_v60 = vcombine.high %v394_v54, %v398_v55 }
  0x65   : > { %1417 = vmatprep.mubr.bf16.mxu1 %v2041_v61  ;;  %v2045_v61 = vcombine.high %v395_v56, %v399_v57 }
  0x6b   : > { %1321 = vmatmul.mubr.bf16.gmra.mrb[28].mxu0 %v2038_v2 }
  0x6c   : > { %1418 = vmatmul.mubr.bf16.gmra.mrb[28].mxu1 %v2040_v3  ;;  %1458 = vmatprep.mubr.bf16.mxu0 %v1987_v4 }
  0x6d   : > { %1555 = vmatprep.mubr.bf16.mxu1 %v1989_v5 }
  0x73   : > { %1459 = vmatmul.mubr.bf16.vlgmr.msra.gmra.mrb[32].mxu0 %v1986_v10 }
  0x74   : > { %1556 = vmatmul.mubr.bf16.vlgmr.msra.gmra.mrb[32].mxu1 %v1988_v11  ;;  %1466 = vmatprep.mubr.bf16.mxu0 %v1995_v12 }
  0x75   : > { %1563 = vmatprep.mubr.bf16.mxu1 %v1997_v13 }
  0x7b   : > { %1467 = vmatmul.mubr.bf16.gmra.mrb[36].mxu0 %v1994_v18 }
  0x7c   : > { %1564 = vmatmul.mubr.bf16.gmra.mrb[36].mxu1 %v1996_v19  ;;  %1474 = vmatprep.mubr.bf16.mxu0 %v2003_v20 }
  0x7d   : > { %1571 = vmatprep.mubr.bf16.mxu1 %v2005_v21 }
  0x83   : > { %1475 = vmatmul.mubr.bf16.gmra.mrb[40].mxu0 %v2002_v26 }
  0x84   : > { %1572 = vmatmul.mubr.bf16.gmra.mrb[40].mxu1 %v2004_v27  ;;  %1482 = vmatprep.mubr.bf16.mxu0 %v2011_v28 }
  0x85   : > { %1579 = vmatprep.mubr.bf16.mxu1 %v2013_v29 }
  0x8b   : > { %1483 = vmatmul.mubr.bf16.gmra.mrb[44].mxu0 %v2010_v34 }
  0x8c   : > { %1580 = vmatmul.mubr.bf16.gmra.mrb[44].mxu1 %v2012_v35  ;;  %1490 = vmatprep.mubr.bf16.mxu0 %v2019_v36 }
  0x8d   : > { %1587 = vmatprep.mubr.bf16.mxu1 %v2021_v37 }
  0x93   : > { %1491 = vmatmul.mubr.bf16.gmra.mrb[48].mxu0 %v2018_v42 }
  0x94   : > { %1588 = vmatmul.mubr.bf16.gmra.mrb[48].mxu1 %v2020_v43  ;;  %1498 = vmatprep.mubr.bf16.mxu0 %v2027_v44 }
  0x95   : > { %1595 = vmatprep.mubr.bf16.mxu1 %v2029_v45 }
  0x9b   : > { %1499 = vmatmul.mubr.bf16.gmra.mrb[52].mxu0 %v2026_v50 }
  0x9c   : > { %1596 = vmatmul.mubr.bf16.gmra.mrb[52].mxu1 %v2028_v51  ;;  %1506 = vmatprep.mubr.bf16.mxu0 %v2035_v52 }
  0x9d   : > { %1603 = vmatprep.mubr.bf16.mxu1 %v2037_v53 }
  0xa3   : > { %1507 = vmatmul.mubr.bf16.gmra.mrb[56].mxu0 %v2034_v58 }
  0xa4   : > { %1604 = vmatmul.mubr.bf16.gmra.mrb[56].mxu1 %v2036_v59  ;;  %1514 = vmatprep.mubr.bf16.mxu0 %v2043_v60 }
  0xa5   : > { %1611 = vmatprep.mubr.bf16.mxu1 %v2045_v61 }
  0xab   : > { %1515 = vmatmul.mubr.bf16.gmra.mrb[60].mxu0 %v2042_v62 }
  0xac   : > { %1612 = vmatmul.mubr.bf16.gmra.mrb[60].mxu1 %v2044_v63 }
 0x106   : > { %v2210_v0 = vpop.f32.mrb[0].mxu0 }
 0x107   : > { %v2274_v1 = vpop.f32.mrb[0].mxu1  ;;  %v2211_v2 = vpop.f32.mrb[1].mxu0 }
 0x108   : > { %v2212_v3 = vadd.f32 %v2211_v2, %v2210_v0  ;;  %v2275_v4 = vpop.f32.mrb[1].mxu1  ;;  %v2213_v5 = vpop.f32.mrb[2].mxu0 }
 0x109   : > { %v2276_v6 = vadd.f32 %v2275_v4, %v2274_v1  ;;  %v2277_v7 = vpop.f32.mrb[2].mxu1  ;;  %v2214_v8 = vpop.f32.mrb[3].mxu0 }
 0x10a   : > { %v2215_v9 = vadd.f32 %v2214_v8, %v2213_v5  ;;  %v2278_v10 = vpop.f32.mrb[3].mxu1 }
 0x10b   : > { %v2750_v11 = vadd.f32 %v2276_v6, %v2212_v3  ;;  %v2279_v12 = vadd.f32 %v2278_v10, %v2277_v7 }
 0x10d   : > { %v2752_v13 = vadd.f32 %v2279_v12, %v2215_v9 }
 0x10e   : > { %v2216_v14 = vpop.f32.mrb[4].mxu0 }
 0x10f   : > { %v2280_v15 = vpop.f32.mrb[4].mxu1  ;;  %v2217_v16 = vpop.f32.mrb[5].mxu0 }
 0x110   : > { %v2218_v17 = vadd.f32 %v2217_v16, %v2216_v14  ;;  %v2281_v18 = vpop.f32.mrb[5].mxu1  ;;  %v2219_v19 = vpop.f32.mrb[6].mxu0 }
 0x111   : > { %v2282_v20 = vadd.f32 %v2281_v18, %v2280_v15  ;;  %v2283_v21 = vpop.f32.mrb[6].mxu1  ;;  %v2220_v22 = vpop.f32.mrb[7].mxu0 }
 0x112   : > { %v2221_v23 = vadd.f32 %v2220_v22, %v2219_v19  ;;  %v2284_v24 = vpop.f32.mrb[7].mxu1 }
 0x113   : > { %v2754_v25 = vadd.f32 %v2282_v20, %v2218_v17  ;;  %v2285_v26 = vadd.f32 %v2284_v24, %v2283_v21 }
 0x115   : > { %v2756_v27 = vadd.f32 %v2285_v26, %v2221_v23 }
 0x116   : > { %v2222_v28 = vpop.f32.mrb[8].mxu0 }
 0x117   : > { %v2286_v29 = vpop.f32.mrb[8].mxu1  ;;  %v2223_v30 = vpop.f32.mrb[9].mxu0 }
 0x118   : > { %v2224_v31 = vadd.f32 %v2223_v30, %v2222_v28  ;;  %v2287_v32 = vpop.f32.mrb[9].mxu1  ;;  %v2225_v33 = vpop.f32.mrb[10].mxu0 }
 0x119   : > { %v2288_v34 = vadd.f32 %v2287_v32, %v2286_v29  ;;  %v2289_v35 = vpop.f32.mrb[10].mxu1  ;;  %v2226_v36 = vpop.f32.mrb[11].mxu0 }
 0x11a   : > { %v2227_v37 = vadd.f32 %v2226_v36, %v2225_v33  ;;  %v2290_v38 = vpop.f32.mrb[11].mxu1 }
 0x11b   : > { %v2758_v39 = vadd.f32 %v2288_v34, %v2224_v31  ;;  %v2291_v40 = vadd.f32 %v2290_v38, %v2289_v35 }
 0x11d   : > { %v2760_v41 = vadd.f32 %v2291_v40, %v2227_v37 }
 0x11e   : > { %v2228_v42 = vpop.f32.mrb[12].mxu0 }
 0x11f   : > { %v2292_v43 = vpop.f32.mrb[12].mxu1  ;;  %v2229_v44 = vpop.f32.mrb[13].mxu0 }
 0x120   : > { %v2230_v45 = vadd.f32 %v2229_v44, %v2228_v42  ;;  %v2293_v46 = vpop.f32.mrb[13].mxu1  ;;  %v2231_v47 = vpop.f32.mrb[14].mxu0 }
 0x121   : > { %v2294_v48 = vadd.f32 %v2293_v46, %v2292_v43  ;;  %v2295_v49 = vpop.f32.mrb[14].mxu1  ;;  %v2232_v50 = vpop.f32.mrb[15].mxu0 }
 0x122   : > { %v2233_v51 = vadd.f32 %v2232_v50, %v2231_v47  ;;  %v2296_v52 = vpop.f32.mrb[15].mxu1 }
 0x123   : > { %v2762_v53 = vadd.f32 %v2294_v48, %v2230_v45  ;;  %v2297_v54 = vadd.f32 %v2296_v52, %v2295_v49 }
 0x125   : > { %v2764_v55 = vadd.f32 %v2297_v54, %v2233_v51 }
 0x126   : > { %v2234_v56 = vpop.f32.mrb[16].mxu0 }
 0x127   : > { %v2298_v57 = vpop.f32.mrb[16].mxu1  ;;  %v2235_v58 = vpop.f32.mrb[17].mxu0 }
 0x128   : > { %v2236_v59 = vadd.f32 %v2235_v58, %v2234_v56  ;;  %v2299_v60 = vpop.f32.mrb[17].mxu1  ;;  %v2237_v61 = vpop.f32.mrb[18].mxu0 }
 0x129   : > { %v2300_v62 = vadd.f32 %v2299_v60, %v2298_v57  ;;  %v2301_v63 = vpop.f32.mrb[18].mxu1  ;;  %v2238_v0 = vpop.f32.mrb[19].mxu0 }
 0x12a   : > { %v2239_v1 = vadd.f32 %v2238_v0, %v2237_v61  ;;  %v2302_v2 = vpop.f32.mrb[19].mxu1 }
 0x12b   : > { %v2766_v3 = vadd.f32 %v2300_v62, %v2236_v59  ;;  %v2303_v4 = vadd.f32 %v2302_v2, %v2301_v63 }
 0x12d   : > { %v2768_v5 = vadd.f32 %v2303_v4, %v2239_v1 }
 0x12e   : > { %v2240_v6 = vpop.f32.mrb[20].mxu0 }
 0x12f   : > { %v2304_v7 = vpop.f32.mrb[20].mxu1  ;;  %v2241_v8 = vpop.f32.mrb[21].mxu0 }
 0x130   : > { %v2242_v9 = vadd.f32 %v2241_v8, %v2240_v6  ;;  %v2305_v10 = vpop.f32.mrb[21].mxu1  ;;  %v2243_v12 = vpop.f32.mrb[22].mxu0 }
 0x131   : > { %v2306_v14 = vadd.f32 %v2305_v10, %v2304_v7  ;;  %v2307_v15 = vpop.f32.mrb[22].mxu1  ;;  %v2244_v16 = vpop.f32.mrb[23].mxu0 }
 0x132   : > { %v2245_v17 = vadd.f32 %v2244_v16, %v2243_v12  ;;  %v2308_v18 = vpop.f32.mrb[23].mxu1 }
 0x133   : > { %v2770_v19 = vadd.f32 %v2306_v14, %v2242_v9  ;;  %v2309_v20 = vadd.f32 %v2308_v18, %v2307_v15 }
 0x135   : > { %v2772_v21 = vadd.f32 %v2309_v20, %v2245_v17 }
 0x136   : > { %v2246_v22 = vpop.f32.mrb[24].mxu0 }
 0x137   : > { %v2310_v23 = vpop.f32.mrb[24].mxu1  ;;  %v2247_v24 = vpop.f32.mrb[25].mxu0 }
 0x138   : > { %v2248_v26 = vadd.f32 %v2247_v24, %v2246_v22  ;;  %v2311_v28 = vpop.f32.mrb[25].mxu1  ;;  %v2249_v29 = vpop.f32.mrb[26].mxu0 }
 0x139   : > { %v2312_v30 = vadd.f32 %v2311_v28, %v2310_v23  ;;  %v2313_v31 = vpop.f32.mrb[26].mxu1  ;;  %v2250_v32 = vpop.f32.mrb[27].mxu0 }
 0x13a   : > { %v2251_v33 = vadd.f32 %v2250_v32, %v2249_v29  ;;  %v2314_v34 = vpop.f32.mrb[27].mxu1 }
 0x13b   : > { %v2774_v35 = vadd.f32 %v2312_v30, %v2248_v26  ;;  %v2315_v36 = vadd.f32 %v2314_v34, %v2313_v31 }
 0x13d   : > { %v2776_v37 = vadd.f32 %v2315_v36, %v2251_v33 }
 0x13e   : > { %v2252_v38 = vpop.f32.mrb[28].mxu0 }
 0x13f   : > { %v2316_v40 = vpop.f32.mrb[28].mxu1  ;;  %v2253_v42 = vpop.f32.mrb[29].mxu0 }
 0x140   : > { %v2254_v43 = vadd.f32 %v2253_v42, %v2252_v38  ;;  %v2317_v44 = vpop.f32.mrb[29].mxu1  ;;  %v2255_v45 = vpop.f32.mrb[30].mxu0 }
 0x141   : > { %v2318_v46 = vadd.f32 %v2317_v44, %v2316_v40  ;;  %v2319_v47 = vpop.f32.mrb[30].mxu1  ;;  %v2256_v48 = vpop.f32.mrb[31].mxu0 }
 0x142   : > { %v2257_v49 = vadd.f32 %v2256_v48, %v2255_v45  ;;  %v2320_v50 = vpop.f32.mrb[31].mxu1 }
 0x143   : > { %v2778_v51 = vadd.f32 %v2318_v46, %v2254_v43  ;;  %v2321_v52 = vadd.f32 %v2320_v50, %v2319_v47 }
 0x145   : > { %v2780_v54 = vadd.f32 %v2321_v52, %v2257_v49 }
 0x146   : > { %v2338_v56 = vpop.f32.mrb[32].mxu0 }
 0x147   : > { %v2402_v57 = vpop.f32.mrb[32].mxu1  ;;  %v2339_v58 = vpop.f32.mrb[33].mxu0 }
 0x148   : > { %v2340_v59 = vadd.f32 %v2339_v58, %v2338_v56  ;;  %v2403_v60 = vpop.f32.mrb[33].mxu1  ;;  %v2341_v61 = vpop.f32.mrb[34].mxu0 }
 0x149   : > { %v2404_v62 = vadd.f32 %v2403_v60, %v2402_v57  ;;  %v2405_v63 = vpop.f32.mrb[34].mxu1  ;;  %v2342_v0 = vpop.f32.mrb[35].mxu0 }
 0x14a   : > { %v1461_v1 = vadd.f32 %v2340_v59, %v2750_v11  ;;  %v2343_v2 = vadd.f32 %v2342_v0, %v2341_v61  ;;  %v2406_v4 = vpop.f32.mrb[35].mxu1 }
 0x14b   : > { %v2407_v6 = vadd.f32 %v2406_v4, %v2405_v63 }
 0x14c   : > { %v1558_v7 = vadd.f32 %v2404_v62, %v1461_v1  ;;  %v1464_v8 = vadd.f32 %v2343_v2, %v2752_v13 }
 0x14e   : > { %v1561_v9 = vadd.f32 %v2407_v6, %v1464_v8  ;;  %v2344_v10 = vpop.f32.mrb[36].mxu0  ;;  %v1642_v12 = vmul.f32 %v1558_v7, %v1558_v7 }
 0x14f   : > { %v2408_v14 = vpop.f32.mrb[36].mxu1  ;;  %v2345_v15 = vpop.f32.mrb[37].mxu0 }
 0x150   : > { %v1620_v16 = vadd.f32 %v1561_v9, %v1558_v7  ;;  %v1643_v11 = vmul.f32 %v1561_v9, %v1561_v9  ;;  %v2150_v17 = vpack.c.bf16 %v1561_v9, %v1558_v7  ;;  %v2346_v18 = vadd.f32 %v2345_v15, %v2344_v10  ;;  %v2409_v20 = vpop.f32.mrb[37].mxu1  ;;  %v2347_v22 = vpop.f32.mrb[38].mxu0 }
 0x151   : > { %v2410_v23 = vadd.f32 %v2409_v20, %v2408_v14  ;;  %v2411_v13 = vpop.f32.mrb[38].mxu1  ;;  %v2348_v24 = vpop.f32.mrb[39].mxu0 }
 0x152   : > { %v1658_v26 = vadd.f32 %v1643_v11, %v1642_v12  ;;  %2151 = vst [vmem:[%s2788_s29] sm:$0xff] %v2150_v17   ;;  %v1469_v28 = vadd.f32 %v2346_v18, %v2754_v25  ;;  %v2349_v29 = vadd.f32 %v2348_v24, %v2347_v22  ;;  %v2412_v30 = vpop.f32.mrb[39].mxu1 }
 0x153   : > { %v2413_v31 = vadd.f32 %v2412_v30, %v2411_v13 }
 0x154   : > { %v1566_v32 = vadd.f32 %v2410_v23, %v1469_v28  ;;  %v1472_v33 = vadd.f32 %v2349_v29, %v2756_v27 }
 0x156   : > { %v1621_v34 = vadd.f32 %v1620_v16, %v1566_v32  ;;  %v1644_v36 = vmul.f32 %v1566_v32, %v1566_v32  ;;  %v1569_v38 = vadd.f32 %v2413_v31, %v1472_v33  ;;  %v2350_v40 = vpop.f32.mrb[40].mxu0 }
 0x157   : > { %v2414_v42 = vpop.f32.mrb[40].mxu1  ;;  %v2351_v43 = vpop.f32.mrb[41].mxu0 }
 0x158   : > { %v1659_v44 = vadd.f32 %v1658_v26, %v1644_v36  ;;  %v1622_v45 = vadd.f32 %v1621_v34, %v1569_v38  ;;  %v1645_v46 = vmul.f32 %v1569_v38, %v1569_v38  ;;  %v2155_v47 = vpack.c.bf16 %v1569_v38, %v1566_v32  ;;  %v2415_v48 = vpop.f32.mrb[41].mxu1  ;;  %v2353_v49 = vpop.f32.mrb[42].mxu0 }
 0x159   : > { %v2352_v25 = vadd.f32 %v2351_v43, %v2350_v40  ;;  %v2416_v50 = vadd.f32 %v2415_v48, %v2414_v42  ;;  %v2417_v52 = vpop.f32.mrb[42].mxu1  ;;  %v2354_v56 = vpop.f32.mrb[43].mxu0 }
 0x15a   : > { %v1660_v57 = vadd.f32 %v1659_v44, %v1645_v46  ;;  %2187 = vst [vmem:[%s2788_s29 + $0x8] sm:$0xff] %v2155_v47   ;;  %v2355_v27 = vadd.f32 %v2354_v56, %v2353_v49  ;;  %v2418_v58 = vpop.f32.mrb[43].mxu1 }
 0x15b   : > { %v1477_v59 = vadd.f32 %v2352_v25, %v2758_v39  ;;  %v2419_v60 = vadd.f32 %v2418_v58, %v2417_v52 }
 0x15c   : > { %v1480_v61 = vadd.f32 %v2355_v27, %v2760_v41 }
 0x15d   : > { %v1574_v62 = vadd.f32 %v2416_v50, %v1477_v59 }
 0x15e   : > { %v1577_v63 = vadd.f32 %v2419_v60, %v1480_v61  ;;  %v2356_v0 = vpop.f32.mrb[44].mxu0 }
 0x15f   : > { %v1623_v1 = vadd.f32 %v1622_v45, %v1574_v62  ;;  %v1646_v2 = vmul.f32 %v1574_v62, %v1574_v62  ;;  %v2420_v4 = vpop.f32.mrb[44].mxu1  ;;  %v2357_v6 = vpop.f32.mrb[45].mxu0 }
 0x160   : > { %v1647_v7 = vmul.f32 %v1577_v63, %v1577_v63  ;;  %v2160_v8 = vpack.c.bf16 %v1577_v63, %v1574_v62  ;;  %v2358_v9 = vadd.f32 %v2357_v6, %v2356_v0  ;;  %v2421_v10 = vpop.f32.mrb[45].mxu1  ;;  %v2359_v12 = vpop.f32.mrb[46].mxu0 }
 0x161   : > { %v1661_v14 = vadd.f32 %v1660_v57, %v1646_v2  ;;  %v1624_v15 = vadd.f32 %v1623_v1, %v1577_v63  ;;  %v2422_v16 = vadd.f32 %v2421_v10, %v2420_v4  ;;  %v2423_v39 = vpop.f32.mrb[46].mxu1  ;;  %v2360_v11 = vpop.f32.mrb[47].mxu0 }
 0x162   : > { %2188 = vst [vmem:[%s2788_s29 + $0x10] sm:$0xff] %v2160_v8   ;;  %v1485_v41 = vadd.f32 %v2358_v9, %v2762_v53  ;;  %v2361_v17 = vadd.f32 %v2360_v11, %v2359_v12  ;;  %v2424_v18 = vpop.f32.mrb[47].mxu1 }
 0x163   : > { %v1662_v20 = vadd.f32 %v1661_v14, %v1647_v7  ;;  %v2425_v22 = vadd.f32 %v2424_v18, %v2423_v39 }
 0x164   : > { %v1582_v23 = vadd.f32 %v2422_v16, %v1485_v41  ;;  %v1488_v13 = vadd.f32 %v2361_v17, %v2764_v55 }
 0x166   : > { %v1625_v24 = vadd.f32 %v1624_v15, %v1582_v23  ;;  %v1648_v26 = vmul.f32 %v1582_v23, %v1582_v23  ;;  %v1585_v28 = vadd.f32 %v2425_v22, %v1488_v13  ;;  %v2362_v29 = vpop.f32.mrb[48].mxu0 }
 0x167   : > { %v2426_v30 = vpop.f32.mrb[48].mxu1  ;;  %v2363_v31 = vpop.f32.mrb[49].mxu0 }
 0x168   : > { %v1663_v32 = vadd.f32 %v1662_v20, %v1648_v26  ;;  %v1626_v33 = vadd.f32 %v1625_v24, %v1585_v28  ;;  %v1649_v34 = vmul.f32 %v1585_v28, %v1585_v28  ;;  %v2165_v36 = vpack.c.bf16 %v1585_v28, %v1582_v23  ;;  %v2427_v38 = vpop.f32.mrb[49].mxu1  ;;  %v2365_v53 = vpop.f32.mrb[50].mxu0 }
 0x169   : > { %v2364_v40 = vadd.f32 %v2363_v31, %v2362_v29  ;;  %v2428_v42 = vadd.f32 %v2427_v38, %v2426_v30  ;;  %v2429_v43 = vpop.f32.mrb[50].mxu1  ;;  %v2366_v44 = vpop.f32.mrb[51].mxu0 }
 0x16a   : > { %v1664_v45 = vadd.f32 %v1663_v32, %v1649_v34  ;;  %2189 = vst [vmem:[%s2788_s29 + $0x18] sm:$0xff] %v2165_v36   ;;  %v2367_v55 = vadd.f32 %v2366_v44, %v2365_v53  ;;  %v2430_v46 = vpop.f32.mrb[51].mxu1 }
 0x16b   : > { %v1493_v47 = vadd.f32 %v2364_v40, %v2766_v3  ;;  %v2431_v48 = vadd.f32 %v2430_v46, %v2429_v43 }
 0x16c   : > { %v1496_v49 = vadd.f32 %v2367_v55, %v2768_v5 }
 0x16d   : > { %v1590_v25 = vadd.f32 %v2428_v42, %v1493_v47 }
 0x16e   : > { %v1593_v50 = vadd.f32 %v2431_v48, %v1496_v49  ;;  %v2368_v52 = vpop.f32.mrb[52].mxu0 }
 0x16f   : > { %v1627_v56 = vadd.f32 %v1626_v33, %v1590_v25  ;;  %v1650_v57 = vmul.f32 %v1590_v25, %v1590_v25  ;;  %v2432_v27 = vpop.f32.mrb[52].mxu1  ;;  %v2369_v58 = vpop.f32.mrb[53].mxu0 }
 0x170   : > { %v1651_v59 = vmul.f32 %v1593_v50, %v1593_v50  ;;  %v2170_v60 = vpack.c.bf16 %v1593_v50, %v1590_v25  ;;  %v2370_v61 = vadd.f32 %v2369_v58, %v2368_v52  ;;  %v2433_v62 = vpop.f32.mrb[53].mxu1  ;;  %v2371_v63 = vpop.f32.mrb[54].mxu0 }
 0x171   : > { %v1665_v0 = vadd.f32 %v1664_v45, %v1650_v57  ;;  %v1628_v1 = vadd.f32 %v1627_v56, %v1593_v50  ;;  %v2434_v2 = vadd.f32 %v2433_v62, %v2432_v27  ;;  %v2435_v3 = vpop.f32.mrb[54].mxu1  ;;  %v2372_v4 = vpop.f32.mrb[55].mxu0 }
 0x172   : > { %2190 = vst [vmem:[%s2788_s29 + $0x20] sm:$0xff] %v2170_v60   ;;  %v1501_v5 = vadd.f32 %v2370_v61, %v2770_v19  ;;  %v2373_v6 = vadd.f32 %v2372_v4, %v2371_v63  ;;  %v2436_v7 = vpop.f32.mrb[55].mxu1 }
 0x173   : > { %v1666_v8 = vadd.f32 %v1665_v0, %v1651_v59  ;;  %v2437_v9 = vadd.f32 %v2436_v7, %v2435_v3 }
 0x174   : > { %v1598_v10 = vadd.f32 %v2434_v2, %v1501_v5  ;;  %v1504_v12 = vadd.f32 %v2373_v6, %v2772_v21 }
 0x176   : > { %v1629_v14 = vadd.f32 %v1628_v1, %v1598_v10  ;;  %v1652_v15 = vmul.f32 %v1598_v10, %v1598_v10  ;;  %v1601_v16 = vadd.f32 %v2437_v9, %v1504_v12  ;;  %v2374_v39 = vpop.f32.mrb[56].mxu0 }
 0x177   : > { %v2438_v11 = vpop.f32.mrb[56].mxu1  ;;  %v2375_v41 = vpop.f32.mrb[57].mxu0 }
 0x178   : > { %v1667_v17 = vadd.f32 %v1666_v8, %v1652_v15  ;;  %v1630_v18 = vadd.f32 %v1629_v14, %v1601_v16  ;;  %v1653_v20 = vmul.f32 %v1601_v16, %v1601_v16  ;;  %v2175_v22 = vpack.c.bf16 %v1601_v16, %v1598_v10  ;;  %v2439_v23 = vpop.f32.mrb[57].mxu1  ;;  %v2377_v19 = vpop.f32.mrb[58].mxu0 }
 0x179   : > { %v2376_v13 = vadd.f32 %v2375_v41, %v2374_v39  ;;  %v2440_v24 = vadd.f32 %v2439_v23, %v2438_v11  ;;  %v2441_v26 = vpop.f32.mrb[58].mxu1  ;;  %v2378_v28 = vpop.f32.mrb[59].mxu0 }
 0x17a   : > { %v1668_v29 = vadd.f32 %v1667_v17, %v1653_v20  ;;  %2191 = vst [vmem:[%s2788_s29 + $0x28] sm:$0xff] %v2175_v22   ;;  %v2379_v21 = vadd.f32 %v2378_v28, %v2377_v19  ;;  %v2442_v30 = vpop.f32.mrb[59].mxu1 }
 0x17b   : > { %v1509_v31 = vadd.f32 %v2376_v13, %v2774_v35  ;;  %v2443_v32 = vadd.f32 %v2442_v30, %v2441_v26 }
 0x17c   : > { %v1512_v33 = vadd.f32 %v2379_v21, %v2776_v37 }
 0x17d   : > { %v1606_v34 = vadd.f32 %v2440_v24, %v1509_v31 }
 0x17e   : > { %v1609_v36 = vadd.f32 %v2443_v32, %v1512_v33  ;;  %v2380_v38 = vpop.f32.mrb[60].mxu0 }
 0x17f   : > { %v1631_v53 = vadd.f32 %v1630_v18, %v1606_v34  ;;  %v1654_v40 = vmul.f32 %v1606_v34, %v1606_v34  ;;  %v2444_v42 = vpop.f32.mrb[60].mxu1  ;;  %v2381_v43 = vpop.f32.mrb[61].mxu0 }
 0x180   : > { %v1655_v44 = vmul.f32 %v1609_v36, %v1609_v36  ;;  %v2180_v45 = vpack.c.bf16 %v1609_v36, %v1606_v34  ;;  %v2382_v55 = vadd.f32 %v2381_v43, %v2380_v38  ;;  %v2445_v46 = vpop.f32.mrb[61].mxu1  ;;  %v2383_v47 = vpop.f32.mrb[62].mxu0 }
 0x181   : > { %v1669_v48 = vadd.f32 %v1668_v29, %v1654_v40  ;;  %v1632_v49 = vadd.f32 %v1631_v53, %v1609_v36  ;;  %v2446_v25 = vadd.f32 %v2445_v46, %v2444_v42  ;;  %v2447_v35 = vpop.f32.mrb[62].mxu1  ;;  %v2384_v50 = vpop.f32.mrb[63].mxu0 }
 0x182   : > { %2192 = vst [vmem:[%s2788_s29 + $0x30] sm:$0xff] %v2180_v45   ;;  %v1517_v37 = vadd.f32 %v2382_v55, %v2778_v51  ;;  %v2385_v52 = vadd.f32 %v2384_v50, %v2383_v47  ;;  %v2448_v56 = vpop.f32.mrb[63].mxu1 }
 0x183   : > { %v1670_v57 = vadd.f32 %v1669_v48, %v1655_v44  ;;  %v2449_v27 = vadd.f32 %v2448_v56, %v2447_v35 }
 0x184   : > { %v1614_v58 = vadd.f32 %v2446_v25, %v1517_v37  ;;  %v1520_v59 = vadd.f32 %v2385_v52, %v2780_v54 }
 0x186   : > { %v1633_v60 = vadd.f32 %v1632_v49, %v1614_v58  ;;  %v1656_v61 = vmul.f32 %v1614_v58, %v1614_v58  ;;  %v1617_v62 = vadd.f32 %v2449_v27, %v1520_v59 }
 0x188   : > { %v1671_v63 = vadd.f32 %v1670_v57, %v1656_v61  ;;  %v1634_v0 = vadd.f32 %v1633_v60, %v1617_v62  ;;  %v1657_v1 = vmul.f32 %v1617_v62, %v1617_v62  ;;  %v2185_v2 = vpack.c.bf16 %v1617_v62, %v1614_v58 }
 0x18a   : > { %v1635_v3 = vrot.slane %v1634_v0, 4  ;;  %v1672_v4 = vadd.f32 %v1671_v63, %v1657_v1  ;;  %2193 = vst [vmem:[%s2788_s29 + $0x38] sm:$0xff] %v2185_v2  }
 0x18c   : > { %v1636_v51 = vadd.f32 %v1635_v3, %v1634_v0  ;;  %v1673_v5 = vrot.slane %v1672_v4, 4 }
 0x18e   : > { %v1637_v6 = vrot.slane %v1636_v51, 2  ;;  %v1674_v7 = vadd.f32 %v1673_v5, %v1672_v4 }
 0x190   : > { %v1638_v8 = vadd.f32 %v1637_v6, %v1636_v51  ;;  %v1675_v9 = vrot.slane %v1674_v7, 2 }
 0x192   : > { %v1639_v10 = vrot.slane %v1638_v8, 1  ;;  %v1676_v54 = vadd.f32 %v1675_v9, %v1674_v7 }
 0x194   : > { %v1640_v12 = vadd.f32 %v1639_v10, %v1638_v8  ;;  %v1677_v14 = vrot.slane %v1676_v54, 1 }
 0x196   : > { %1641 = vst [vmem:[%s325_s6] sm:$0x1] %v1640_v12  ;;  %v1678_v15 = vadd.f32 %v1677_v14, %v1676_v54 }
 0x198   : > { %1679 = vst [vmem:[%s334_s9] sm:$0x1] %v1678_v15 }
 0x199 PF: > { %s15_s17 = sadd.s32 1, %s2560_s17   ;;  %s2834_s15 = smov %s2556_s16 }
 0x19a   : > { %p12_p5 = scmp.ge.s32.totalorder %s15_s17, 6   ;;  %s2835_s16 = smov %s2837_s18 }
 0x19c   :  { %14 = sbr.rel (!%p12_p5) target bundleno = 2 (0x2), region = 85 }

// kernel: generator_forward.7
= control target key start
LH: loop header
LB: loop body
LE: loop exit
PB: predicated region body
PF: predicated region fallthrough
CT: control target
= control target key end

     0   :  { %s3316_s9 = smov 0   ;;  %s3318_s10 = smov 0   ;;  %s3590_s0 = inlined_call_operand.vmem [shape: bf16[4,512,512], index: 0, kind: input, shape index: {}]   ;;  %s3591_s1 = inlined_call_operand.vmem [shape: bf16[4,512,128], index: 1, kind: input, shape index: {}]   ;;  %s3592_s2 = inlined_call_operand.vmem [shape: bf16[4,512,128], index: 2, kind: output, shape index: {}]  }
   0x1   :  { %s3320_s11 = smov 0  }
   0x2 LB: > { %s31_s12 = sadd.s32 1, %s3294_s10  ;;  %p2344_p0 = scmp.ge.s32.totalorder %s3298_s11, 1  ;;  %s3298_s11 = sphi %s3320_s11, %s12_s11   ;;  %s3294_s10 = sphi %s3318_s10, %s3594_s10   ;;  %s3290_s9 = sphi %s3316_s9, %s3593_s9  }
   0x3   : > { %p33_p1 = scmp.ge.s32.totalorder %s31_s12, 4  ;;  %p158_p2 = scmp.lt.s32.totalorder %s3298_s11, 5 }
   0x5   : > { %s3596_s12 = smov (%p33_p1, %s31_s12), 0  ;;  %p159_p3 = pnand %p2344_p0, %p158_p2 }
   0x6   : > { %p201_p4 = scmp.lt.s32.totalorder (!%p159_p3), %s3290_s9, 3  ;;  %v3300_v0 = vmov (!%p159_p3), 0  }
   0x7   : > { %162 = sbr.rel (%p159_p3) target bundleno = 560 (0x230), region = 28  ;;  %1257 = vmatprep.subr.bf16.mxu1 (!%p159_p3), %v3300_v0  ;;  %1546 = vmatprep.subr.bf16.mxu0 (!%p159_p3), %v3300_v0 }
   0xe   : > { %s3598_s9 = smov (!%p201_p4, %s3290_s9), 3 }
   0xf   : > { %s2578_s13 = sshll.u32 %s3598_s9, 8  ;;  %s2577_s17 = sshll.u32 %s3598_s9, 10 }
  0x10   : > { %s3344_s16 = scalar_lea.vmem %s3591_s1, %s2578_s13  ;;  %s3380_s20 = scalar_lea.vmem %s3590_s0, %s2577_s17 }
  0x11   : > { %v2924_v1 = vld [vmem:[%s3344_s16] sm:$0xff]   ;;  %v2926_v3 = vld [vmem:[%s3344_s16 + $0x8] sm:$0xff]   ;;  %v2928_v5 = vld [vmem:[%s3344_s16 + $0x10] sm:$0xff]   ;;  %s3537_s23 = scalar_lea.vmem %s3592_s2, %s2578_s13 }
  0x12   : > { %v2925_v2 = vld [vmem:[%s3344_s16 + $0x80] sm:$0xff]   ;;  %1258 = vmatpush1.bf16.msra.mxu1 %v2924_v1  ;;  %v2927_v4 = vld [vmem:[%s3344_s16 + $0x88] sm:$0xff]   ;;  %v2929_v6 = vld [vmem:[%s3344_s16 + $0x90] sm:$0xff]  }
  0x13   : > { %1547 = vmatpush1.bf16.msra.mxu0 %v2925_v2  ;;  %1259 = vmatprep.subr.bf16.mxu1 %v3300_v0  ;;  %v2930_v7 = vld [vmem:[%s3344_s16 + $0x18] sm:$0xff]   ;;  %v2932_v9 = vld [vmem:[%s3344_s16 + $0x20] sm:$0xff]   ;;  %v2934_v11 = vld [vmem:[%s3344_s16 + $0x28] sm:$0xff]  }
  0x14   : > { %1548 = vmatprep.subr.bf16.mxu0 %v3300_v0  ;;  %v2931_v8 = vld [vmem:[%s3344_s16 + $0x98] sm:$0xff]   ;;  %v2933_v10 = vld [vmem:[%s3344_s16 + $0xa0] sm:$0xff]   ;;  %v2935_v12 = vld [vmem:[%s3344_s16 + $0xa8] sm:$0xff]  }
  0x15   : > { %v2936_v13 = vld [vmem:[%s3344_s16 + $0x30] sm:$0xff]   ;;  %v2938_v15 = vld [vmem:[%s3344_s16 + $0x38] sm:$0xff]   ;;  %v2940_v17 = vld [vmem:[%s3344_s16 + $0x40] sm:$0xff]  }
  0x16   : > { %1260 = vmatpush1.bf16.msra.mxu1 %v2926_v3  ;;  %v2937_v14 = vld [vmem:[%s3344_s16 + $0xb0] sm:$0xff]   ;;  %v2939_v16 = vld [vmem:[%s3344_s16 + $0xb8] sm:$0xff]   ;;  %v2941_v18 = vld [vmem:[%s3344_s16 + $0xc0] sm:$0xff]  }
  0x17   : > { %1549 = vmatpush1.bf16.msra.mxu0 %v2927_v4  ;;  %1261 = vmatprep.subr.bf16.mxu1 %v3300_v0  ;;  %v2958_v19 = vld [vmem:[%s3380_s20 + $0x4] ss:$16 sps:$4 sm:$0xff]   ;;  %v2942_v20 = vld [vmem:[%s3344_s16 + $0x48] sm:$0xff]   ;;  %v2946_v25 = vld [vmem:[%s3344_s16 + $0x58] sm:$0xff]  }
  0x18   : > { %1550 = vmatprep.subr.bf16.mxu0 %v3300_v0  ;;  %v2961_v21 = vld [vmem:[%s3380_s20 + $0xc] ss:$16 sps:$4 sm:$0xff]   ;;  %1289 = vmatprep.mubr.bf16.mxu1 %v2958_v19  ;;  %v2944_v23 = vld [vmem:[%s3344_s16 + $0x50] sm:$0xff]   ;;  %v2948_v27 = vld [vmem:[%s3344_s16 + $0x60] sm:$0xff]  }
  0x19   : > { %v2943_v22 = vld [vmem:[%s3344_s16 + $0xc8] sm:$0xff]   ;;  %1578 = vmatprep.mubr.bf16.mxu0 %v2961_v21  ;;  %v2945_v24 = vld [vmem:[%s3344_s16 + $0xd0] sm:$0xff]   ;;  %v2947_v26 = vld [vmem:[%s3344_s16 + $0xd8] sm:$0xff]  }
  0x1a   : > { %1262 = vmatpush1.bf16.msra.mxu1 %v2928_v5  ;;  %v2949_v28 = vld [vmem:[%s3344_s16 + $0xe0] sm:$0xff]   ;;  %v2950_v29 = vld [vmem:[%s3344_s16 + $0x68] sm:$0xff]   ;;  %v2952_v31 = vld [vmem:[%s3344_s16 + $0x70] sm:$0xff]  }
  0x1b   : > { %1551 = vmatpush1.bf16.msra.mxu0 %v2929_v6  ;;  %1263 = vmatprep.subr.bf16.mxu1 %v3300_v0  ;;  %v2951_v30 = vld [vmem:[%s3344_s16 + $0xe8] sm:$0xff]   ;;  %v2953_v32 = vld [vmem:[%s3344_s16 + $0xf0] sm:$0xff]   ;;  %v2954_v33 = vld [vmem:[%s3344_s16 + $0x78] sm:$0xff]  }
  0x1c   : > { %1552 = vmatprep.subr.bf16.mxu0 %v3300_v0  ;;  %v2955_v34 = vld [vmem:[%s3344_s16 + $0xf8] sm:$0xff]   ;;  %v2956_v35 = vld [vmem:[%s3380_s20] ss:$16 sps:$4 sm:$0xff]   ;;  %v2962_v37 = vld [vmem:[%s3380_s20 + $0x24] ss:$16 sps:$4 sm:$0xff]  }
  0x1d   : > { %v2959_v36 = vld [vmem:[%s3380_s20 + $0x8] ss:$16 sps:$4 sm:$0xff]   ;;  %v2964_v38 = vld [vmem:[%s3380_s20 + $0x2c] ss:$16 sps:$4 sm:$0xff]   ;;  %v2966_v39 = vld [vmem:[%s3380_s20 + $0x20] ss:$16 sps:$4 sm:$0xff]  }
  0x1e   : > { %1264 = vmatpush1.bf16.msra.mxu1 %v2930_v7  ;;  %v2967_v40 = vld [vmem:[%s3380_s20 + $0x28] ss:$16 sps:$4 sm:$0xff]   ;;  %v2968_v41 = vld [vmem:[%s3380_s20 + $0x44] ss:$16 sps:$4 sm:$0xff]   ;;  %v2970_v42 = vld [vmem:[%s3380_s20 + $0x4c] ss:$16 sps:$4 sm:$0xff]  }
  0x1f   : > { %1553 = vmatpush1.bf16.msra.mxu0 %v2931_v8  ;;  %1265 = vmatprep.subr.bf16.mxu1 %v3300_v0  ;;  %v2972_v43 = vld [vmem:[%s3380_s20 + $0x40] ss:$16 sps:$4 sm:$0xff]   ;;  %v2973_v44 = vld [vmem:[%s3380_s20 + $0x48] ss:$16 sps:$4 sm:$0xff]   ;;  %v2974_v45 = vld [vmem:[%s3380_s20 + $0x64] ss:$16 sps:$4 sm:$0xff]  }
  0x20   : > { %1554 = vmatprep.subr.bf16.mxu0 %v3300_v0  ;;  %v2976_v46 = vld [vmem:[%s3380_s20 + $0x6c] ss:$16 sps:$4 sm:$0xff]   ;;  %v2978_v47 = vld [vmem:[%s3380_s20 + $0x60] ss:$16 sps:$4 sm:$0xff]   ;;  %v2979_v48 = vld [vmem:[%s3380_s20 + $0x68] ss:$16 sps:$4 sm:$0xff]  }
  0x21   : > { %v2980_v49 = vld [vmem:[%s3380_s20 + $0x84] ss:$16 sps:$4 sm:$0xff]   ;;  %v2982_v50 = vld [vmem:[%s3380_s20 + $0x8c] ss:$16 sps:$4 sm:$0xff]   ;;  %v2984_v51 = vld [vmem:[%s3380_s20 + $0x80] ss:$16 sps:$4 sm:$0xff]  }
  0x22   : > { %1266 = vmatpush1.bf16.msra.mxu1 %v2932_v9  ;;  %v2985_v52 = vld [vmem:[%s3380_s20 + $0x88] ss:$16 sps:$4 sm:$0xff]   ;;  %v2986_v53 = vld [vmem:[%s3380_s20 + $0xa4] ss:$16 sps:$4 sm:$0xff]   ;;  %v2988_v54 = vld [vmem:[%s3380_s20 + $0xac] ss:$16 sps:$4 sm:$0xff]  }
  0x23   : > { %1555 = vmatpush1.bf16.msra.mxu0 %v2933_v10  ;;  %1267 = vmatprep.subr.bf16.mxu1 %v3300_v0  ;;  %v2990_v55 = vld [vmem:[%s3380_s20 + $0xa0] ss:$16 sps:$4 sm:$0xff]   ;;  %v2991_v56 = vld [vmem:[%s3380_s20 + $0xa8] ss:$16 sps:$4 sm:$0xff]   ;;  %v2992_v57 = vld [vmem:[%s3380_s20 + $0xc4] ss:$16 sps:$4 sm:$0xff]  }
  0x24   : > { %1556 = vmatprep.subr.bf16.mxu0 %v3300_v0  ;;  %v2994_v58 = vld [vmem:[%s3380_s20 + $0xcc] ss:$16 sps:$4 sm:$0xff]   ;;  %v2996_v59 = vld [vmem:[%s3380_s20 + $0xc0] ss:$16 sps:$4 sm:$0xff]   ;;  %v2997_v60 = vld [vmem:[%s3380_s20 + $0xc8] ss:$16 sps:$4 sm:$0xff]  }
  0x25   : > { %v2998_v61 = vld [vmem:[%s3380_s20 + $0xe4] ss:$16 sps:$4 sm:$0xff]   ;;  %v3000_v62 = vld [vmem:[%s3380_s20 + $0xec] ss:$16 sps:$4 sm:$0xff]   ;;  %v3002_v63 = vld [vmem:[%s3380_s20 + $0xe0] ss:$16 sps:$4 sm:$0xff]  }
  0x26   : > { %1268 = vmatpush1.bf16.msra.mxu1 %v2934_v11  ;;  %v3004_v1 = vld [vmem:[%s3380_s20 + $0x104] ss:$16 sps:$4 sm:$0xff]   ;;  %v3006_v2 = vld [vmem:[%s3380_s20 + $0x10c] ss:$16 sps:$4 sm:$0xff]   ;;  %v3008_v3 = vld [vmem:[%s3380_s20 + $0x100] ss:$16 sps:$4 sm:$0xff]  }
  0x27   : > { %1557 = vmatpush1.bf16.msra.mxu0 %v2935_v12  ;;  %1269 = vmatprep.subr.bf16.mxu1 %v3300_v0  ;;  %v3009_v4 = vld [vmem:[%s3380_s20 + $0x108] ss:$16 sps:$4 sm:$0xff]   ;;  %v3010_v5 = vld [vmem:[%s3380_s20 + $0x124] ss:$16 sps:$4 sm:$0xff]   ;;  %v3012_v6 = vld [vmem:[%s3380_s20 + $0x12c] ss:$16 sps:$4 sm:$0xff]  }
  0x28   : > { %1558 = vmatprep.subr.bf16.mxu0 %v3300_v0  ;;  %v3014_v7 = vld [vmem:[%s3380_s20 + $0x120] ss:$16 sps:$4 sm:$0xff]   ;;  %v3015_v8 = vld [vmem:[%s3380_s20 + $0x128] ss:$16 sps:$4 sm:$0xff]   ;;  %v3016_v9 = vld [vmem:[%s3380_s20 + $0x144] ss:$16 sps:$4 sm:$0xff]  }
  0x29   : > { %v3018_v10 = vld [vmem:[%s3380_s20 + $0x14c] ss:$16 sps:$4 sm:$0xff]   ;;  %v3020_v11 = vld [vmem:[%s3380_s20 + $0x140] ss:$16 sps:$4 sm:$0xff]   ;;  %v3021_v12 = vld [vmem:[%s3380_s20 + $0x148] ss:$16 sps:$4 sm:$0xff]  }
  0x2a   : > { %1270 = vmatpush1.bf16.msra.mxu1 %v2936_v13  ;;  %v3022_v13 = vld [vmem:[%s3380_s20 + $0x164] ss:$16 sps:$4 sm:$0xff]   ;;  %v3032_v19 = vld [vmem:[%s3380_s20 + $0x180] ss:$16 sps:$4 sm:$0xff]  }
  0x2b   : > { %1559 = vmatpush1.bf16.msra.mxu0 %v2937_v14  ;;  %1271 = vmatprep.subr.bf16.mxu1 %v3300_v0  ;;  %v3024_v14 = vld [vmem:[%s3380_s20 + $0x16c] ss:$16 sps:$4 sm:$0xff]   ;;  %v3034_v21 = vld [vmem:[%s3380_s20 + $0x1a4] ss:$16 sps:$4 sm:$0xff]  }
  0x2c   : > { %1560 = vmatprep.subr.bf16.mxu0 %v3300_v0 }
  0x2e   : > { %1272 = vmatpush1.bf16.msra.mxu1 %v2938_v15  ;;  %v3026_v15 = vld [vmem:[%s3380_s20 + $0x160] ss:$16 sps:$4 sm:$0xff]  }
  0x2f   : > { %1561 = vmatpush1.bf16.msra.mxu0 %v2939_v16  ;;  %1273 = vmatprep.subr.bf16.mxu1 %v3300_v0  ;;  %v3027_v16 = vld [vmem:[%s3380_s20 + $0x168] ss:$16 sps:$4 sm:$0xff]  }
  0x30   : > { %1562 = vmatprep.subr.bf16.mxu0 %v3300_v0 }
  0x32   : > { %1274 = vmatpush1.bf16.msra.mxu1 %v2940_v17  ;;  %v3028_v17 = vld [vmem:[%s3380_s20 + $0x184] ss:$16 sps:$4 sm:$0xff]  }
  0x33   : > { %1563 = vmatpush1.bf16.msra.mxu0 %v2941_v18  ;;  %1275 = vmatprep.subr.bf16.mxu1 %v3300_v0  ;;  %v3030_v18 = vld [vmem:[%s3380_s20 + $0x18c] ss:$16 sps:$4 sm:$0xff]  }
  0x34   : > { %1564 = vmatprep.subr.bf16.mxu0 %v3300_v0 }
  0x36   : > { %1276 = vmatpush1.bf16.msra.mxu1 %v2942_v20  ;;  %v3033_v20 = vld [vmem:[%s3380_s20 + $0x188] ss:$16 sps:$4 sm:$0xff]  }
  0x37   : > { %1565 = vmatpush1.bf16.msra.mxu0 %v2943_v22  ;;  %1277 = vmatprep.subr.bf16.mxu1 %v3300_v0  ;;  %v3036_v22 = vld [vmem:[%s3380_s20 + $0x1ac] ss:$16 sps:$4 sm:$0xff]  }
  0x38   : > { %1566 = vmatprep.subr.bf16.mxu0 %v3300_v0 }
  0x3a   : > { %1278 = vmatpush1.bf16.msra.mxu1 %v2944_v23  ;;  %v3038_v23 = vld [vmem:[%s3380_s20 + $0x1a0] ss:$16 sps:$4 sm:$0xff]  }
  0x3b   : > { %1567 = vmatpush1.bf16.msra.mxu0 %v2945_v24  ;;  %1279 = vmatprep.subr.bf16.mxu1 %v3300_v0  ;;  %v3039_v24 = vld [vmem:[%s3380_s20 + $0x1a8] ss:$16 sps:$4 sm:$0xff]  }
  0x3c   : > { %1568 = vmatprep.subr.bf16.mxu0 %v3300_v0 }
  0x3e   : > { %1280 = vmatpush1.bf16.msra.mxu1 %v2946_v25  ;;  %v3040_v25 = vld [vmem:[%s3380_s20 + $0x1c4] ss:$16 sps:$4 sm:$0xff]  }
  0x3f   : > { %1569 = vmatpush1.bf16.msra.mxu0 %v2947_v26  ;;  %1281 = vmatprep.subr.bf16.mxu1 %v3300_v0  ;;  %v3042_v26 = vld [vmem:[%s3380_s20 + $0x1cc] ss:$16 sps:$4 sm:$0xff]  }
  0x40   : > { %1570 = vmatprep.subr.bf16.mxu0 %v3300_v0 }
  0x42   : > { %1282 = vmatpush1.bf16.msra.mxu1 %v2948_v27  ;;  %v3044_v27 = vld [vmem:[%s3380_s20 + $0x1c0] ss:$16 sps:$4 sm:$0xff]  }
  0x43   : > { %1571 = vmatpush1.bf16.msra.mxu0 %v2949_v28  ;;  %1283 = vmatprep.subr.bf16.mxu1 %v3300_v0  ;;  %v3045_v28 = vld [vmem:[%s3380_s20 + $0x1c8] ss:$16 sps:$4 sm:$0xff]  }
  0x44   : > { %1572 = vmatprep.subr.bf16.mxu0 %v3300_v0 }
  0x46   : > { %1284 = vmatpush1.bf16.msra.mxu1 %v2950_v29  ;;  %v3046_v29 = vld [vmem:[%s3380_s20 + $0x1e4] ss:$16 sps:$4 sm:$0xff]  }
  0x47   : > { %1573 = vmatpush1.bf16.msra.mxu0 %v2951_v30  ;;  %1285 = vmatprep.subr.bf16.mxu1 %v3300_v0  ;;  %v3048_v30 = vld [vmem:[%s3380_s20 + $0x1ec] ss:$16 sps:$4 sm:$0xff]  }
  0x48   : > { %1574 = vmatprep.subr.bf16.mxu0 %v3300_v0 }
  0x4a   : > { %1286 = vmatpush1.bf16.msra.mxu1 %v2952_v31  ;;  %v3050_v31 = vld [vmem:[%s3380_s20 + $0x1e0] ss:$16 sps:$4 sm:$0xff]  }
  0x4b   : > { %1575 = vmatpush1.bf16.msra.mxu0 %v2953_v32  ;;  %1287 = vmatprep.subr.bf16.mxu1 %v3300_v0  ;;  %v3051_v32 = vld [vmem:[%s3380_s20 + $0x1e8] ss:$16 sps:$4 sm:$0xff]  }
  0x4c   : > { %1576 = vmatprep.subr.bf16.mxu0 %v3300_v0  ;;  %v3003_v0 = vld [vmem:[%s3380_s20 + $0xe8] ss:$16 sps:$4 sm:$0xff]  }
  0x4e   : > { %1288 = vmatpush1.bf16.msra.mxu1 %v2954_v33  ;;  %v3052_v33 = vld [vmem:[%s3380_s20 + $0x204] ss:$16 sps:$4 sm:$0xff]  }
  0x4f   : > { %1577 = vmatpush1.bf16.msra.mxu0 %v2955_v34  ;;  %v3054_v34 = vld [vmem:[%s3380_s20 + $0x20c] ss:$16 sps:$4 sm:$0xff]  }
  0x51   : > { %1290 = vmatmul.mubr.bf16.vlgmr.msra.gmra.mrb[0].mxu1 %v2956_v35  ;;  %v3056_v35 = vld [vmem:[%s3380_s20 + $0x200] ss:$16 sps:$4 sm:$0xff]  }
  0x52   : > { %1579 = vmatmul.mubr.bf16.vlgmr.msra.gmra.mrb[0].mxu0 %v2959_v36  ;;  %1297 = vmatprep.mubr.bf16.mxu1 %v2962_v37  ;;  %v3057_v36 = vld [vmem:[%s3380_s20 + $0x208] ss:$16 sps:$4 sm:$0xff]   ;;  %v3058_v37 = vld [vmem:[%s3380_s20 + $0x224] ss:$16 sps:$4 sm:$0xff]  }
  0x53   : > { %1586 = vmatprep.mubr.bf16.mxu0 %v2964_v38  ;;  %v3060_v38 = vld [vmem:[%s3380_s20 + $0x22c] ss:$16 sps:$4 sm:$0xff]  }
  0x59   : > { %1298 = vmatmul.mubr.bf16.gmra.mrb[4].mxu1 %v2966_v39  ;;  %v3062_v39 = vld [vmem:[%s3380_s20 + $0x220] ss:$16 sps:$4 sm:$0xff]  }
  0x5a   : > { %1587 = vmatmul.mubr.bf16.gmra.mrb[4].mxu0 %v2967_v40  ;;  %1305 = vmatprep.mubr.bf16.mxu1 %v2968_v41  ;;  %v3063_v40 = vld [vmem:[%s3380_s20 + $0x228] ss:$16 sps:$4 sm:$0xff]   ;;  %v3064_v41 = vld [vmem:[%s3380_s20 + $0x244] ss:$16 sps:$4 sm:$0xff]  }
  0x5b   : > { %1594 = vmatprep.mubr.bf16.mxu0 %v2970_v42  ;;  %v3066_v42 = vld [vmem:[%s3380_s20 + $0x24c] ss:$16 sps:$4 sm:$0xff]  }
  0x61   : > { %1306 = vmatmul.mubr.bf16.gmra.mrb[8].mxu1 %v2972_v43  ;;  %v3068_v43 = vld [vmem:[%s3380_s20 + $0x240] ss:$16 sps:$4 sm:$0xff]  }
  0x62   : > { %1595 = vmatmul.mubr.bf16.gmra.mrb[8].mxu0 %v2973_v44  ;;  %1313 = vmatprep.mubr.bf16.mxu1 %v2974_v45  ;;  %v3069_v44 = vld [vmem:[%s3380_s20 + $0x248] ss:$16 sps:$4 sm:$0xff]   ;;  %v3070_v45 = vld [vmem:[%s3380_s20 + $0x264] ss:$16 sps:$4 sm:$0xff]  }
  0x63   : > { %1602 = vmatprep.mubr.bf16.mxu0 %v2976_v46  ;;  %v3072_v46 = vld [vmem:[%s3380_s20 + $0x26c] ss:$16 sps:$4 sm:$0xff]  }
  0x69   : > { %1314 = vmatmul.mubr.bf16.gmra.mrb[12].mxu1 %v2978_v47  ;;  %v3074_v47 = vld [vmem:[%s3380_s20 + $0x260] ss:$16 sps:$4 sm:$0xff]  }
  0x6a   : > { %1603 = vmatmul.mubr.bf16.gmra.mrb[12].mxu0 %v2979_v48  ;;  %1321 = vmatprep.mubr.bf16.mxu1 %v2980_v49  ;;  %v3075_v48 = vld [vmem:[%s3380_s20 + $0x268] ss:$16 sps:$4 sm:$0xff]   ;;  %v3076_v49 = vld [vmem:[%s3380_s20 + $0x284] ss:$16 sps:$4 sm:$0xff]  }
  0x6b   : > { %1610 = vmatprep.mubr.bf16.mxu0 %v2982_v50  ;;  %v3078_v50 = vld [vmem:[%s3380_s20 + $0x28c] ss:$16 sps:$4 sm:$0xff]  }
  0x71   : > { %1322 = vmatmul.mubr.bf16.gmra.mrb[16].mxu1 %v2984_v51  ;;  %v3080_v51 = vld [vmem:[%s3380_s20 + $0x280] ss:$16 sps:$4 sm:$0xff]  }
  0x72   : > { %1611 = vmatmul.mubr.bf16.gmra.mrb[16].mxu0 %v2985_v52  ;;  %1329 = vmatprep.mubr.bf16.mxu1 %v2986_v53  ;;  %v3081_v52 = vld [vmem:[%s3380_s20 + $0x288] ss:$16 sps:$4 sm:$0xff]   ;;  %v3082_v53 = vld [vmem:[%s3380_s20 + $0x2a4] ss:$16 sps:$4 sm:$0xff]  }
  0x73   : > { %1618 = vmatprep.mubr.bf16.mxu0 %v2988_v54  ;;  %v3084_v54 = vld [vmem:[%s3380_s20 + $0x2ac] ss:$16 sps:$4 sm:$0xff]  }
  0x79   : > { %1330 = vmatmul.mubr.bf16.gmra.mrb[20].mxu1 %v2990_v55  ;;  %v3086_v55 = vld [vmem:[%s3380_s20 + $0x2a0] ss:$16 sps:$4 sm:$0xff]  }
  0x7a   : > { %1619 = vmatmul.mubr.bf16.gmra.mrb[20].mxu0 %v2991_v56  ;;  %1337 = vmatprep.mubr.bf16.mxu1 %v2992_v57  ;;  %v3087_v56 = vld [vmem:[%s3380_s20 + $0x2a8] ss:$16 sps:$4 sm:$0xff]   ;;  %v3088_v57 = vld [vmem:[%s3380_s20 + $0x2c4] ss:$16 sps:$4 sm:$0xff]  }
  0x7b   : > { %1626 = vmatprep.mubr.bf16.mxu0 %v2994_v58  ;;  %v3090_v58 = vld [vmem:[%s3380_s20 + $0x2cc] ss:$16 sps:$4 sm:$0xff]  }
  0x81   : > { %1338 = vmatmul.mubr.bf16.gmra.mrb[24].mxu1 %v2996_v59  ;;  %v3092_v59 = vld [vmem:[%s3380_s20 + $0x2c0] ss:$16 sps:$4 sm:$0xff]  }
  0x82   : > { %1627 = vmatmul.mubr.bf16.gmra.mrb[24].mxu0 %v2997_v60  ;;  %1345 = vmatprep.mubr.bf16.mxu1 %v2998_v61  ;;  %v3093_v60 = vld [vmem:[%s3380_s20 + $0x2c8] ss:$16 sps:$4 sm:$0xff]   ;;  %v3094_v61 = vld [vmem:[%s3380_s20 + $0x2e4] ss:$16 sps:$4 sm:$0xff]  }
  0x83   : > { %1634 = vmatprep.mubr.bf16.mxu0 %v3000_v62  ;;  %v3096_v62 = vld [vmem:[%s3380_s20 + $0x2ec] ss:$16 sps:$4 sm:$0xff]  }
  0x89   : > { %1346 = vmatmul.mubr.bf16.gmra.mrb[28].mxu1 %v3002_v63  ;;  %v3098_v63 = vld [vmem:[%s3380_s20 + $0x2e0] ss:$16 sps:$4 sm:$0xff]  }
  0x8a   : > { %1635 = vmatmul.mubr.bf16.gmra.mrb[28].mxu0 %v3003_v0  ;;  %1353 = vmatprep.mubr.bf16.mxu1 %v3004_v1  ;;  %v3099_v0 = vld [vmem:[%s3380_s20 + $0x2e8] ss:$16 sps:$4 sm:$0xff]   ;;  %v3100_v1 = vld [vmem:[%s3380_s20 + $0x304] ss:$16 sps:$4 sm:$0xff]  }
  0x8b   : > { %1642 = vmatprep.mubr.bf16.mxu0 %v3006_v2  ;;  %v3102_v2 = vld [vmem:[%s3380_s20 + $0x30c] ss:$16 sps:$4 sm:$0xff]  }
  0x91   : > { %1354 = vmatmul.mubr.bf16.gmra.mrb[32].mxu1 %v3008_v3  ;;  %v3104_v3 = vld [vmem:[%s3380_s20 + $0x300] ss:$16 sps:$4 sm:$0xff]  }
  0x92   : > { %1643 = vmatmul.mubr.bf16.gmra.mrb[32].mxu0 %v3009_v4  ;;  %1361 = vmatprep.mubr.bf16.mxu1 %v3010_v5  ;;  %v3105_v4 = vld [vmem:[%s3380_s20 + $0x308] ss:$16 sps:$4 sm:$0xff]   ;;  %v3106_v5 = vld [vmem:[%s3380_s20 + $0x324] ss:$16 sps:$4 sm:$0xff]  }
  0x93   : > { %1650 = vmatprep.mubr.bf16.mxu0 %v3012_v6  ;;  %v3108_v6 = vld [vmem:[%s3380_s20 + $0x32c] ss:$16 sps:$4 sm:$0xff]  }
  0x99   : > { %1362 = vmatmul.mubr.bf16.gmra.mrb[36].mxu1 %v3014_v7  ;;  %v3110_v7 = vld [vmem:[%s3380_s20 + $0x320] ss:$16 sps:$4 sm:$0xff]  }
  0x9a   : > { %1651 = vmatmul.mubr.bf16.gmra.mrb[36].mxu0 %v3015_v8  ;;  %1369 = vmatprep.mubr.bf16.mxu1 %v3016_v9  ;;  %v3111_v8 = vld [vmem:[%s3380_s20 + $0x328] ss:$16 sps:$4 sm:$0xff]   ;;  %v3112_v9 = vld [vmem:[%s3380_s20 + $0x344] ss:$16 sps:$4 sm:$0xff]  }
  0x9b   : > { %1658 = vmatprep.mubr.bf16.mxu0 %v3018_v10  ;;  %v3114_v10 = vld [vmem:[%s3380_s20 + $0x34c] ss:$16 sps:$4 sm:$0xff]  }
  0xa1   : > { %1370 = vmatmul.mubr.bf16.gmra.mrb[40].mxu1 %v3020_v11  ;;  %v3116_v11 = vld [vmem:[%s3380_s20 + $0x340] ss:$16 sps:$4 sm:$0xff]  }
  0xa2   : > { %1659 = vmatmul.mubr.bf16.gmra.mrb[40].mxu0 %v3021_v12  ;;  %1377 = vmatprep.mubr.bf16.mxu1 %v3022_v13  ;;  %v3117_v12 = vld [vmem:[%s3380_s20 + $0x348] ss:$16 sps:$4 sm:$0xff]   ;;  %v3118_v13 = vld [vmem:[%s3380_s20 + $0x364] ss:$16 sps:$4 sm:$0xff]  }
  0xa3   : > { %1666 = vmatprep.mubr.bf16.mxu0 %v3024_v14  ;;  %v3120_v14 = vld [vmem:[%s3380_s20 + $0x36c] ss:$16 sps:$4 sm:$0xff]  }
  0xa9   : > { %1378 = vmatmul.mubr.bf16.gmra.mrb[44].mxu1 %v3026_v15 }
  0xaa   : > { %1667 = vmatmul.mubr.bf16.gmra.mrb[44].mxu0 %v3027_v16  ;;  %1385 = vmatprep.mubr.bf16.mxu1 %v3028_v17 }
  0xab   : > { %1674 = vmatprep.mubr.bf16.mxu0 %v3030_v18  ;;  %v3122_v18 = vld [vmem:[%s3380_s20 + $0x360] ss:$16 sps:$4 sm:$0xff]  }
  0xb1   : > { %1386 = vmatmul.mubr.bf16.gmra.mrb[48].mxu1 %v3032_v19 }
  0xb2   : > { %1675 = vmatmul.mubr.bf16.gmra.mrb[48].mxu0 %v3033_v20  ;;  %1393 = vmatprep.mubr.bf16.mxu1 %v3034_v21 }
  0xb3   : > { %1682 = vmatprep.mubr.bf16.mxu0 %v3036_v22  ;;  %v3123_v22 = vld [vmem:[%s3380_s20 + $0x368] ss:$16 sps:$4 sm:$0xff]  }
  0xb9   : > { %1394 = vmatmul.mubr.bf16.gmra.mrb[52].mxu1 %v3038_v23  ;;  %v3124_v23 = vld [vmem:[%s3380_s20 + $0x384] ss:$16 sps:$4 sm:$0xff]  }
  0xba   : > { %1683 = vmatmul.mubr.bf16.gmra.mrb[52].mxu0 %v3039_v24  ;;  %1401 = vmatprep.mubr.bf16.mxu1 %v3040_v25 }
  0xbb   : > { %1690 = vmatprep.mubr.bf16.mxu0 %v3042_v26  ;;  %v3126_v26 = vld [vmem:[%s3380_s20 + $0x38c] ss:$16 sps:$4 sm:$0xff]  }
  0xc1   : > { %1402 = vmatmul.mubr.bf16.gmra.mrb[56].mxu1 %v3044_v27 }
  0xc2   : > { %1691 = vmatmul.mubr.bf16.gmra.mrb[56].mxu0 %v3045_v28  ;;  %1409 = vmatprep.mubr.bf16.mxu1 %v3046_v29 }
  0xc3   : > { %1698 = vmatprep.mubr.bf16.mxu0 %v3048_v30 }
  0xc9   : > { %1410 = vmatmul.mubr.bf16.gmra.mrb[60].mxu1 %v3050_v31 }
  0xca   : > { %1699 = vmatmul.mubr.bf16.gmra.mrb[60].mxu0 %v3051_v32  ;;  %1417 = vmatprep.mubr.bf16.mxu1 %v3052_v33  ;;  %v3128_v32 = vld [vmem:[%s3380_s20 + $0x380] ss:$16 sps:$4 sm:$0xff]  }
  0xcb   : > { %1706 = vmatprep.mubr.bf16.mxu0 %v3054_v34 }
  0xd1   : > { %1418 = vmatmul.mubr.bf16.gmra.mrb[64].mxu1 %v3056_v35 }
  0xd2   : > { %1707 = vmatmul.mubr.bf16.gmra.mrb[64].mxu0 %v3057_v36  ;;  %1425 = vmatprep.mubr.bf16.mxu1 %v3058_v37  ;;  %v3129_v36 = vld [vmem:[%s3380_s20 + $0x388] ss:$16 sps:$4 sm:$0xff]   ;;  %v3130_v37 = vld [vmem:[%s3380_s20 + $0x3a4] ss:$16 sps:$4 sm:$0xff]  }
  0xd3   : > { %1714 = vmatprep.mubr.bf16.mxu0 %v3060_v38 }
  0xd9   : > { %1426 = vmatmul.mubr.bf16.gmra.mrb[68].mxu1 %v3062_v39 }
  0xda   : > { %1715 = vmatmul.mubr.bf16.gmra.mrb[68].mxu0 %v3063_v40  ;;  %1433 = vmatprep.mubr.bf16.mxu1 %v3064_v41  ;;  %v3132_v40 = vld [vmem:[%s3380_s20 + $0x3ac] ss:$16 sps:$4 sm:$0xff]  }
  0xdb   : > { %1722 = vmatprep.mubr.bf16.mxu0 %v3066_v42 }
  0xe1   : > { %1434 = vmatmul.mubr.bf16.gmra.mrb[72].mxu1 %v3068_v43 }
  0xe2   : > { %1723 = vmatmul.mubr.bf16.gmra.mrb[72].mxu0 %v3069_v44  ;;  %1441 = vmatprep.mubr.bf16.mxu1 %v3070_v45 }
  0xe3   : > { %1730 = vmatprep.mubr.bf16.mxu0 %v3072_v46 }
  0xe9   : > { %1442 = vmatmul.mubr.bf16.gmra.mrb[76].mxu1 %v3074_v47 }
  0xea   : > { %1731 = vmatmul.mubr.bf16.gmra.mrb[76].mxu0 %v3075_v48  ;;  %1449 = vmatprep.mubr.bf16.mxu1 %v3076_v49  ;;  %v3134_v49 = vld [vmem:[%s3380_s20 + $0x3a0] ss:$16 sps:$4 sm:$0xff]  }
  0xeb   : > { %1738 = vmatprep.mubr.bf16.mxu0 %v3078_v50 }
  0xf1   : > { %1450 = vmatmul.mubr.bf16.gmra.mrb[80].mxu1 %v3080_v51 }
  0xf2   : > { %1739 = vmatmul.mubr.bf16.gmra.mrb[80].mxu0 %v3081_v52  ;;  %1457 = vmatprep.mubr.bf16.mxu1 %v3082_v53  ;;  %v3135_v53 = vld [vmem:[%s3380_s20 + $0x3a8] ss:$16 sps:$4 sm:$0xff]  }
  0xf3   : > { %1746 = vmatprep.mubr.bf16.mxu0 %v3084_v54  ;;  %v3136_v54 = vld [vmem:[%s3380_s20 + $0x3c4] ss:$16 sps:$4 sm:$0xff]  }
  0xf9   : > { %1458 = vmatmul.mubr.bf16.gmra.mrb[84].mxu1 %v3086_v55 }
  0xfa   : > { %1747 = vmatmul.mubr.bf16.gmra.mrb[84].mxu0 %v3087_v56  ;;  %1465 = vmatprep.mubr.bf16.mxu1 %v3088_v57  ;;  %v3138_v57 = vld [vmem:[%s3380_s20 + $0x3cc] ss:$16 sps:$4 sm:$0xff]  }
  0xfb   : > { %1754 = vmatprep.mubr.bf16.mxu0 %v3090_v58 }
 0x101   : > { %1466 = vmatmul.mubr.bf16.gmra.mrb[88].mxu1 %v3092_v59 }
 0x102   : > { %1755 = vmatmul.mubr.bf16.gmra.mrb[88].mxu0 %v3093_v60  ;;  %1473 = vmatprep.mubr.bf16.mxu1 %v3094_v61 }
 0x103   : > { %1762 = vmatprep.mubr.bf16.mxu0 %v3096_v62 }
 0x109   : > { %1474 = vmatmul.mubr.bf16.gmra.mrb[92].mxu1 %v3098_v63 }
 0x10a   : > { %1763 = vmatmul.mubr.bf16.gmra.mrb[92].mxu0 %v3099_v0  ;;  %1481 = vmatprep.mubr.bf16.mxu1 %v3100_v1 }
 0x10b   : > { %1770 = vmatprep.mubr.bf16.mxu0 %v3102_v2  ;;  %v3140_v2 = vld [vmem:[%s3380_s20 + $0x3c0] ss:$16 sps:$4 sm:$0xff]  }
 0x111   : > { %1482 = vmatmul.mubr.bf16.gmra.mrb[96].mxu1 %v3104_v3 }
 0x112   : > { %1771 = vmatmul.mubr.bf16.gmra.mrb[96].mxu0 %v3105_v4  ;;  %1489 = vmatprep.mubr.bf16.mxu1 %v3106_v5 }
 0x113   : > { %1778 = vmatprep.mubr.bf16.mxu0 %v3108_v6  ;;  %v3141_v6 = vld [vmem:[%s3380_s20 + $0x3c8] ss:$16 sps:$4 sm:$0xff]  }
 0x119   : > { %1490 = vmatmul.mubr.bf16.gmra.mrb[100].mxu1 %v3110_v7  ;;  %v3142_v7 = vld [vmem:[%s3380_s20 + $0x3e4] ss:$16 sps:$4 sm:$0xff]  }
 0x11a   : > { %1779 = vmatmul.mubr.bf16.gmra.mrb[100].mxu0 %v3111_v8  ;;  %1497 = vmatprep.mubr.bf16.mxu1 %v3112_v9 }
 0x11b   : > { %1786 = vmatprep.mubr.bf16.mxu0 %v3114_v10  ;;  %v3144_v10 = vld [vmem:[%s3380_s20 + $0x3ec] ss:$16 sps:$4 sm:$0xff]  }
 0x121   : > { %1498 = vmatmul.mubr.bf16.gmra.mrb[104].mxu1 %v3116_v11 }
 0x122   : > { %1787 = vmatmul.mubr.bf16.gmra.mrb[104].mxu0 %v3117_v12  ;;  %1505 = vmatprep.mubr.bf16.mxu1 %v3118_v13 }
 0x123   : > { %1794 = vmatprep.mubr.bf16.mxu0 %v3120_v14 }
 0x124   : > { %v1291_v15 = vpop.f32.mrb[0].mxu1 }
 0x125   : > { %v1580_v16 = vpop.f32.mrb[0].mxu0  ;;  %v1293_v17 = vpop.f32.mrb[1].mxu1 }
 0x126   : > { %v1581_v19 = vadd.f32 %v1580_v16, %v1291_v15  ;;  %v1582_v20 = vpop.f32.mrb[1].mxu0  ;;  %v1294_v21 = vpop.f32.mrb[2].mxu1 }
 0x127   : > { %v1583_v24 = vpop.f32.mrb[2].mxu0  ;;  %v1296_v25 = vpop.f32.mrb[3].mxu1 }
 0x128   : > { %v1584_v27 = vadd.f32 %v1583_v24, %v1294_v21  ;;  %v1585_v28 = vpop.f32.mrb[3].mxu0  ;;  %3148 = vtanh.f32 %v1581_v19  ;;  %v3146_v19 = vld [vmem:[%s3380_s20 + $0x3e0] ss:$16 sps:$4 sm:$0xff]  }
 0x129   : > { %1506 = vmatmul.mubr.bf16.gmra.mrb[108].mxu1 %v3122_v18 }
 0x12a   : > { %3150 = vtanh.f32 %v1584_v27  ;;  %1795 = vmatmul.mubr.bf16.gmra.mrb[108].mxu0 %v3123_v22  ;;  %1513 = vmatprep.mubr.bf16.mxu1 %v3124_v23  ;;  %v3147_v23 = vld [vmem:[%s3380_s20 + $0x3e8] ss:$16 sps:$4 sm:$0xff]  }
 0x12b   : > { %1802 = vmatprep.mubr.bf16.mxu0 %v3126_v26 }
 0x12c   : > { %v1299_v29 = vpop.f32.mrb[4].mxu1 }
 0x12d   : > { %v1588_v30 = vpop.f32.mrb[4].mxu0  ;;  %v1301_v31 = vpop.f32.mrb[5].mxu1 }
 0x12e   : > { %v1589_v33 = vadd.f32 %v1588_v30, %v1299_v29  ;;  %v1590_v34 = vpop.f32.mrb[5].mxu0  ;;  %v1302_v35 = vpop.f32.mrb[6].mxu1 }
 0x12f   : > { %v1591_v38 = vpop.f32.mrb[6].mxu0  ;;  %v1304_v39 = vpop.f32.mrb[7].mxu1 }
 0x130   : > { %v1592_v41 = vadd.f32 %v1591_v38, %v1302_v35  ;;  %v1593_v42 = vpop.f32.mrb[7].mxu0  ;;  %3152 = vtanh.f32 %v1589_v33 }
 0x131   : > { %1514 = vmatmul.mubr.bf16.gmra.mrb[112].mxu1 %v3128_v32 }
 0x132   : > { %3154 = vtanh.f32 %v1592_v41  ;;  %1803 = vmatmul.mubr.bf16.gmra.mrb[112].mxu0 %v3129_v36  ;;  %1521 = vmatprep.mubr.bf16.mxu1 %v3130_v37  ;;  %v3149_v43 = vpop.eup %3148 }
 0x133   : > { %1810 = vmatprep.mubr.bf16.mxu0 %v3132_v40 }
 0x134   : > { %v3151_v44 = vpop.eup %3150  ;;  %v1307_v45 = vpop.f32.mrb[8].mxu1 }
 0x135   : > { %v2647_v46 = vpack.c.bf16 %v3151_v44, %v3149_v43  ;;  %v1596_v47 = vpop.f32.mrb[8].mxu0  ;;  %v1309_v48 = vpop.f32.mrb[9].mxu1 }
 0x136   : > { %v1597_v50 = vadd.f32 %v1596_v47, %v1307_v45  ;;  %v1598_v51 = vpop.f32.mrb[9].mxu0  ;;  %v1310_v52 = vpop.f32.mrb[10].mxu1 }
 0x137   : > { %2648 = vst [vmem:[%s3537_s23] sm:$0xff] %v2647_v46   ;;  %v1599_v55 = vpop.f32.mrb[10].mxu0  ;;  %v1312_v56 = vpop.f32.mrb[11].mxu1 }
 0x138   : > { %v1600_v58 = vadd.f32 %v1599_v55, %v1310_v52  ;;  %v1601_v59 = vpop.f32.mrb[11].mxu0  ;;  %3156 = vtanh.f32 %v1597_v50 }
 0x139   : > { %1522 = vmatmul.mubr.bf16.gmra.mrb[116].mxu1 %v3134_v49 }
 0x13a   : > { %3158 = vtanh.f32 %v1600_v58  ;;  %1811 = vmatmul.mubr.bf16.gmra.mrb[116].mxu0 %v3135_v53  ;;  %1529 = vmatprep.mubr.bf16.mxu1 %v3136_v54  ;;  %v3153_v60 = vpop.eup %3152 }
 0x13b   : > { %1818 = vmatprep.mubr.bf16.mxu0 %v3138_v57 }
 0x13c   : > { %v3155_v61 = vpop.eup %3154  ;;  %v1315_v62 = vpop.f32.mrb[12].mxu1 }
 0x13d   : > { %v2652_v63 = vpack.c.bf16 %v3155_v61, %v3153_v60  ;;  %v1604_v0 = vpop.f32.mrb[12].mxu0  ;;  %v1317_v1 = vpop.f32.mrb[13].mxu1 }
 0x13e   : > { %v1605_v3 = vadd.f32 %v1604_v0, %v1315_v62  ;;  %v1606_v4 = vpop.f32.mrb[13].mxu0  ;;  %v1318_v5 = vpop.f32.mrb[14].mxu1 }
 0x13f   : > { %2804 = vst [vmem:[%s3537_s23 + $0x8] sm:$0xff] %v2652_v63   ;;  %v1607_v8 = vpop.f32.mrb[14].mxu0  ;;  %v1320_v9 = vpop.f32.mrb[15].mxu1 }
 0x140   : > { %v1608_v11 = vadd.f32 %v1607_v8, %v1318_v5  ;;  %v1609_v12 = vpop.f32.mrb[15].mxu0  ;;  %3160 = vtanh.f32 %v1605_v3 }
 0x141   : > { %1530 = vmatmul.mubr.bf16.gmra.mrb[120].mxu1 %v3140_v2 }
 0x142   : > { %3162 = vtanh.f32 %v1608_v11  ;;  %1819 = vmatmul.mubr.bf16.gmra.mrb[120].mxu0 %v3141_v6  ;;  %1537 = vmatprep.mubr.bf16.mxu1 %v3142_v7  ;;  %v3157_v13 = vpop.eup %3156 }
 0x143   : > { %1826 = vmatprep.mubr.bf16.mxu0 %v3144_v10 }
 0x144   : > { %v3159_v14 = vpop.eup %3158  ;;  %v1323_v15 = vpop.f32.mrb[16].mxu1 }
 0x145   : > { %v2657_v16 = vpack.c.bf16 %v3159_v14, %v3157_v13  ;;  %v1612_v17 = vpop.f32.mrb[16].mxu0  ;;  %v1325_v18 = vpop.f32.mrb[17].mxu1 }
 0x146   : > { %v1613_v20 = vadd.f32 %v1612_v17, %v1323_v15  ;;  %v1614_v21 = vpop.f32.mrb[17].mxu0  ;;  %v1326_v22 = vpop.f32.mrb[18].mxu1 }
 0x147   : > { %2805 = vst [vmem:[%s3537_s23 + $0x10] sm:$0xff] %v2657_v16   ;;  %v1615_v24 = vpop.f32.mrb[18].mxu0  ;;  %v1328_v25 = vpop.f32.mrb[19].mxu1 }
 0x148   : > { %v1616_v26 = vadd.f32 %v1615_v24, %v1326_v22  ;;  %v1617_v27 = vpop.f32.mrb[19].mxu0  ;;  %3164 = vtanh.f32 %v1613_v20 }
 0x149   : > { %1538 = vmatmul.mubr.bf16.gmra.mrb[124].mxu1 %v3146_v19 }
 0x14a   : > { %3166 = vtanh.f32 %v1616_v26  ;;  %1827 = vmatmul.mubr.bf16.gmra.mrb[124].mxu0 %v3147_v23  ;;  %v3161_v28 = vpop.eup %3160 }
 0x14c   : > { %v3163_v29 = vpop.eup %3162  ;;  %v1331_v30 = vpop.f32.mrb[20].mxu1 }
 0x14d   : > { %v2662_v31 = vpack.c.bf16 %v3163_v29, %v3161_v28  ;;  %v1620_v32 = vpop.f32.mrb[20].mxu0  ;;  %v1333_v33 = vpop.f32.mrb[21].mxu1 }
 0x14e   : > { %v1621_v34 = vadd.f32 %v1620_v32, %v1331_v30  ;;  %v1622_v35 = vpop.f32.mrb[21].mxu0  ;;  %v1334_v36 = vpop.f32.mrb[22].mxu1 }
 0x14f   : > { %2806 = vst [vmem:[%s3537_s23 + $0x18] sm:$0xff] %v2662_v31   ;;  %v1623_v37 = vpop.f32.mrb[22].mxu0  ;;  %v1336_v38 = vpop.f32.mrb[23].mxu1 }
 0x150   : > { %v1624_v39 = vadd.f32 %v1623_v37, %v1334_v36  ;;  %v1625_v40 = vpop.f32.mrb[23].mxu0  ;;  %3168 = vtanh.f32 %v1621_v34 }
 0x152   : > { %3170 = vtanh.f32 %v1624_v39  ;;  %v3165_v41 = vpop.eup %3164 }
 0x154   : > { %v3167_v42 = vpop.eup %3166  ;;  %v1339_v43 = vpop.f32.mrb[24].mxu1 }
 0x155   : > { %v2667_v44 = vpack.c.bf16 %v3167_v42, %v3165_v41  ;;  %v1628_v45 = vpop.f32.mrb[24].mxu0  ;;  %v1341_v46 = vpop.f32.mrb[25].mxu1 }
 0x156   : > { %v1629_v47 = vadd.f32 %v1628_v45, %v1339_v43  ;;  %v1630_v48 = vpop.f32.mrb[25].mxu0  ;;  %v1342_v49 = vpop.f32.mrb[26].mxu1 }
 0x157   : > { %2807 = vst [vmem:[%s3537_s23 + $0x20] sm:$0xff] %v2667_v44   ;;  %v1631_v50 = vpop.f32.mrb[26].mxu0  ;;  %v1344_v51 = vpop.f32.mrb[27].mxu1 }
 0x158   : > { %v1632_v52 = vadd.f32 %v1631_v50, %v1342_v49  ;;  %v1633_v53 = vpop.f32.mrb[27].mxu0  ;;  %3172 = vtanh.f32 %v1629_v47 }
 0x15a   : > { %3174 = vtanh.f32 %v1632_v52  ;;  %v3169_v54 = vpop.eup %3168 }
 0x15c   : > { %v3171_v55 = vpop.eup %3170  ;;  %v1347_v56 = vpop.f32.mrb[28].mxu1 }
 0x15d   : > { %v2672_v57 = vpack.c.bf16 %v3171_v55, %v3169_v54  ;;  %v1636_v58 = vpop.f32.mrb[28].mxu0  ;;  %v1349_v59 = vpop.f32.mrb[29].mxu1 }
 0x15e   : > { %v1637_v60 = vadd.f32 %v1636_v58, %v1347_v56  ;;  %v1638_v61 = vpop.f32.mrb[29].mxu0  ;;  %v1350_v62 = vpop.f32.mrb[30].mxu1 }
 0x15f   : > { %2808 = vst [vmem:[%s3537_s23 + $0x28] sm:$0xff] %v2672_v57   ;;  %v1639_v63 = vpop.f32.mrb[30].mxu0  ;;  %v1352_v0 = vpop.f32.mrb[31].mxu1 }
 0x160   : > { %v1640_v1 = vadd.f32 %v1639_v63, %v1350_v62  ;;  %v1641_v2 = vpop.f32.mrb[31].mxu0  ;;  %3176 = vtanh.f32 %v1637_v60 }
 0x162   : > { %3178 = vtanh.f32 %v1640_v1  ;;  %v3173_v3 = vpop.eup %3172 }
 0x164   : > { %v3175_v4 = vpop.eup %3174  ;;  %v1355_v5 = vpop.f32.mrb[32].mxu1 }
 0x165   : > { %v2677_v6 = vpack.c.bf16 %v3175_v4, %v3173_v3  ;;  %v1644_v7 = vpop.f32.mrb[32].mxu0  ;;  %v1357_v8 = vpop.f32.mrb[33].mxu1 }
 0x166   : > { %v1645_v9 = vadd.f32 %v1644_v7, %v1355_v5  ;;  %v1646_v10 = vpop.f32.mrb[33].mxu0  ;;  %v1358_v11 = vpop.f32.mrb[34].mxu1 }
 0x167   : > { %2809 = vst [vmem:[%s3537_s23 + $0x30] sm:$0xff] %v2677_v6   ;;  %v1647_v12 = vpop.f32.mrb[34].mxu0  ;;  %v1360_v13 = vpop.f32.mrb[35].mxu1 }
 0x168   : > { %v1648_v14 = vadd.f32 %v1647_v12, %v1358_v11  ;;  %v1649_v15 = vpop.f32.mrb[35].mxu0  ;;  %3180 = vtanh.f32 %v1645_v9 }
 0x16a   : > { %3182 = vtanh.f32 %v1648_v14  ;;  %v3177_v16 = vpop.eup %3176 }
 0x16c   : > { %v3179_v17 = vpop.eup %3178  ;;  %v1363_v18 = vpop.f32.mrb[36].mxu1 }
 0x16d   : > { %v2682_v19 = vpack.c.bf16 %v3179_v17, %v3177_v16  ;;  %v1652_v20 = vpop.f32.mrb[36].mxu0  ;;  %v1365_v21 = vpop.f32.mrb[37].mxu1 }
 0x16e   : > { %v1653_v22 = vadd.f32 %v1652_v20, %v1363_v18  ;;  %v1654_v23 = vpop.f32.mrb[37].mxu0  ;;  %v1366_v24 = vpop.f32.mrb[38].mxu1 }
 0x16f   : > { %2810 = vst [vmem:[%s3537_s23 + $0x38] sm:$0xff] %v2682_v19   ;;  %v1655_v25 = vpop.f32.mrb[38].mxu0  ;;  %v1368_v26 = vpop.f32.mrb[39].mxu1 }
 0x170   : > { %v1656_v27 = vadd.f32 %v1655_v25, %v1366_v24  ;;  %v1657_v28 = vpop.f32.mrb[39].mxu0  ;;  %3184 = vtanh.f32 %v1653_v22 }
 0x172   : > { %3186 = vtanh.f32 %v1656_v27  ;;  %v3181_v29 = vpop.eup %3180 }
 0x174   : > { %v3183_v30 = vpop.eup %3182  ;;  %v1371_v31 = vpop.f32.mrb[40].mxu1 }
 0x175   : > { %v2687_v32 = vpack.c.bf16 %v3183_v30, %v3181_v29  ;;  %v1660_v33 = vpop.f32.mrb[40].mxu0  ;;  %v1373_v34 = vpop.f32.mrb[41].mxu1 }
 0x176   : > { %v1661_v35 = vadd.f32 %v1660_v33, %v1371_v31  ;;  %v1662_v36 = vpop.f32.mrb[41].mxu0  ;;  %v1374_v37 = vpop.f32.mrb[42].mxu1 }
 0x177   : > { %2811 = vst [vmem:[%s3537_s23 + $0x40] sm:$0xff] %v2687_v32   ;;  %v1663_v38 = vpop.f32.mrb[42].mxu0  ;;  %v1376_v39 = vpop.f32.mrb[43].mxu1 }
 0x178   : > { %v1664_v40 = vadd.f32 %v1663_v38, %v1374_v37  ;;  %v1665_v41 = vpop.f32.mrb[43].mxu0  ;;  %3188 = vtanh.f32 %v1661_v35 }
 0x17a   : > { %3190 = vtanh.f32 %v1664_v40  ;;  %v3185_v42 = vpop.eup %3184 }
 0x17c   : > { %v3187_v43 = vpop.eup %3186  ;;  %v1379_v44 = vpop.f32.mrb[44].mxu1 }
 0x17d   : > { %v2692_v45 = vpack.c.bf16 %v3187_v43, %v3185_v42  ;;  %v1668_v46 = vpop.f32.mrb[44].mxu0  ;;  %v1381_v47 = vpop.f32.mrb[45].mxu1 }
 0x17e   : > { %v1669_v48 = vadd.f32 %v1668_v46, %v1379_v44  ;;  %v1670_v49 = vpop.f32.mrb[45].mxu0  ;;  %v1382_v50 = vpop.f32.mrb[46].mxu1 }
 0x17f   : > { %2812 = vst [vmem:[%s3537_s23 + $0x48] sm:$0xff] %v2692_v45   ;;  %v1671_v51 = vpop.f32.mrb[46].mxu0  ;;  %v1384_v52 = vpop.f32.mrb[47].mxu1 }
 0x180   : > { %v1672_v53 = vadd.f32 %v1671_v51, %v1382_v50  ;;  %v1673_v54 = vpop.f32.mrb[47].mxu0  ;;  %3192 = vtanh.f32 %v1669_v48 }
 0x182   : > { %3194 = vtanh.f32 %v1672_v53  ;;  %v3189_v55 = vpop.eup %3188 }
 0x184   : > { %v3191_v56 = vpop.eup %3190  ;;  %v1387_v57 = vpop.f32.mrb[48].mxu1 }
 0x185   : > { %v2697_v58 = vpack.c.bf16 %v3191_v56, %v3189_v55  ;;  %v1676_v59 = vpop.f32.mrb[48].mxu0  ;;  %v1389_v60 = vpop.f32.mrb[49].mxu1 }
 0x186   : > { %v1677_v61 = vadd.f32 %v1676_v59, %v1387_v57  ;;  %v1678_v62 = vpop.f32.mrb[49].mxu0  ;;  %v1390_v63 = vpop.f32.mrb[50].mxu1 }
 0x187   : > { %2813 = vst [vmem:[%s3537_s23 + $0x50] sm:$0xff] %v2697_v58   ;;  %v1679_v0 = vpop.f32.mrb[50].mxu0  ;;  %v1392_v1 = vpop.f32.mrb[51].mxu1 }
 0x188   : > { %v1680_v2 = vadd.f32 %v1679_v0, %v1390_v63  ;;  %v1681_v3 = vpop.f32.mrb[51].mxu0  ;;  %3196 = vtanh.f32 %v1677_v61 }
 0x18a   : > { %3198 = vtanh.f32 %v1680_v2  ;;  %v3193_v4 = vpop.eup %3192 }
 0x18c   : > { %v3195_v5 = vpop.eup %3194  ;;  %v1395_v6 = vpop.f32.mrb[52].mxu1 }
 0x18d   : > { %v2702_v7 = vpack.c.bf16 %v3195_v5, %v3193_v4  ;;  %v1684_v8 = vpop.f32.mrb[52].mxu0  ;;  %v1397_v9 = vpop.f32.mrb[53].mxu1 }
 0x18e   : > { %v1685_v10 = vadd.f32 %v1684_v8, %v1395_v6  ;;  %v1686_v11 = vpop.f32.mrb[53].mxu0  ;;  %v1398_v12 = vpop.f32.mrb[54].mxu1 }
 0x18f   : > { %2814 = vst [vmem:[%s3537_s23 + $0x58] sm:$0xff] %v2702_v7   ;;  %v1687_v13 = vpop.f32.mrb[54].mxu0  ;;  %v1400_v14 = vpop.f32.mrb[55].mxu1 }
 0x190   : > { %v1688_v15 = vadd.f32 %v1687_v13, %v1398_v12  ;;  %v1689_v16 = vpop.f32.mrb[55].mxu0  ;;  %3200 = vtanh.f32 %v1685_v10 }
 0x192   : > { %3202 = vtanh.f32 %v1688_v15  ;;  %v3197_v17 = vpop.eup %3196 }
 0x194   : > { %v3199_v18 = vpop.eup %3198  ;;  %v1403_v19 = vpop.f32.mrb[56].mxu1 }
 0x195   : > { %v2707_v20 = vpack.c.bf16 %v3199_v18, %v3197_v17  ;;  %v1692_v21 = vpop.f32.mrb[56].mxu0  ;;  %v1405_v22 = vpop.f32.mrb[57].mxu1 }
 0x196   : > { %v1693_v23 = vadd.f32 %v1692_v21, %v1403_v19  ;;  %v1694_v24 = vpop.f32.mrb[57].mxu0  ;;  %v1406_v25 = vpop.f32.mrb[58].mxu1 }
 0x197   : > { %2815 = vst [vmem:[%s3537_s23 + $0x60] sm:$0xff] %v2707_v20   ;;  %v1695_v26 = vpop.f32.mrb[58].mxu0  ;;  %v1408_v27 = vpop.f32.mrb[59].mxu1 }
 0x198   : > { %v1696_v28 = vadd.f32 %v1695_v26, %v1406_v25  ;;  %v1697_v29 = vpop.f32.mrb[59].mxu0  ;;  %3204 = vtanh.f32 %v1693_v23 }
 0x19a   : > { %3206 = vtanh.f32 %v1696_v28  ;;  %v3201_v30 = vpop.eup %3200 }
 0x19c   : > { %v3203_v31 = vpop.eup %3202  ;;  %v1411_v32 = vpop.f32.mrb[60].mxu1 }
 0x19d   : > { %v2712_v33 = vpack.c.bf16 %v3203_v31, %v3201_v30  ;;  %v1700_v34 = vpop.f32.mrb[60].mxu0  ;;  %v1413_v35 = vpop.f32.mrb[61].mxu1 }
 0x19e   : > { %v1701_v36 = vadd.f32 %v1700_v34, %v1411_v32  ;;  %v1702_v37 = vpop.f32.mrb[61].mxu0  ;;  %v1414_v38 = vpop.f32.mrb[62].mxu1 }
 0x19f   : > { %2816 = vst [vmem:[%s3537_s23 + $0x68] sm:$0xff] %v2712_v33   ;;  %v1703_v39 = vpop.f32.mrb[62].mxu0  ;;  %v1416_v40 = vpop.f32.mrb[63].mxu1 }
 0x1a0   : > { %v1704_v41 = vadd.f32 %v1703_v39, %v1414_v38  ;;  %v1705_v42 = vpop.f32.mrb[63].mxu0  ;;  %3208 = vtanh.f32 %v1701_v36 }
 0x1a2   : > { %3210 = vtanh.f32 %v1704_v41  ;;  %v3205_v43 = vpop.eup %3204 }
 0x1a4   : > { %v3207_v44 = vpop.eup %3206  ;;  %v1419_v45 = vpop.f32.mrb[64].mxu1 }
 0x1a5   : > { %v2717_v46 = vpack.c.bf16 %v3207_v44, %v3205_v43  ;;  %v1708_v47 = vpop.f32.mrb[64].mxu0  ;;  %v1421_v48 = vpop.f32.mrb[65].mxu1 }
 0x1a6   : > { %v1709_v49 = vadd.f32 %v1708_v47, %v1419_v45  ;;  %v1710_v50 = vpop.f32.mrb[65].mxu0  ;;  %v1422_v51 = vpop.f32.mrb[66].mxu1 }
 0x1a7   : > { %2817 = vst [vmem:[%s3537_s23 + $0x70] sm:$0xff] %v2717_v46   ;;  %v1711_v52 = vpop.f32.mrb[66].mxu0  ;;  %v1424_v53 = vpop.f32.mrb[67].mxu1 }
 0x1a8   : > { %v1712_v54 = vadd.f32 %v1711_v52, %v1422_v51  ;;  %v1713_v55 = vpop.f32.mrb[67].mxu0  ;;  %3212 = vtanh.f32 %v1709_v49 }
 0x1aa   : > { %3214 = vtanh.f32 %v1712_v54  ;;  %v3209_v56 = vpop.eup %3208 }
 0x1ac   : > { %v3211_v57 = vpop.eup %3210  ;;  %v1427_v58 = vpop.f32.mrb[68].mxu1 }
 0x1ad   : > { %v2722_v59 = vpack.c.bf16 %v3211_v57, %v3209_v56  ;;  %v1716_v60 = vpop.f32.mrb[68].mxu0  ;;  %v1429_v61 = vpop.f32.mrb[69].mxu1 }
 0x1ae   : > { %v1717_v62 = vadd.f32 %v1716_v60, %v1427_v58  ;;  %v1718_v63 = vpop.f32.mrb[69].mxu0  ;;  %v1430_v0 = vpop.f32.mrb[70].mxu1 }
 0x1af   : > { %2818 = vst [vmem:[%s3537_s23 + $0x78] sm:$0xff] %v2722_v59   ;;  %v1719_v1 = vpop.f32.mrb[70].mxu0  ;;  %v1432_v2 = vpop.f32.mrb[71].mxu1 }
 0x1b0   : > { %v1720_v3 = vadd.f32 %v1719_v1, %v1430_v0  ;;  %v1721_v4 = vpop.f32.mrb[71].mxu0  ;;  %3216 = vtanh.f32 %v1717_v62 }
 0x1b2   : > { %3218 = vtanh.f32 %v1720_v3  ;;  %v3213_v5 = vpop.eup %3212 }
 0x1b4   : > { %v3215_v6 = vpop.eup %3214  ;;  %v1435_v7 = vpop.f32.mrb[72].mxu1 }
 0x1b5   : > { %v2727_v8 = vpack.c.bf16 %v3215_v6, %v3213_v5  ;;  %v1724_v9 = vpop.f32.mrb[72].mxu0  ;;  %v1437_v10 = vpop.f32.mrb[73].mxu1 }
 0x1b6   : > { %v1725_v11 = vadd.f32 %v1724_v9, %v1435_v7  ;;  %v1726_v12 = vpop.f32.mrb[73].mxu0  ;;  %v1438_v13 = vpop.f32.mrb[74].mxu1 }
 0x1b7   : > { %2819 = vst [vmem:[%s3537_s23 + $0x80] sm:$0xff] %v2727_v8   ;;  %v1727_v14 = vpop.f32.mrb[74].mxu0  ;;  %v1440_v15 = vpop.f32.mrb[75].mxu1 }
 0x1b8   : > { %v1728_v16 = vadd.f32 %v1727_v14, %v1438_v13  ;;  %v1729_v17 = vpop.f32.mrb[75].mxu0  ;;  %3220 = vtanh.f32 %v1725_v11 }
 0x1ba   : > { %3222 = vtanh.f32 %v1728_v16  ;;  %v3217_v18 = vpop.eup %3216 }
 0x1bc   : > { %v3219_v19 = vpop.eup %3218  ;;  %v1443_v20 = vpop.f32.mrb[76].mxu1 }
 0x1bd   : > { %v2732_v21 = vpack.c.bf16 %v3219_v19, %v3217_v18  ;;  %v1732_v22 = vpop.f32.mrb[76].mxu0  ;;  %v1445_v23 = vpop.f32.mrb[77].mxu1 }
 0x1be   : > { %v1733_v24 = vadd.f32 %v1732_v22, %v1443_v20  ;;  %v1734_v25 = vpop.f32.mrb[77].mxu0  ;;  %v1446_v26 = vpop.f32.mrb[78].mxu1 }
 0x1bf   : > { %2820 = vst [vmem:[%s3537_s23 + $0x88] sm:$0xff] %v2732_v21   ;;  %v1735_v27 = vpop.f32.mrb[78].mxu0  ;;  %v1448_v28 = vpop.f32.mrb[79].mxu1 }
 0x1c0   : > { %v1736_v29 = vadd.f32 %v1735_v27, %v1446_v26  ;;  %v1737_v30 = vpop.f32.mrb[79].mxu0  ;;  %3224 = vtanh.f32 %v1733_v24 }
 0x1c2   : > { %3226 = vtanh.f32 %v1736_v29  ;;  %v3221_v31 = vpop.eup %3220 }
 0x1c4   : > { %v3223_v32 = vpop.eup %3222  ;;  %v1451_v33 = vpop.f32.mrb[80].mxu1 }
 0x1c5   : > { %v2737_v34 = vpack.c.bf16 %v3223_v32, %v3221_v31  ;;  %v1740_v35 = vpop.f32.mrb[80].mxu0  ;;  %v1453_v36 = vpop.f32.mrb[81].mxu1 }
 0x1c6   : > { %v1741_v37 = vadd.f32 %v1740_v35, %v1451_v33  ;;  %v1742_v38 = vpop.f32.mrb[81].mxu0  ;;  %v1454_v39 = vpop.f32.mrb[82].mxu1 }
 0x1c7   : > { %2821 = vst [vmem:[%s3537_s23 + $0x90] sm:$0xff] %v2737_v34   ;;  %v1743_v40 = vpop.f32.mrb[82].mxu0  ;;  %v1456_v41 = vpop.f32.mrb[83].mxu1 }
 0x1c8   : > { %v1744_v42 = vadd.f32 %v1743_v40, %v1454_v39  ;;  %v1745_v43 = vpop.f32.mrb[83].mxu0  ;;  %3228 = vtanh.f32 %v1741_v37 }
 0x1ca   : > { %3230 = vtanh.f32 %v1744_v42  ;;  %v3225_v44 = vpop.eup %3224 }
 0x1cc   : > { %v3227_v45 = vpop.eup %3226  ;;  %v1459_v46 = vpop.f32.mrb[84].mxu1 }
 0x1cd   : > { %v2742_v47 = vpack.c.bf16 %v3227_v45, %v3225_v44  ;;  %v1748_v48 = vpop.f32.mrb[84].mxu0  ;;  %v1461_v49 = vpop.f32.mrb[85].mxu1 }
 0x1ce   : > { %v1749_v50 = vadd.f32 %v1748_v48, %v1459_v46  ;;  %v1750_v51 = vpop.f32.mrb[85].mxu0  ;;  %v1462_v52 = vpop.f32.mrb[86].mxu1 }
 0x1cf   : > { %2822 = vst [vmem:[%s3537_s23 + $0x98] sm:$0xff] %v2742_v47   ;;  %v1751_v53 = vpop.f32.mrb[86].mxu0  ;;  %v1464_v54 = vpop.f32.mrb[87].mxu1 }
 0x1d0   : > { %v1752_v55 = vadd.f32 %v1751_v53, %v1462_v52  ;;  %v1753_v56 = vpop.f32.mrb[87].mxu0  ;;  %3232 = vtanh.f32 %v1749_v50 }
 0x1d2   : > { %3234 = vtanh.f32 %v1752_v55  ;;  %v3229_v57 = vpop.eup %3228 }
 0x1d4   : > { %v3231_v58 = vpop.eup %3230  ;;  %v1467_v59 = vpop.f32.mrb[88].mxu1 }
 0x1d5   : > { %v2747_v60 = vpack.c.bf16 %v3231_v58, %v3229_v57  ;;  %v1756_v61 = vpop.f32.mrb[88].mxu0  ;;  %v1469_v62 = vpop.f32.mrb[89].mxu1 }
 0x1d6   : > { %v1757_v63 = vadd.f32 %v1756_v61, %v1467_v59  ;;  %v1758_v0 = vpop.f32.mrb[89].mxu0  ;;  %v1470_v1 = vpop.f32.mrb[90].mxu1 }
 0x1d7   : > { %2823 = vst [vmem:[%s3537_s23 + $0xa0] sm:$0xff] %v2747_v60   ;;  %v1759_v2 = vpop.f32.mrb[90].mxu0  ;;  %v1472_v3 = vpop.f32.mrb[91].mxu1 }
 0x1d8   : > { %v1760_v4 = vadd.f32 %v1759_v2, %v1470_v1  ;;  %v1761_v5 = vpop.f32.mrb[91].mxu0  ;;  %3236 = vtanh.f32 %v1757_v63 }
 0x1da   : > { %3238 = vtanh.f32 %v1760_v4  ;;  %v3233_v6 = vpop.eup %3232 }
 0x1dc   : > { %v3235_v7 = vpop.eup %3234  ;;  %v1475_v8 = vpop.f32.mrb[92].mxu1 }
 0x1dd   : > { %v2752_v9 = vpack.c.bf16 %v3235_v7, %v3233_v6  ;;  %v1764_v10 = vpop.f32.mrb[92].mxu0  ;;  %v1477_v11 = vpop.f32.mrb[93].mxu1 }
 0x1de   : > { %v1765_v12 = vadd.f32 %v1764_v10, %v1475_v8  ;;  %v1766_v13 = vpop.f32.mrb[93].mxu0  ;;  %v1478_v14 = vpop.f32.mrb[94].mxu1 }
 0x1df   : > { %2824 = vst [vmem:[%s3537_s23 + $0xa8] sm:$0xff] %v2752_v9   ;;  %v1767_v15 = vpop.f32.mrb[94].mxu0  ;;  %v1480_v16 = vpop.f32.mrb[95].mxu1 }
 0x1e0   : > { %v1768_v17 = vadd.f32 %v1767_v15, %v1478_v14  ;;  %v1769_v18 = vpop.f32.mrb[95].mxu0  ;;  %3240 = vtanh.f32 %v1765_v12 }
 0x1e2   : > { %3242 = vtanh.f32 %v1768_v17  ;;  %v3237_v19 = vpop.eup %3236 }
 0x1e4   : > { %v3239_v20 = vpop.eup %3238  ;;  %v1483_v21 = vpop.f32.mrb[96].mxu1 }
 0x1e5   : > { %v2757_v22 = vpack.c.bf16 %v3239_v20, %v3237_v19  ;;  %v1772_v23 = vpop.f32.mrb[96].mxu0  ;;  %v1485_v24 = vpop.f32.mrb[97].mxu1 }
 0x1e6   : > { %v1773_v25 = vadd.f32 %v1772_v23, %v1483_v21  ;;  %v1774_v26 = vpop.f32.mrb[97].mxu0  ;;  %v1486_v27 = vpop.f32.mrb[98].mxu1 }
 0x1e7   : > { %2825 = vst [vmem:[%s3537_s23 + $0xb0] sm:$0xff] %v2757_v22   ;;  %v1775_v28 = vpop.f32.mrb[98].mxu0  ;;  %v1488_v29 = vpop.f32.mrb[99].mxu1 }
 0x1e8   : > { %v1776_v30 = vadd.f32 %v1775_v28, %v1486_v27  ;;  %v1777_v31 = vpop.f32.mrb[99].mxu0  ;;  %3244 = vtanh.f32 %v1773_v25 }
 0x1ea   : > { %3246 = vtanh.f32 %v1776_v30  ;;  %v3241_v32 = vpop.eup %3240 }
 0x1ec   : > { %v3243_v33 = vpop.eup %3242  ;;  %v1491_v34 = vpop.f32.mrb[100].mxu1 }
 0x1ed   : > { %v2762_v35 = vpack.c.bf16 %v3243_v33, %v3241_v32  ;;  %v1780_v36 = vpop.f32.mrb[100].mxu0  ;;  %v1493_v37 = vpop.f32.mrb[101].mxu1 }
 0x1ee   : > { %v1781_v38 = vadd.f32 %v1780_v36, %v1491_v34  ;;  %v1782_v39 = vpop.f32.mrb[101].mxu0  ;;  %v1494_v40 = vpop.f32.mrb[102].mxu1 }
 0x1ef   : > { %2826 = vst [vmem:[%s3537_s23 + $0xb8] sm:$0xff] %v2762_v35   ;;  %v1783_v41 = vpop.f32.mrb[102].mxu0  ;;  %v1496_v42 = vpop.f32.mrb[103].mxu1 }
 0x1f0   : > { %v1784_v43 = vadd.f32 %v1783_v41, %v1494_v40  ;;  %v1785_v44 = vpop.f32.mrb[103].mxu0  ;;  %3248 = vtanh.f32 %v1781_v38 }
 0x1f2   : > { %3250 = vtanh.f32 %v1784_v43  ;;  %v3245_v45 = vpop.eup %3244 }
 0x1f4   : > { %v3247_v46 = vpop.eup %3246  ;;  %v1499_v47 = vpop.f32.mrb[104].mxu1 }
 0x1f5   : > { %v2767_v48 = vpack.c.bf16 %v3247_v46, %v3245_v45  ;;  %v1788_v49 = vpop.f32.mrb[104].mxu0  ;;  %v1501_v50 = vpop.f32.mrb[105].mxu1 }
 0x1f6   : > { %v1789_v51 = vadd.f32 %v1788_v49, %v1499_v47  ;;  %v1790_v52 = vpop.f32.mrb[105].mxu0  ;;  %v1502_v53 = vpop.f32.mrb[106].mxu1 }
 0x1f7   : > { %2827 = vst [vmem:[%s3537_s23 + $0xc0] sm:$0xff] %v2767_v48   ;;  %v1791_v54 = vpop.f32.mrb[106].mxu0  ;;  %v1504_v55 = vpop.f32.mrb[107].mxu1 }
 0x1f8   : > { %v1792_v56 = vadd.f32 %v1791_v54, %v1502_v53  ;;  %v1793_v57 = vpop.f32.mrb[107].mxu0  ;;  %3252 = vtanh.f32 %v1789_v51 }
 0x1fa   : > { %3254 = vtanh.f32 %v1792_v56  ;;  %v3249_v58 = vpop.eup %3248 }
 0x1fc   : > { %v3251_v59 = vpop.eup %3250  ;;  %v1507_v60 = vpop.f32.mrb[108].mxu1 }
 0x1fd   : > { %v2772_v61 = vpack.c.bf16 %v3251_v59, %v3249_v58  ;;  %v1796_v62 = vpop.f32.mrb[108].mxu0  ;;  %v1509_v63 = vpop.f32.mrb[109].mxu1 }
 0x1fe   : > { %v1797_v0 = vadd.f32 %v1796_v62, %v1507_v60  ;;  %v1798_v1 = vpop.f32.mrb[109].mxu0  ;;  %v1510_v2 = vpop.f32.mrb[110].mxu1 }
 0x1ff   : > { %2828 = vst [vmem:[%s3537_s23 + $0xc8] sm:$0xff] %v2772_v61   ;;  %v1799_v3 = vpop.f32.mrb[110].mxu0  ;;  %v1512_v4 = vpop.f32.mrb[111].mxu1 }
 0x200   : > { %v1800_v5 = vadd.f32 %v1799_v3, %v1510_v2  ;;  %v1801_v6 = vpop.f32.mrb[111].mxu0  ;;  %3256 = vtanh.f32 %v1797_v0 }
 0x202   : > { %3258 = vtanh.f32 %v1800_v5  ;;  %v3253_v7 = vpop.eup %3252 }
 0x204   : > { %v3255_v8 = vpop.eup %3254  ;;  %v1515_v9 = vpop.f32.mrb[112].mxu1 }
 0x205   : > { %v2777_v10 = vpack.c.bf16 %v3255_v8, %v3253_v7  ;;  %v1804_v11 = vpop.f32.mrb[112].mxu0  ;;  %v1517_v12 = vpop.f32.mrb[113].mxu1 }
 0x206   : > { %v1805_v13 = vadd.f32 %v1804_v11, %v1515_v9  ;;  %v1806_v14 = vpop.f32.mrb[113].mxu0  ;;  %v1518_v15 = vpop.f32.mrb[114].mxu1 }
 0x207   : > { %2829 = vst [vmem:[%s3537_s23 + $0xd0] sm:$0xff] %v2777_v10   ;;  %v1807_v16 = vpop.f32.mrb[114].mxu0  ;;  %v1520_v17 = vpop.f32.mrb[115].mxu1 }
 0x208   : > { %v1808_v18 = vadd.f32 %v1807_v16, %v1518_v15  ;;  %v1809_v19 = vpop.f32.mrb[115].mxu0  ;;  %3260 = vtanh.f32 %v1805_v13 }
 0x20a   : > { %3262 = vtanh.f32 %v1808_v18  ;;  %v3257_v20 = vpop.eup %3256 }
 0x20c   : > { %v3259_v21 = vpop.eup %3258  ;;  %v1523_v22 = vpop.f32.mrb[116].mxu1 }
 0x20d   : > { %v2782_v23 = vpack.c.bf16 %v3259_v21, %v3257_v20  ;;  %v1812_v24 = vpop.f32.mrb[116].mxu0  ;;  %v1525_v25 = vpop.f32.mrb[117].mxu1 }
 0x20e   : > { %v1813_v26 = vadd.f32 %v1812_v24, %v1523_v22  ;;  %v1814_v27 = vpop.f32.mrb[117].mxu0  ;;  %v1526_v28 = vpop.f32.mrb[118].mxu1 }
 0x20f   : > { %2830 = vst [vmem:[%s3537_s23 + $0xd8] sm:$0xff] %v2782_v23   ;;  %v1815_v29 = vpop.f32.mrb[118].mxu0  ;;  %v1528_v30 = vpop.f32.mrb[119].mxu1 }
 0x210   : > { %v1816_v31 = vadd.f32 %v1815_v29, %v1526_v28  ;;  %v1817_v32 = vpop.f32.mrb[119].mxu0  ;;  %3264 = vtanh.f32 %v1813_v26 }
 0x212   : > { %3266 = vtanh.f32 %v1816_v31  ;;  %v3261_v33 = vpop.eup %3260 }
 0x214   : > { %v3263_v34 = vpop.eup %3262  ;;  %v1531_v35 = vpop.f32.mrb[120].mxu1 }
 0x215   : > { %v2787_v36 = vpack.c.bf16 %v3263_v34, %v3261_v33  ;;  %v1820_v37 = vpop.f32.mrb[120].mxu0  ;;  %v1533_v38 = vpop.f32.mrb[121].mxu1 }
 0x216   : > { %v1821_v39 = vadd.f32 %v1820_v37, %v1531_v35  ;;  %v1822_v40 = vpop.f32.mrb[121].mxu0  ;;  %v1534_v41 = vpop.f32.mrb[122].mxu1 }
 0x217   : > { %2831 = vst [vmem:[%s3537_s23 + $0xe0] sm:$0xff] %v2787_v36   ;;  %v1823_v42 = vpop.f32.mrb[122].mxu0  ;;  %v1536_v43 = vpop.f32.mrb[123].mxu1 }
 0x218   : > { %v1824_v44 = vadd.f32 %v1823_v42, %v1534_v41  ;;  %v1825_v45 = vpop.f32.mrb[123].mxu0  ;;  %3268 = vtanh.f32 %v1821_v39 }
 0x21a   : > { %3270 = vtanh.f32 %v1824_v44  ;;  %v3265_v46 = vpop.eup %3264 }
 0x21c   : > { %v3267_v47 = vpop.eup %3266  ;;  %v1539_v48 = vpop.f32.mrb[124].mxu1 }
 0x21d   : > { %v2792_v49 = vpack.c.bf16 %v3267_v47, %v3265_v46  ;;  %v1828_v50 = vpop.f32.mrb[124].mxu0  ;;  %v1541_v51 = vpop.f32.mrb[125].mxu1 }
 0x21e   : > { %v1829_v52 = vadd.f32 %v1828_v50, %v1539_v48  ;;  %v1830_v53 = vpop.f32.mrb[125].mxu0  ;;  %v1542_v54 = vpop.f32.mrb[126].mxu1 }
 0x21f   : > { %2832 = vst [vmem:[%s3537_s23 + $0xe8] sm:$0xff] %v2792_v49   ;;  %v1831_v55 = vpop.f32.mrb[126].mxu0  ;;  %v1544_v56 = vpop.f32.mrb[127].mxu1 }
 0x220   : > { %v1832_v57 = vadd.f32 %v1831_v55, %v1542_v54  ;;  %v1833_v58 = vpop.f32.mrb[127].mxu0  ;;  %3272 = vtanh.f32 %v1829_v52 }
 0x222   : > { %3274 = vtanh.f32 %v1832_v57  ;;  %v3269_v59 = vpop.eup %3268 }
 0x224   : > { %v3271_v60 = vpop.eup %3270 }
 0x225   : > { %v2797_v61 = vpack.c.bf16 %v3271_v60, %v3269_v59 }
 0x227   : > { %2833 = vst [vmem:[%s3537_s23 + $0xf0] sm:$0xff] %v2797_v61  }
 0x22a   : > { %v3273_v62 = vpop.eup %3272 }
 0x22c   : > { %v3275_v63 = vpop.eup %3274 }
 0x22d   : > { %v2802_v0 = vpack.c.bf16 %v3275_v63, %v3273_v62 }
 0x22f   : > { %2834 = vst [vmem:[%s3537_s23 + $0xf8] sm:$0xff] %v2802_v0  }
 0x230 PF: > { %s12_s11 = sadd.s32 1, %s3298_s11   ;;  %s3593_s9 = smov %s3294_s10 }
 0x231   : > { %p9_p5 = scmp.ge.s32.totalorder %s12_s11, 6   ;;  %s3594_s10 = smov %s3596_s12 }
 0x233   :  { %11 = sbr.rel (!%p9_p5) target bundleno = 2 (0x2), region = 61 }

</bundles_post_ra>
